<compile_context>
chip_gen: v7x
topology: tpu7x:2x2x1
jax: 0.10.0
libtpu: 0.0.40
codegen_flags: <defaults>
</compile_context>

<pallas_src>
import functools
import numpy as np
import jax
import jax.numpy as jnp
from jax import lax
from jax.experimental import pallas as pl
from jax.experimental.pallas import tpu as pltpu

F32 = jnp.float32
_TYPES = ('ont_ent', 'ont_pred', 'img_ent', 'img_pred')


def _pad8(n):
    return ((int(n) + 7) // 8) * 8


# ------------------------- static layout of the stacked node array -----------

def make_layout(hidden_dim, num_ont_ent, num_ont_pred, num_img_ent, num_img_pred,
                emb_ent_dim, emb_pred_dim):
    H = hidden_dim
    p_oe, p_op, p_ie, p_ip = map(_pad8, (num_ont_ent, num_ont_pred,
                                         num_img_ent, num_img_pred))
    r_oe, r_op, r_ie, r_ip = 0, p_oe, p_oe + p_op, p_oe + p_op + p_ie
    return dict(H=H, HM=H // 4,
                n_oe=num_ont_ent, n_op=num_ont_pred,
                n_ie=num_img_ent, n_ip=num_img_pred,
                d_oe=emb_ent_dim, d_op=emb_pred_dim,
                p_oe=p_oe, p_op=p_op, p_ie=p_ie, p_ip=p_ip,
                r_oe=r_oe, r_op=r_op, r_ie=r_ie, r_ip=r_ip,
                R=r_ip + p_ip)


# ------------------------------ slab packing ---------------------------------

class _Slab:
    """Row-stacks small 2-D arrays into one (rows, width) f32 slab.

    Each entry starts on an 8-row (sublane) boundary so the kernel can carve it
    out with aligned static ref slices.
    """

    def __init__(self, width):
        self.width = width
        self.rows = 0
        self.index = {}      # name -> (row_offset, rows, cols)
        self.bufs = []

    def add(self, name, arr):
        arr = np.asarray(arr, dtype=np.float32)
        if arr.ndim == 1:
            arr = arr[None, :]
        r, c = arr.shape
        assert c <= self.width, (name, arr.shape)
        rp = _pad8(r)
        buf = np.zeros((rp, self.width), np.float32)
        buf[:r, :c] = arr
        self.index[name] = (self.rows, r, c)
        self.bufs.append(buf)
        self.rows += rp

    def finish(self):
        return np.concatenate(self.bufs, axis=0), self.index


def pack_ggnn_params(params, *, hidden_dim, num_ont_ent, num_ont_pred,
                     num_img_ent, num_img_pred, emb_ent_dim, emb_pred_dim):
    """Packs all weights / biases / type masks into ONE f32 slab (done once)."""
    L = make_layout(hidden_dim, num_ont_ent, num_ont_pred, num_img_ent,
                    num_img_pred, emb_ent_dim, emb_pred_dim)
    H, HM, R = L['H'], L['HM'], L['R']
    rows = {'ont_ent': (L['r_oe'], L['p_oe']), 'ont_pred': (L['r_op'], L['p_op']),
            'img_ent': (L['r_ie'], L['p_ie']), 'img_pred': (L['r_ip'], L['p_ip'])}

    def np_(x):
        return np.asarray(x, np.float32)

    def per_row(width, blocks):
        # per-type (1,width) bias broadcast over that type's (padded) row range
        out = np.zeros((R, width), np.float32)
        for t in _TYPES:
            r0, pr = rows[t]
            out[r0:r0 + pr, :] = np_(blocks[t])
        return out

    def type_mask(wpt):
        # row r of type T -> ones in columns [T*wpt : (T+1)*wpt]
        out = np.zeros((R, 4 * wpt), np.float32)
        for i, t in enumerate(_TYPES):
            r0, pr = rows[t]
            out[r0:r0 + pr, i * wpt:(i + 1) * wpt] = 1.0
        return out

    sb = _Slab(width=128)

    # --- send MLPs [H -> H/2 -> H/4], ReLU after both layers (4 types fused) ---
    sb.add('w1_send', np.concatenate([np_(params[f'send_{t}'][0]) for t in _TYPES], axis=1))
    sb.add('b1_send', np.concatenate([np_(params[f'send_{t}'][1]) for t in _TYPES], axis=1))
    sb.add('mask_send', type_mask(H // 2))
    sb.add('w2_send', np.concatenate([np_(params[f'send_{t}'][2]) for t in _TYPES], axis=0))
    sb.add('b2_send', per_row(HM, {t: np_(params[f'send_{t}'][3]) for t in _TYPES}))

    # --- receive MLPs [3H/4 -> 3H/4 -> H], ReLU after both layers --------------
    sb.add('w1_recv', np.concatenate([np_(params[f'recv_{t}'][0]) for t in _TYPES], axis=1))
    sb.add('b1_recv', np.concatenate([np_(params[f'recv_{t}'][1]) for t in _TYPES], axis=1))
    sb.add('mask_recv', type_mask(3 * HM))
    sb.add('w2_recv', np.concatenate([np_(params[f'recv_{t}'][2]) for t in _TYPES], axis=0))
    sb.add('b2_recv', per_row(H, {t: np_(params[f'recv_{t}'][3]) for t in _TYPES}))

    # --- GRU (eqs. 3-5): gates fused per type, node types fused via vstack -----
    # per-type param order: (w3,b3,u3,c3,w4,b4,u4,c4,w5,b5,u5,c5)
    g = {t: [np_(x) for x in params[f'gru_{t}']] for t in _TYPES}
    sb.add('w_gru_m', np.concatenate(
        [np.concatenate([g[t][0], g[t][4], g[t][8]], axis=1) for t in _TYPES], axis=0))
    sb.add('b_gru_m', per_row(3 * H, {t: np.concatenate([g[t][1], g[t][5], g[t][9]], axis=1)
                                      for t in _TYPES}))
    sb.add('u_gru_zr', np.concatenate(
        [np.concatenate([g[t][2], g[t][6]], axis=1) for t in _TYPES], axis=0))
    sb.add('c_gru_zr', per_row(2 * H, {t: np.concatenate([g[t][3], g[t][7]], axis=1)
                                       for t in _TYPES}))
    sb.add('u_gru_h', np.concatenate([g[t][10] for t in _TYPES], axis=0))
    sb.add('c_gru_h', per_row(H, {t: g[t][11] for t in _TYPES}))
    sb.add('mask_gru', type_mask(H))

    # --- output projections (ont_pred, img_pred) [H -> H -> H], ReLU after L1 --
    R_out = L['p_op'] + L['p_ie'] + L['p_ip']
    sb.add('w1_out', np.concatenate([np_(params['out_ont_pred'][0]),
                                     np_(params['out_img_pred'][0])], axis=1))
    sb.add('b1_out', np.concatenate([np_(params['out_ont_pred'][1]),
                                     np_(params['out_img_pred'][1])], axis=1))
    mo = np.zeros((R_out, 2 * H), np.float32)
    mo[0:L['p_op'], 0:H] = 1.0
    mo[L['p_op'] + L['p_ie']:R_out, H:2 * H] = 1.0
    sb.add('mask_out', mo)
    sb.add('w2_out', np.concatenate([np_(params['out_ont_pred'][2]),
                                     np_(params['out_img_pred'][2])], axis=0))
    b2o = np.zeros((R_out, H), np.float32)
    b2o[0:L['p_op'], :] = np_(params['out_ont_pred'][3])
    b2o[L['p_op'] + L['p_ie']:R_out, :] = np_(params['out_img_pred'][3])
    sb.add('b2_out', b2o)

    # --- initial ontology-node projections --------------------------------------
    sb.add('w_init_oe', np_(params['fc_init_ont_ent'][0]))
    sb.add('b_init_oe', np_(params['fc_init_ont_ent'][1]))
    sb.add('w_init_op', np_(params['fc_init_ont_pred'][0]))
    sb.add('b_init_op', np_(params['fc_init_ont_pred'][1]))

    # --- mask that zeroes the padded img_pred rows of the soft predicate edges --
    rm = np.zeros((L['p_ip'], L['n_op']), np.float32)
    rm[:L['n_ip'], :] = 1.0
    sb.add('rowmask_ip', rm)

    wslab, windex = sb.finish()
    # TODO(synk): cast the slab to bf16 for the matmul operands on v6e/v7x once
    # shapes grow beyond toy size (keep f32 accumulation + elementwise math).
    return jnp.asarray(wslab), windex, L


def _dslab_layout(L):
    entries = [('emb_oe', L['p_oe'], L['d_oe']),
               ('emb_op', L['p_op'], L['d_op']),
               ('feat_ie', L['p_ie'], L['H']),
               ('feat_ip', L['p_ip'], L['H']),
               ('e01', 2 * L['R'], L['p_ie'] + L['p_ip']),
               ('e2', L['R'], L['R'])]
    width = max(c for _, _, c in entries)
    index, off = {}, 0
    for name, r, c in entries:
        index[name] = (off, r, c)
        off += _pad8(r)
    return index, off, width


# ----------------------------- fused kernel -----------------------------------

def _ggnn_kernel(d_ref, w_ref, logits_ref, *, T, wix, dix, L):
    H, HM, R = L['H'], L['HM'], L['R']
    r_op, r_ie, r_ip = L['r_op'], L['r_ie'], L['r_ip']
    p_op, p_ie, p_ip = L['p_op'], L['p_ie'], L['p_ip']
    n_op = L['n_op']

    def W(name):                       # static slice-load from the weight slab
        off, nr, nc = wix[name]
        return w_ref[off:off + nr, 0:nc]

    def D(name):                       # static slice-load from the data slab
        off, nr, nc = dix[name]
        return d_ref[off:off + nr, 0:nc]

    def dot(a, b):
        return jnp.dot(a, b, preferred_element_type=jnp.float32)

    def relu(x):
        return jnp.maximum(x, 0.0)

    # ---- initial node states (once): ontology nodes through their init Linear,
    #      image nodes straight from the (row-padded) features --------------------
    nodes0 = jnp.concatenate([
        dot(D('emb_oe'), W('w_init_oe')) + W('b_init_oe'),
        dot(D('emb_op'), W('w_init_op')) + W('b_init_op'),
        D('feat_ie'),
        D('feat_ip'),
    ], axis=0)                                                    # (R, H)

    e_pred0 = jnp.zeros((p_ip, n_op), F32)   # edges_img2ont_pred at t=0 (exact zeros)
    logits0 = jnp.zeros((p_ip, n_op), F32)

    def step(_, carry):
        nodes, e_pred, _ = carry

        # ---------- send MLPs: all 4 node types in 2 matmuls ----------
        h1 = relu(dot(nodes, W('w1_send')) + W('b1_send')) * W('mask_send')
        ms = relu(dot(h1, W('w2_send')) + W('b2_send'))           # (R, HM)

        # ---------- message aggregation in 2 matmuls ----------
        # slots 0/1 (subject / object one-hot edges), both image targets at once:
        s01 = dot(D('e01'), ms[r_ie:R, :])                        # (2R, HM)
        # slot 2: static ontology<->image blocks + current soft predicate edges.
        # e_pred is zero on entry to step 0, so the t=0 predicate terms vanish
        # for free (review: "peel iteration 0").
        e_pred_t = e_pred.T                                       # (n_op, p_ip)
        if n_op < p_op:
            e_pred_t = jnp.concatenate(
                [e_pred_t, jnp.zeros((p_op - n_op, p_ip), F32)], axis=0)
        row_op = jnp.concatenate(
            [jnp.zeros((p_op, r_ip), F32), e_pred_t], axis=1)     # (p_op, R)
        row_ip = jnp.concatenate(
            [jnp.zeros((p_ip, r_op), F32), e_pred,
             jnp.zeros((p_ip, R - r_op - n_op), F32)], axis=1)    # (p_ip, R)
        e2s = D('e2')
        e2 = jnp.concatenate([e2s[0:r_op], row_op,
                              e2s[r_ie:r_ip], row_ip], axis=0)    # (R, R)
        s2 = dot(e2, ms)                                          # (R, HM)
        agg = jnp.concatenate([s01[0:R], s01[R:2 * R], s2], axis=1)   # (R, 3*HM)

        # ---------- receive MLPs: all 4 node types in 2 matmuls ----------
        g1 = relu(dot(agg, W('w1_recv')) + W('b1_recv')) * W('mask_recv')
        mr = relu(dot(g1, W('w2_recv')) + W('b2_recv'))           # (R, H)

        # ---------- GGNN update (eqs. 3-6): gates + node types fused, 3 matmuls --
        gmask = W('mask_gru')                                     # (R, 4H)
        m_sp = jnp.concatenate([mr, mr, mr, mr], axis=1) * gmask
        h_sp = jnp.concatenate([nodes, nodes, nodes, nodes], axis=1) * gmask
        gm = dot(m_sp, W('w_gru_m')) + W('b_gru_m')               # (R, 3H): [z|r|h~]
        gh = dot(h_sp, W('u_gru_zr')) + W('c_gru_zr')             # (R, 2H): [z|r]
        zr = jax.nn.sigmoid(gm[:, 0:2 * H] + gh)
        z = zr[:, 0:H]
        r = zr[:, H:2 * H]
        rh_sp = jnp.concatenate([r * nodes] * 4, axis=1) * gmask
        hh = jnp.tanh(gm[:, 2 * H:3 * H] + dot(rh_sp, W('u_gru_h')) + W('c_gru_h'))
        nodes = (1.0 - z) * nodes + z * hh

        # ---------- output projections (ont_pred + img_pred) in 2 matmuls --------
        x = nodes[r_op:R, :]                                      # op | ie | ip rows
        p1 = relu(dot(x, W('w1_out')) + W('b1_out')) * W('mask_out')
        p2 = dot(p1, W('w2_out')) + W('b2_out')
        proj_op = p2[0:n_op, :]
        proj_ip = p2[p_op + p_ie:p_op + p_ie + p_ip, :]

        # ---------- predicate logits + single softmax ----------
        logits = lax.dot_general(proj_ip, proj_op, (((1,), (1,)), ((), ())),
                                 preferred_element_type=jnp.float32)  # (p_ip, n_op)
        mx = jnp.max(logits, axis=1, keepdims=True)
        ex = jnp.exp(logits - mx)
        inv = pl.reciprocal(jnp.sum(ex, axis=1, keepdims=True), approx=True)
        e_pred_new = ex * inv * W('rowmask_ip')   # zero the padded img_pred rows
        return nodes, e_pred_new, logits

    _, _, logits = lax.fori_loop(0, T, step, (nodes0, e_pred0, logits0),
                                 unroll=True)
    logits_ref[...] = logits


# ----------------------------- forward factory --------------------------------

def make_ggnn_forward(wslab_index, L, time_step_num=3, use_knowledge=False,
                      refine_obj_cls=False):
    # TODO(synk): use_knowledge=True (non-zero ontology adjacency, possibly with
    # multiple edge types) and refine_obj_cls=True are not implemented in the
    # fused kernel; the exercised synthetic config uses neither.
    assert not use_knowledge and not refine_obj_cls
    didx, drows, dwidth = _dslab_layout(L)
    kernel = functools.partial(_ggnn_kernel, T=time_step_num, wix=wslab_index,
                               dix=didx, L=L)

    @jax.jit
    def forward(wslab, rel_inds, obj_probs, obj_fmaps, vr, emb_ent, emb_pred):
        assert obj_probs.shape == (L['n_ie'], L['n_oe'])
        assert obj_fmaps.shape == (L['n_ie'], L['H'])
        assert vr.shape == (L['n_ip'], L['H'])
        assert rel_inds.shape == (L['n_ip'], 2)

        # One-hot edges + static edge blocks are folded into a single data slab
        # (one DMA) instead of many tiny operands / host-side transposes per call.
        p2s = jax.nn.one_hot(rel_inds[:, 0], L['n_ie'], dtype=F32)
        p2o = jax.nn.one_hot(rel_inds[:, 1], L['n_ie'], dtype=F32)
        e01 = jnp.zeros((2 * L['R'], L['p_ie'] + L['p_ip']), F32)
        e01 = e01.at[L['r_ie']:L['r_ie'] + L['n_ie'],
                     L['p_ie']:L['p_ie'] + L['n_ip']].set(p2s.T)
        e01 = e01.at[L['r_ip']:L['r_ip'] + L['n_ip'], 0:L['n_ie']].set(p2s)
        e01 = e01.at[L['R'] + L['r_ie']:L['R'] + L['r_ie'] + L['n_ie'],
                     L['p_ie']:L['p_ie'] + L['n_ip']].set(p2o.T)
        e01 = e01.at[L['R'] + L['r_ip']:L['R'] + L['r_ip'] + L['n_ip'],
                     0:L['n_ie']].set(p2o)
        e2 = jnp.zeros((L['R'], L['R']), F32)
        e2 = e2.at[L['r_oe']:L['r_oe'] + L['n_oe'],
                   L['r_ie']:L['r_ie'] + L['n_ie']].set(obj_probs.T)
        e2 = e2.at[L['r_ie']:L['r_ie'] + L['n_ie'],
                   L['r_oe']:L['r_oe'] + L['n_oe']].set(obj_probs)

        dslab = jnp.zeros((drows, dwidth), F32)
        for name, arr in (('emb_oe', emb_ent), ('emb_op', emb_pred),
                          ('feat_ie', obj_fmaps), ('feat_ip', vr),
                          ('e01', e01), ('e2', e2)):
            off, _, _ = didx[name]
            arr = arr.astype(F32)
            dslab = dslab.at[off:off + arr.shape[0], 0:arr.shape[1]].set(arr)

        logits_padded = pl.pallas_call(
            kernel,
            out_shape=jax.ShapeDtypeStruct((L['p_ip'], L['n_op']), F32),
            # TODO(synk): at production scene-graph sizes add a BlockSpec grid
            # over the img_pred axis (softmax is row-wise so it tiles safely) to
            # stay inside v7x's 64 MiB VMEM, and a leading batched "parallel"
            # grid axis to occupy v7x's second TensorCore.
            compiler_params=pltpu.CompilerParams(
                vmem_limit_bytes=32 * 1024 * 1024),
        )(dslab, wslab)

        pred_cls_logits = logits_padded[:L['n_ip'], :]
        return pred_cls_logits, None    # refine_obj_cls=False -> ent logits None

    return forward


# ----------------------------- parameter init ----------------------------------

def init_linear(key, fan_in, fan_out):
    k1, k2 = jax.random.split(key)
    bound = 1.0 / np.sqrt(fan_in)
    w = jax.random.uniform(k1, (fan_in, fan_out), F32, -bound, bound)
    b = jax.random.uniform(k2, (1, fan_out), F32, -bound, bound)
    return w, b


def init_mlp(key, dims):
    k1, k2 = jax.random.split(key)
    w1, b1 = init_linear(k1, dims[0], dims[1])
    w2, b2 = init_linear(k2, dims[1], dims[2])
    return (w1, b1, w2, b2)


def init_gru(key, h):
    # order: eq3_w, eq3_u, eq4_w, eq4_u, eq5_w, eq5_u (each W, b)
    ks = jax.random.split(key, 6)
    ps = []
    for k in ks:
        w, b = init_linear(k, h, h)
        ps.extend([w, b])
    return tuple(ps)


# ----------------------------- main ---------------------------------------------

if __name__ == "__main__":
    H = 32                         # hidden_dim
    N_ONT_ENT, N_ONT_PRED = 16, 8
    N_IMG_ENT, N_IMG_PRED = 4, 6
    T = 3                          # time_step_num

    keys = jax.random.split(jax.random.PRNGKey(0), 20)
    ki = iter(keys)

    emb_ent = jnp.eye(N_ONT_ENT, dtype=F32)    # use_embedding=False -> identity
    emb_pred = jnp.eye(N_ONT_PRED, dtype=F32)

    params = {
        'fc_init_ont_ent': init_linear(next(ki), N_ONT_ENT, H),
        'fc_init_ont_pred': init_linear(next(ki), N_ONT_PRED, H),
        'send_ont_ent': init_mlp(next(ki), [H, H // 2, H // 4]),
        'send_ont_pred': init_mlp(next(ki), [H, H // 2, H // 4]),
        'send_img_ent': init_mlp(next(ki), [H, H // 2, H // 4]),
        'send_img_pred': init_mlp(next(ki), [H, H // 2, H // 4]),
        'recv_ont_ent': init_mlp(next(ki), [3 * H // 4, 3 * H // 4, H]),
        'recv_ont_pred': init_mlp(next(ki), [3 * H // 4, 3 * H // 4, H]),
        'recv_img_ent': init_mlp(next(ki), [3 * H // 4, 3 * H // 4, H]),
        'recv_img_pred': init_mlp(next(ki), [3 * H // 4, 3 * H // 4, H]),
        'gru_ont_ent': init_gru(next(ki), H),
        'gru_ont_pred': init_gru(next(ki), H),
        'gru_img_ent': init_gru(next(ki), H),
        'gru_img_pred': init_gru(next(ki), H),
        'out_img_pred': init_mlp(next(ki), [H, H, H]),
        'out_ont_pred': init_mlp(next(ki), [H, H, H]),
    }

    dkeys = jax.random.split(jax.random.PRNGKey(1), 4)
    rel_inds = jax.random.randint(dkeys[0], (N_IMG_PRED, 2), 0, N_IMG_ENT,
                                  dtype=jnp.int32)
    obj_probs = jax.nn.softmax(
        jax.random.normal(dkeys[1], (N_IMG_ENT, N_ONT_ENT), F32), axis=1)
    obj_fmaps = jax.random.normal(dkeys[2], (N_IMG_ENT, H), F32)
    vr = jax.random.normal(dkeys[3], (N_IMG_PRED, H), F32)

    # Pack every weight/bias/mask into one slab ONCE (outside jit).
    wslab, windex, L = pack_ggnn_params(
        params, hidden_dim=H,
        num_ont_ent=N_ONT_ENT, num_ont_pred=N_ONT_PRED,
        num_img_ent=N_IMG_ENT, num_img_pred=N_IMG_PRED,
        emb_ent_dim=int(emb_ent.shape[1]), emb_pred_dim=int(emb_pred.shape[1]))

    ggnn_forward = make_ggnn_forward(windex, L, time_step_num=T)
    pred_cls_logits, ent_cls_logits = ggnn_forward(
        wslab, rel_inds, obj_probs, obj_fmaps, vr, emb_ent, emb_pred)

    jax.block_until_ready(pred_cls_logits)
    assert pred_cls_logits.shape == (N_IMG_PRED, N_ONT_PRED)
    assert pred_cls_logits.dtype == jnp.float32
    assert bool(jnp.all(jnp.isfinite(pred_cls_logits)))
    assert ent_cls_logits is None
    print("KERNEL_OK")
</pallas_src>

<mosaic_0001>
module attributes {stable_mosaic.version = 11 : i64} {
  func.func @_ggnn_kernel(%arg0: memref<160x40xf32, #tpu.memory_space<vmem>>, %arg1: memref<1136x128xf32, #tpu.memory_space<vmem>>, %arg2: memref<8x8xf32, #tpu.memory_space<vmem>>) attributes {dimension_semantics = [], scalar_prefetch = 0 : i64, scratch_operands = 0 : i64, tpu.core_type = #tpu.core_type<tc>} {
    %c0 = arith.constant 0 : index
    %c0_0 = arith.constant 0 : index
    %0 = vector.load %arg0[%c0, %c0_0] : memref<160x40xf32, #tpu.memory_space<vmem>>, vector<16x16xf32>
    %c1088 = arith.constant 1088 : index
    %c0_1 = arith.constant 0 : index
    %1 = vector.load %arg1[%c1088, %c0_1] : memref<1136x128xf32, #tpu.memory_space<vmem>>, vector<16x32xf32>
    %cst = arith.constant dense<0.000000e+00> : vector<16x32xf32>
    %2 = tpu.matmul %0, %1, %cst {dimension_numbers = #tpu.dot_dimension_numbers<[1], [0], [0], [1], [0, 0, 1, 1], [], []>} : vector<16x16xf32>, vector<16x32xf32>, vector<16x32xf32> -> vector<16x32xf32>
    %c1104 = arith.constant 1104 : index
    %c0_2 = arith.constant 0 : index
    %3 = vector.load %arg1[%c1104, %c0_2] : memref<1136x128xf32, #tpu.memory_space<vmem>>, vector<1x32xf32>
    %4 = vector.broadcast %3 : vector<1x32xf32> to vector<16x32xf32>
    %5 = arith.addf %2, %4 : vector<16x32xf32>
    %c16 = arith.constant 16 : index
    %c0_3 = arith.constant 0 : index
    %6 = vector.load %arg0[%c16, %c0_3] : memref<160x40xf32, #tpu.memory_space<vmem>>, vector<8x8xf32>
    %c1112 = arith.constant 1112 : index
    %c0_4 = arith.constant 0 : index
    %7 = vector.load %arg1[%c1112, %c0_4] : memref<1136x128xf32, #tpu.memory_space<vmem>>, vector<8x32xf32>
    %cst_5 = arith.constant dense<0.000000e+00> : vector<8x32xf32>
    %8 = tpu.matmul %6, %7, %cst_5 {dimension_numbers = #tpu.dot_dimension_numbers<[1], [0], [0], [1], [0, 0, 1, 1], [], []>} : vector<8x8xf32>, vector<8x32xf32>, vector<8x32xf32> -> vector<8x32xf32>
    %c1120 = arith.constant 1120 : index
    %c0_6 = arith.constant 0 : index
    %9 = vector.load %arg1[%c1120, %c0_6] : memref<1136x128xf32, #tpu.memory_space<vmem>>, vector<1x32xf32>
    %10 = vector.broadcast %9 : vector<1x32xf32> to vector<8x32xf32>
    %11 = arith.addf %8, %10 : vector<8x32xf32>
    %c24 = arith.constant 24 : index
    %c0_7 = arith.constant 0 : index
    %12 = vector.load %arg0[%c24, %c0_7] : memref<160x40xf32, #tpu.memory_space<vmem>>, vector<8x32xf32>
    %c32 = arith.constant 32 : index
    %c0_8 = arith.constant 0 : index
    %13 = vector.load %arg0[%c32, %c0_8] : memref<160x40xf32, #tpu.memory_space<vmem>>, vector<8x32xf32>
    %14 = tpu.concatenate %5, %11, %12, %13 in 0 : vector<16x32xf32>, vector<8x32xf32>, vector<8x32xf32>, vector<8x32xf32> -> vector<40x32xf32>
    %cst_9 = arith.constant 0.000000e+00 : f32
    %15 = vector.broadcast %cst_9 : f32 to vector<8x8xf32>
    %cst_10 = arith.constant 0.000000e+00 : f32
    %16 = vector.broadcast %cst_10 : f32 to vector<8x8xf32>
    %c0_i32 = arith.constant 0 : i32
    %c0_11 = arith.constant 0 : index
    %c0_12 = arith.constant 0 : index
    %17 = vector.load %arg1[%c0_11, %c0_12] : memref<1136x128xf32, #tpu.memory_space<vmem>>, vector<32x64xf32>
    %cst_13 = arith.constant dense<0.000000e+00> : vector<40x64xf32>
    %18 = tpu.matmul %14, %17, %cst_13 {dimension_numbers = #tpu.dot_dimension_numbers<[1], [0], [0], [1], [0, 0, 1, 1], [], []>} : vector<40x32xf32>, vector<32x64xf32>, vector<40x64xf32> -> vector<40x64xf32>
    %c32_14 = arith.constant 32 : index
    %c0_15 = arith.constant 0 : index
    %19 = vector.load %arg1[%c32_14, %c0_15] : memref<1136x128xf32, #tpu.memory_space<vmem>>, vector<1x64xf32>
    %20 = vector.broadcast %19 : vector<1x64xf32> to vector<40x64xf32>
    %21 = arith.addf %18, %20 : vector<40x64xf32>
    %cst_16 = arith.constant 0.000000e+00 : f32
    %22 = vector.broadcast %cst_16 : f32 to vector<40x64xf32>
    %23 = arith.maximumf %21, %22 : vector<40x64xf32>
    %c40 = arith.constant 40 : index
    %c0_17 = arith.constant 0 : index
    %24 = vector.load %arg1[%c40, %c0_17] : memref<1136x128xf32, #tpu.memory_space<vmem>>, vector<40x64xf32>
    %25 = arith.mulf %23, %24 : vector<40x64xf32>
    %c80 = arith.constant 80 : index
    %c0_18 = arith.constant 0 : index
    %26 = vector.load %arg1[%c80, %c0_18] : memref<1136x128xf32, #tpu.memory_space<vmem>>, vector<64x8xf32>
    %cst_19 = arith.constant dense<0.000000e+00> : vector<40x8xf32>
    %27 = tpu.matmul %25, %26, %cst_19 {dimension_numbers = #tpu.dot_dimension_numbers<[1], [0], [0], [1], [0, 0, 1, 1], [], []>} : vector<40x64xf32>, vector<64x8xf32>, vector<40x8xf32> -> vector<40x8xf32>
    %c144 = arith.constant 144 : index
    %c0_20 = arith.constant 0 : index
    %28 = vector.load %arg1[%c144, %c0_20] : memref<1136x128xf32, #tpu.memory_space<vmem>>, vector<40x8xf32>
    %29 = arith.addf %27, %28 : vector<40x8xf32>
    %cst_21 = arith.constant 0.000000e+00 : f32
    %30 = vector.broadcast %cst_21 : f32 to vector<40x8xf32>
    %31 = arith.maximumf %29, %30 : vector<40x8xf32>
    %c40_22 = arith.constant 40 : index
    %c0_23 = arith.constant 0 : index
    %32 = vector.load %arg0[%c40_22, %c0_23] : memref<160x40xf32, #tpu.memory_space<vmem>>, vector<80x16xf32>
    %33 = vector.extract_strided_slice %31 {offsets = [24, 0], sizes = [16, 8], strides = [1, 1]} : vector<40x8xf32> to vector<16x8xf32>
    %cst_24 = arith.constant dense<0.000000e+00> : vector<80x8xf32>
    %34 = tpu.matmul %32, %33, %cst_24 {dimension_numbers = #tpu.dot_dimension_numbers<[1], [0], [0], [1], [0, 0, 1, 1], [], []>} : vector<80x16xf32>, vector<16x8xf32>, vector<80x8xf32> -> vector<80x8xf32>
    %35 = tpu.transpose %15, [1, 0] : vector<8x8xf32> -> vector<8x8xf32>
    %cst_25 = arith.constant 0.000000e+00 : f32
    %36 = vector.broadcast %cst_25 : f32 to vector<8x32xf32>
    %37 = tpu.concatenate %36, %35 in 1 : vector<8x32xf32>, vector<8x8xf32> -> vector<8x40xf32>
    %cst_26 = arith.constant 0.000000e+00 : f32
    %38 = vector.broadcast %cst_26 : f32 to vector<8x16xf32>
    %cst_27 = arith.constant 0.000000e+00 : f32
    %39 = vector.broadcast %cst_27 : f32 to vector<8x16xf32>
    %40 = tpu.concatenate %38, %15, %39 in 1 : vector<8x16xf32>, vector<8x8xf32>, vector<8x16xf32> -> vector<8x40xf32>
    %c120 = arith.constant 120 : index
    %c0_28 = arith.constant 0 : index
    %41 = vector.load %arg0[%c120, %c0_28] : memref<160x40xf32, #tpu.memory_space<vmem>>, vector<40x40xf32>
    %42 = vector.extract_strided_slice %41 {offsets = [0, 0], sizes = [16, 40], strides = [1, 1]} : vector<40x40xf32> to vector<16x40xf32>
    %43 = vector.extract_strided_slice %41 {offsets = [24, 0], sizes = [8, 40], strides = [1, 1]} : vector<40x40xf32> to vector<8x40xf32>
    %44 = tpu.concatenate %42, %37, %43, %40 in 0 : vector<16x40xf32>, vector<8x40xf32>, vector<8x40xf32>, vector<8x40xf32> -> vector<40x40xf32>
    %cst_29 = arith.constant dense<0.000000e+00> : vector<40x8xf32>
    %45 = tpu.matmul %44, %31, %cst_29 {dimension_numbers = #tpu.dot_dimension_numbers<[1], [0], [0], [1], [0, 0, 1, 1], [], []>} : vector<40x40xf32>, vector<40x8xf32>, vector<40x8xf32> -> vector<40x8xf32>
    %46 = vector.extract_strided_slice %34 {offsets = [0, 0], sizes = [40, 8], strides = [1, 1]} : vector<80x8xf32> to vector<40x8xf32>
    %47 = vector.extract_strided_slice %34 {offsets = [40, 0], sizes = [40, 8], strides = [1, 1]} : vector<80x8xf32> to vector<40x8xf32>
    %48 = tpu.concatenate %46, %47, %45 in 1 : vector<40x8xf32>, vector<40x8xf32>, vector<40x8xf32> -> vector<40x24xf32>
    %c184 = arith.constant 184 : index
    %c0_30 = arith.constant 0 : index
    %49 = vector.load %arg1[%c184, %c0_30] : memref<1136x128xf32, #tpu.memory_space<vmem>>, vector<24x96xf32>
    %cst_31 = arith.constant dense<0.000000e+00> : vector<40x96xf32>
    %50 = tpu.matmul %48, %49, %cst_31 {dimension_numbers = #tpu.dot_dimension_numbers<[1], [0], [0], [1], [0, 0, 1, 1], [], []>} : vector<40x24xf32>, vector<24x96xf32>, vector<40x96xf32> -> vector<40x96xf32>
    %c208 = arith.constant 208 : index
    %c0_32 = arith.constant 0 : index
    %51 = vector.load %arg1[%c208, %c0_32] : memref<1136x128xf32, #tpu.memory_space<vmem>>, vector<1x96xf32>
    %52 = vector.broadcast %51 : vector<1x96xf32> to vector<40x96xf32>
    %53 = arith.addf %50, %52 : vector<40x96xf32>
    %cst_33 = arith.constant 0.000000e+00 : f32
    %54 = vector.broadcast %cst_33 : f32 to vector<40x96xf32>
    %55 = arith.maximumf %53, %54 : vector<40x96xf32>
    %c216 = arith.constant 216 : index
    %c0_34 = arith.constant 0 : index
    %56 = vector.load %arg1[%c216, %c0_34] : memref<1136x128xf32, #tpu.memory_space<vmem>>, vector<40x96xf32>
    %57 = arith.mulf %55, %56 : vector<40x96xf32>
    %c256 = arith.constant 256 : index
    %c0_35 = arith.constant 0 : index
    %58 = vector.load %arg1[%c256, %c0_35] : memref<1136x128xf32, #tpu.memory_space<vmem>>, vector<96x32xf32>
    %cst_36 = arith.constant dense<0.000000e+00> : vector<40x32xf32>
    %59 = tpu.matmul %57, %58, %cst_36 {dimension_numbers = #tpu.dot_dimension_numbers<[1], [0], [0], [1], [0, 0, 1, 1], [], []>} : vector<40x96xf32>, vector<96x32xf32>, vector<40x32xf32> -> vector<40x32xf32>
    %c352 = arith.constant 352 : index
    %c0_37 = arith.constant 0 : index
    %60 = vector.load %arg1[%c352, %c0_37] : memref<1136x128xf32, #tpu.memory_space<vmem>>, vector<40x32xf32>
    %61 = arith.addf %59, %60 : vector<40x32xf32>
    %cst_38 = arith.constant 0.000000e+00 : f32
    %62 = vector.broadcast %cst_38 : f32 to vector<40x32xf32>
    %63 = arith.maximumf %61, %62 : vector<40x32xf32>
    %c896 = arith.constant 896 : index
    %c0_39 = arith.constant 0 : index
    %64 = vector.load %arg1[%c896, %c0_39] : memref<1136x128xf32, #tpu.memory_space<vmem>>, vector<40x128xf32>
    %65 = tpu.concatenate %63, %63, %63, %63 in 1 : vector<40x32xf32>, vector<40x32xf32>, vector<40x32xf32>, vector<40x32xf32> -> vector<40x128xf32>
    %66 = arith.mulf %65, %64 : vector<40x128xf32>
    %67 = tpu.concatenate %14, %14, %14, %14 in 1 : vector<40x32xf32>, vector<40x32xf32>, vector<40x32xf32>, vector<40x32xf32> -> vector<40x128xf32>
    %68 = arith.mulf %67, %64 : vector<40x128xf32>
    %c392 = arith.constant 392 : index
    %c0_40 = arith.constant 0 : index
    %69 = vector.load %arg1[%c392, %c0_40] : memref<1136x128xf32, #tpu.memory_space<vmem>>, vector<128x96xf32>
    %cst_41 = arith.constant dense<0.000000e+00> : vector<40x96xf32>
    %70 = tpu.matmul %66, %69, %cst_41 {dimension_numbers = #tpu.dot_dimension_numbers<[1], [0], [0], [1], [0, 0, 1, 1], [], []>} : vector<40x128xf32>, vector<128x96xf32>, vector<40x96xf32> -> vector<40x96xf32>
    %c520 = arith.constant 520 : index
    %c0_42 = arith.constant 0 : index
    %71 = vector.load %arg1[%c520, %c0_42] : memref<1136x128xf32, #tpu.memory_space<vmem>>, vector<40x96xf32>
    %72 = arith.addf %70, %71 : vector<40x96xf32>
    %c560 = arith.constant 560 : index
    %c0_43 = arith.constant 0 : index
    %73 = vector.load %arg1[%c560, %c0_43] : memref<1136x128xf32, #tpu.memory_space<vmem>>, vector<128x64xf32>
    %cst_44 = arith.constant dense<0.000000e+00> : vector<40x64xf32>
    %74 = tpu.matmul %68, %73, %cst_44 {dimension_numbers = #tpu.dot_dimension_numbers<[1], [0], [0], [1], [0, 0, 1, 1], [], []>} : vector<40x128xf32>, vector<128x64xf32>, vector<40x64xf32> -> vector<40x64xf32>
    %c688 = arith.constant 688 : index
    %c0_45 = arith.constant 0 : index
    %75 = vector.load %arg1[%c688, %c0_45] : memref<1136x128xf32, #tpu.memory_space<vmem>>, vector<40x64xf32>
    %76 = arith.addf %74, %75 : vector<40x64xf32>
    %77 = vector.extract_strided_slice %72 {offsets = [0, 0], sizes = [40, 64], strides = [1, 1]} : vector<40x96xf32> to vector<40x64xf32>
    %78 = arith.addf %77, %76 : vector<40x64xf32>
    %79 = arith.negf %78 : vector<40x64xf32>
    %80 = math.exp %79 : vector<40x64xf32>
    %cst_46 = arith.constant 1.000000e+00 : f32
    %81 = vector.broadcast %cst_46 : f32 to vector<40x64xf32>
    %82 = arith.addf %81, %80 : vector<40x64xf32>
    %83 = arith.divf %81, %82 : vector<40x64xf32>
    %84 = vector.extract_strided_slice %83 {offsets = [0, 0], sizes = [40, 32], strides = [1, 1]} : vector<40x64xf32> to vector<40x32xf32>
    %85 = vector.extract_strided_slice %83 {offsets = [0, 32], sizes = [40, 32], strides = [1, 1]} : vector<40x64xf32> to vector<40x32xf32>
    %86 = arith.mulf %85, %14 : vector<40x32xf32>
    %87 = tpu.concatenate %86, %86, %86, %86 in 1 : vector<40x32xf32>, vector<40x32xf32>, vector<40x32xf32>, vector<40x32xf32> -> vector<40x128xf32>
    %88 = arith.mulf %87, %64 : vector<40x128xf32>
    %89 = vector.extract_strided_slice %72 {offsets = [0, 64], sizes = [40, 32], strides = [1, 1]} : vector<40x96xf32> to vector<40x32xf32>
    %c728 = arith.constant 728 : index
    %c0_47 = arith.constant 0 : index
    %90 = vector.load %arg1[%c728, %c0_47] : memref<1136x128xf32, #tpu.memory_space<vmem>>, vector<128x32xf32>
    %cst_48 = arith.constant dense<0.000000e+00> : vector<40x32xf32>
    %91 = tpu.matmul %88, %90, %cst_48 {dimension_numbers = #tpu.dot_dimension_numbers<[1], [0], [0], [1], [0, 0, 1, 1], [], []>} : vector<40x128xf32>, vector<128x32xf32>, vector<40x32xf32> -> vector<40x32xf32>
    %92 = arith.addf %89, %91 : vector<40x32xf32>
    %c856 = arith.constant 856 : index
    %c0_49 = arith.constant 0 : index
    %93 = vector.load %arg1[%c856, %c0_49] : memref<1136x128xf32, #tpu.memory_space<vmem>>, vector<40x32xf32>
    %94 = arith.addf %92, %93 : vector<40x32xf32>
    %95 = math.tanh %94 : vector<40x32xf32>
    %cst_50 = arith.constant 1.000000e+00 : f32
    %96 = vector.broadcast %cst_50 : f32 to vector<40x32xf32>
    %97 = arith.subf %96, %84 : vector<40x32xf32>
    %98 = arith.mulf %97, %14 : vector<40x32xf32>
    %99 = arith.mulf %84, %95 : vector<40x32xf32>
    %100 = arith.addf %98, %99 : vector<40x32xf32>
    %101 = vector.extract_strided_slice %100 {offsets = [16, 0], sizes = [24, 32], strides = [1, 1]} : vector<40x32xf32> to vector<24x32xf32>
    %c936 = arith.constant 936 : index
    %c0_51 = arith.constant 0 : index
    %102 = vector.load %arg1[%c936, %c0_51] : memref<1136x128xf32, #tpu.memory_space<vmem>>, vector<32x64xf32>
    %cst_52 = arith.constant dense<0.000000e+00> : vector<24x64xf32>
    %103 = tpu.matmul %101, %102, %cst_52 {dimension_numbers = #tpu.dot_dimension_numbers<[1], [0], [0], [1], [0, 0, 1, 1], [], []>} : vector<24x32xf32>, vector<32x64xf32>, vector<24x64xf32> -> vector<24x64xf32>
    %c968 = arith.constant 968 : index
    %c0_53 = arith.constant 0 : index
    %104 = vector.load %arg1[%c968, %c0_53] : memref<1136x128xf32, #tpu.memory_space<vmem>>, vector<1x64xf32>
    %105 = vector.broadcast %104 : vector<1x64xf32> to vector<24x64xf32>
    %106 = arith.addf %103, %105 : vector<24x64xf32>
    %cst_54 = arith.constant 0.000000e+00 : f32
    %107 = vector.broadcast %cst_54 : f32 to vector<24x64xf32>
    %108 = arith.maximumf %106, %107 : vector<24x64xf32>
    %c976 = arith.constant 976 : index
    %c0_55 = arith.constant 0 : index
    %109 = vector.load %arg1[%c976, %c0_55] : memref<1136x128xf32, #tpu.memory_space<vmem>>, vector<24x64xf32>
    %110 = arith.mulf %108, %109 : vector<24x64xf32>
    %c1000 = arith.constant 1000 : index
    %c0_56 = arith.constant 0 : index
    %111 = vector.load %arg1[%c1000, %c0_56] : memref<1136x128xf32, #tpu.memory_space<vmem>>, vector<64x32xf32>
    %cst_57 = arith.constant dense<0.000000e+00> : vector<24x32xf32>
    %112 = tpu.matmul %110, %111, %cst_57 {dimension_numbers = #tpu.dot_dimension_numbers<[1], [0], [0], [1], [0, 0, 1, 1], [], []>} : vector<24x64xf32>, vector<64x32xf32>, vector<24x32xf32> -> vector<24x32xf32>
    %c1064 = arith.constant 1064 : index
    %c0_58 = arith.constant 0 : index
    %113 = vector.load %arg1[%c1064, %c0_58] : memref<1136x128xf32, #tpu.memory_space<vmem>>, vector<24x32xf32>
    %114 = arith.addf %112, %113 : vector<24x32xf32>
    %115 = vector.extract_strided_slice %114 {offsets = [0, 0], sizes = [8, 32], strides = [1, 1]} : vector<24x32xf32> to vector<8x32xf32>
    %116 = vector.extract_strided_slice %114 {offsets = [16, 0], sizes = [8, 32], strides = [1, 1]} : vector<24x32xf32> to vector<8x32xf32>
    %cst_59 = arith.constant dense<0.000000e+00> : vector<8x8xf32>
    %117 = tpu.matmul %116, %115, %cst_59 {dimension_numbers = #tpu.dot_dimension_numbers<[1], [1], [0], [0], [0, 0, 1, 0], [], []>} : vector<8x32xf32>, vector<8x32xf32>, vector<8x8xf32> -> vector<8x8xf32>
    %cst_60 = arith.constant dense<0xFF800000> : vector<8xf32>
    %118 = vector.multi_reduction <maximumf>, %117, %cst_60 [1] : vector<8x8xf32> to vector<8xf32>
    %119 = vector.shape_cast %118 : vector<8xf32> to vector<8x1xf32>
    %120 = vector.broadcast %119 : vector<8x1xf32> to vector<8x8xf32>
    %121 = arith.subf %117, %120 : vector<8x8xf32>
    %122 = math.exp %121 : vector<8x8xf32>
    %cst_61 = arith.constant dense<0.000000e+00> : vector<8xf32>
    %123 = vector.multi_reduction <add>, %122, %cst_61 [1] : vector<8x8xf32> to vector<8xf32>
    %124 = vector.shape_cast %123 : vector<8xf32> to vector<8x1xf32>
    %125 = tpu.reciprocal %124 {approx = true} : vector<8x1xf32> -> vector<8x1xf32>
    %126 = vector.broadcast %125 : vector<8x1xf32> to vector<8x8xf32>
    %127 = arith.mulf %122, %126 : vector<8x8xf32>
    %c1128 = arith.constant 1128 : index
    %c0_62 = arith.constant 0 : index
    %128 = vector.load %arg1[%c1128, %c0_62] : memref<1136x128xf32, #tpu.memory_space<vmem>>, vector<8x8xf32>
    %129 = arith.mulf %127, %128 : vector<8x8xf32>
    %c1_i32 = arith.constant 1 : i32
    %c0_63 = arith.constant 0 : index
    %c0_64 = arith.constant 0 : index
    %130 = vector.load %arg1[%c0_63, %c0_64] : memref<1136x128xf32, #tpu.memory_space<vmem>>, vector<32x64xf32>
    %cst_65 = arith.constant dense<0.000000e+00> : vector<40x64xf32>
    %131 = tpu.matmul %100, %130, %cst_65 {dimension_numbers = #tpu.dot_dimension_numbers<[1], [0], [0], [1], [0, 0, 1, 1], [], []>} : vector<40x32xf32>, vector<32x64xf32>, vector<40x64xf32> -> vector<40x64xf32>
    %c32_66 = arith.constant 32 : index
    %c0_67 = arith.constant 0 : index
    %132 = vector.load %arg1[%c32_66, %c0_67] : memref<1136x128xf32, #tpu.memory_space<vmem>>, vector<1x64xf32>
    %133 = vector.broadcast %132 : vector<1x64xf32> to vector<40x64xf32>
    %134 = arith.addf %131, %133 : vector<40x64xf32>
    %cst_68 = arith.constant 0.000000e+00 : f32
    %135 = vector.broadcast %cst_68 : f32 to vector<40x64xf32>
    %136 = arith.maximumf %134, %135 : vector<40x64xf32>
    %c40_69 = arith.constant 40 : index
    %c0_70 = arith.constant 0 : index
    %137 = vector.load %arg1[%c40_69, %c0_70] : memref<1136x128xf32, #tpu.memory_space<vmem>>, vector<40x64xf32>
    %138 = arith.mulf %136, %137 : vector<40x64xf32>
    %c80_71 = arith.constant 80 : index
    %c0_72 = arith.constant 0 : index
    %139 = vector.load %arg1[%c80_71, %c0_72] : memref<1136x128xf32, #tpu.memory_space<vmem>>, vector<64x8xf32>
    %cst_73 = arith.constant dense<0.000000e+00> : vector<40x8xf32>
    %140 = tpu.matmul %138, %139, %cst_73 {dimension_numbers = #tpu.dot_dimension_numbers<[1], [0], [0], [1], [0, 0, 1, 1], [], []>} : vector<40x64xf32>, vector<64x8xf32>, vector<40x8xf32> -> vector<40x8xf32>
    %c144_74 = arith.constant 144 : index
    %c0_75 = arith.constant 0 : index
    %141 = vector.load %arg1[%c144_74, %c0_75] : memref<1136x128xf32, #tpu.memory_space<vmem>>, vector<40x8xf32>
    %142 = arith.addf %140, %141 : vector<40x8xf32>
    %cst_76 = arith.constant 0.000000e+00 : f32
    %143 = vector.broadcast %cst_76 : f32 to vector<40x8xf32>
    %144 = arith.maximumf %142, %143 : vector<40x8xf32>
    %c40_77 = arith.constant 40 : index
    %c0_78 = arith.constant 0 : index
    %145 = vector.load %arg0[%c40_77, %c0_78] : memref<160x40xf32, #tpu.memory_space<vmem>>, vector<80x16xf32>
    %146 = vector.extract_strided_slice %144 {offsets = [24, 0], sizes = [16, 8], strides = [1, 1]} : vector<40x8xf32> to vector<16x8xf32>
    %cst_79 = arith.constant dense<0.000000e+00> : vector<80x8xf32>
    %147 = tpu.matmul %145, %146, %cst_79 {dimension_numbers = #tpu.dot_dimension_numbers<[1], [0], [0], [1], [0, 0, 1, 1], [], []>} : vector<80x16xf32>, vector<16x8xf32>, vector<80x8xf32> -> vector<80x8xf32>
    %148 = tpu.transpose %129, [1, 0] : vector<8x8xf32> -> vector<8x8xf32>
    %cst_80 = arith.constant 0.000000e+00 : f32
    %149 = vector.broadcast %cst_80 : f32 to vector<8x32xf32>
    %150 = tpu.concatenate %149, %148 in 1 : vector<8x32xf32>, vector<8x8xf32> -> vector<8x40xf32>
    %cst_81 = arith.constant 0.000000e+00 : f32
    %151 = vector.broadcast %cst_81 : f32 to vector<8x16xf32>
    %cst_82 = arith.constant 0.000000e+00 : f32
    %152 = vector.broadcast %cst_82 : f32 to vector<8x16xf32>
    %153 = tpu.concatenate %151, %129, %152 in 1 : vector<8x16xf32>, vector<8x8xf32>, vector<8x16xf32> -> vector<8x40xf32>
    %c120_83 = arith.constant 120 : index
    %c0_84 = arith.constant 0 : index
    %154 = vector.load %arg0[%c120_83, %c0_84] : memref<160x40xf32, #tpu.memory_space<vmem>>, vector<40x40xf32>
    %155 = vector.extract_strided_slice %154 {offsets = [0, 0], sizes = [16, 40], strides = [1, 1]} : vector<40x40xf32> to vector<16x40xf32>
    %156 = vector.extract_strided_slice %154 {offsets = [24, 0], sizes = [8, 40], strides = [1, 1]} : vector<40x40xf32> to vector<8x40xf32>
    %157 = tpu.concatenate %155, %150, %156, %153 in 0 : vector<16x40xf32>, vector<8x40xf32>, vector<8x40xf32>, vector<8x40xf32> -> vector<40x40xf32>
    %cst_85 = arith.constant dense<0.000000e+00> : vector<40x8xf32>
    %158 = tpu.matmul %157, %144, %cst_85 {dimension_numbers = #tpu.dot_dimension_numbers<[1], [0], [0], [1], [0, 0, 1, 1], [], []>} : vector<40x40xf32>, vector<40x8xf32>, vector<40x8xf32> -> vector<40x8xf32>
    %159 = vector.extract_strided_slice %147 {offsets = [0, 0], sizes = [40, 8], strides = [1, 1]} : vector<80x8xf32> to vector<40x8xf32>
    %160 = vector.extract_strided_slice %147 {offsets = [40, 0], sizes = [40, 8], strides = [1, 1]} : vector<80x8xf32> to vector<40x8xf32>
    %161 = tpu.concatenate %159, %160, %158 in 1 : vector<40x8xf32>, vector<40x8xf32>, vector<40x8xf32> -> vector<40x24xf32>
    %c184_86 = arith.constant 184 : index
    %c0_87 = arith.constant 0 : index
    %162 = vector.load %arg1[%c184_86, %c0_87] : memref<1136x128xf32, #tpu.memory_space<vmem>>, vector<24x96xf32>
    %cst_88 = arith.constant dense<0.000000e+00> : vector<40x96xf32>
    %163 = tpu.matmul %161, %162, %cst_88 {dimension_numbers = #tpu.dot_dimension_numbers<[1], [0], [0], [1], [0, 0, 1, 1], [], []>} : vector<40x24xf32>, vector<24x96xf32>, vector<40x96xf32> -> vector<40x96xf32>
    %c208_89 = arith.constant 208 : index
    %c0_90 = arith.constant 0 : index
    %164 = vector.load %arg1[%c208_89, %c0_90] : memref<1136x128xf32, #tpu.memory_space<vmem>>, vector<1x96xf32>
    %165 = vector.broadcast %164 : vector<1x96xf32> to vector<40x96xf32>
    %166 = arith.addf %163, %165 : vector<40x96xf32>
    %cst_91 = arith.constant 0.000000e+00 : f32
    %167 = vector.broadcast %cst_91 : f32 to vector<40x96xf32>
    %168 = arith.maximumf %166, %167 : vector<40x96xf32>
    %c216_92 = arith.constant 216 : index
    %c0_93 = arith.constant 0 : index
    %169 = vector.load %arg1[%c216_92, %c0_93] : memref<1136x128xf32, #tpu.memory_space<vmem>>, vector<40x96xf32>
    %170 = arith.mulf %168, %169 : vector<40x96xf32>
    %c256_94 = arith.constant 256 : index
    %c0_95 = arith.constant 0 : index
    %171 = vector.load %arg1[%c256_94, %c0_95] : memref<1136x128xf32, #tpu.memory_space<vmem>>, vector<96x32xf32>
    %cst_96 = arith.constant dense<0.000000e+00> : vector<40x32xf32>
    %172 = tpu.matmul %170, %171, %cst_96 {dimension_numbers = #tpu.dot_dimension_numbers<[1], [0], [0], [1], [0, 0, 1, 1], [], []>} : vector<40x96xf32>, vector<96x32xf32>, vector<40x32xf32> -> vector<40x32xf32>
    %c352_97 = arith.constant 352 : index
    %c0_98 = arith.constant 0 : index
    %173 = vector.load %arg1[%c352_97, %c0_98] : memref<1136x128xf32, #tpu.memory_space<vmem>>, vector<40x32xf32>
    %174 = arith.addf %172, %173 : vector<40x32xf32>
    %cst_99 = arith.constant 0.000000e+00 : f32
    %175 = vector.broadcast %cst_99 : f32 to vector<40x32xf32>
    %176 = arith.maximumf %174, %175 : vector<40x32xf32>
    %c896_100 = arith.constant 896 : index
    %c0_101 = arith.constant 0 : index
    %177 = vector.load %arg1[%c896_100, %c0_101] : memref<1136x128xf32, #tpu.memory_space<vmem>>, vector<40x128xf32>
    %178 = tpu.concatenate %176, %176, %176, %176 in 1 : vector<40x32xf32>, vector<40x32xf32>, vector<40x32xf32>, vector<40x32xf32> -> vector<40x128xf32>
    %179 = arith.mulf %178, %177 : vector<40x128xf32>
    %180 = tpu.concatenate %100, %100, %100, %100 in 1 : vector<40x32xf32>, vector<40x32xf32>, vector<40x32xf32>, vector<40x32xf32> -> vector<40x128xf32>
    %181 = arith.mulf %180, %177 : vector<40x128xf32>
    %c392_102 = arith.constant 392 : index
    %c0_103 = arith.constant 0 : index
    %182 = vector.load %arg1[%c392_102, %c0_103] : memref<1136x128xf32, #tpu.memory_space<vmem>>, vector<128x96xf32>
    %cst_104 = arith.constant dense<0.000000e+00> : vector<40x96xf32>
    %183 = tpu.matmul %179, %182, %cst_104 {dimension_numbers = #tpu.dot_dimension_numbers<[1], [0], [0], [1], [0, 0, 1, 1], [], []>} : vector<40x128xf32>, vector<128x96xf32>, vector<40x96xf32> -> vector<40x96xf32>
    %c520_105 = arith.constant 520 : index
    %c0_106 = arith.constant 0 : index
    %184 = vector.load %arg1[%c520_105, %c0_106] : memref<1136x128xf32, #tpu.memory_space<vmem>>, vector<40x96xf32>
    %185 = arith.addf %183, %184 : vector<40x96xf32>
    %c560_107 = arith.constant 560 : index
    %c0_108 = arith.constant 0 : index
    %186 = vector.load %arg1[%c560_107, %c0_108] : memref<1136x128xf32, #tpu.memory_space<vmem>>, vector<128x64xf32>
    %cst_109 = arith.constant dense<0.000000e+00> : vector<40x64xf32>
    %187 = tpu.matmul %181, %186, %cst_109 {dimension_numbers = #tpu.dot_dimension_numbers<[1], [0], [0], [1], [0, 0, 1, 1], [], []>} : vector<40x128xf32>, vector<128x64xf32>, vector<40x64xf32> -> vector<40x64xf32>
    %c688_110 = arith.constant 688 : index
    %c0_111 = arith.constant 0 : index
    %188 = vector.load %arg1[%c688_110, %c0_111] : memref<1136x128xf32, #tpu.memory_space<vmem>>, vector<40x64xf32>
    %189 = arith.addf %187, %188 : vector<40x64xf32>
    %190 = vector.extract_strided_slice %185 {offsets = [0, 0], sizes = [40, 64], strides = [1, 1]} : vector<40x96xf32> to vector<40x64xf32>
    %191 = arith.addf %190, %189 : vector<40x64xf32>
    %192 = arith.negf %191 : vector<40x64xf32>
    %193 = math.exp %192 : vector<40x64xf32>
    %cst_112 = arith.constant 1.000000e+00 : f32
    %194 = vector.broadcast %cst_112 : f32 to vector<40x64xf32>
    %195 = arith.addf %194, %193 : vector<40x64xf32>
    %196 = arith.divf %194, %195 : vector<40x64xf32>
    %197 = vector.extract_strided_slice %196 {offsets = [0, 0], sizes = [40, 32], strides = [1, 1]} : vector<40x64xf32> to vector<40x32xf32>
    %198 = vector.extract_strided_slice %196 {offsets = [0, 32], sizes = [40, 32], strides = [1, 1]} : vector<40x64xf32> to vector<40x32xf32>
    %199 = arith.mulf %198, %100 : vector<40x32xf32>
    %200 = tpu.concatenate %199, %199, %199, %199 in 1 : vector<40x32xf32>, vector<40x32xf32>, vector<40x32xf32>, vector<40x32xf32> -> vector<40x128xf32>
    %201 = arith.mulf %200, %177 : vector<40x128xf32>
    %202 = vector.extract_strided_slice %185 {offsets = [0, 64], sizes = [40, 32], strides = [1, 1]} : vector<40x96xf32> to vector<40x32xf32>
    %c728_113 = arith.constant 728 : index
    %c0_114 = arith.constant 0 : index
    %203 = vector.load %arg1[%c728_113, %c0_114] : memref<1136x128xf32, #tpu.memory_space<vmem>>, vector<128x32xf32>
    %cst_115 = arith.constant dense<0.000000e+00> : vector<40x32xf32>
    %204 = tpu.matmul %201, %203, %cst_115 {dimension_numbers = #tpu.dot_dimension_numbers<[1], [0], [0], [1], [0, 0, 1, 1], [], []>} : vector<40x128xf32>, vector<128x32xf32>, vector<40x32xf32> -> vector<40x32xf32>
    %205 = arith.addf %202, %204 : vector<40x32xf32>
    %c856_116 = arith.constant 856 : index
    %c0_117 = arith.constant 0 : index
    %206 = vector.load %arg1[%c856_116, %c0_117] : memref<1136x128xf32, #tpu.memory_space<vmem>>, vector<40x32xf32>
    %207 = arith.addf %205, %206 : vector<40x32xf32>
    %208 = math.tanh %207 : vector<40x32xf32>
    %cst_118 = arith.constant 1.000000e+00 : f32
    %209 = vector.broadcast %cst_118 : f32 to vector<40x32xf32>
    %210 = arith.subf %209, %197 : vector<40x32xf32>
    %211 = arith.mulf %210, %100 : vector<40x32xf32>
    %212 = arith.mulf %197, %208 : vector<40x32xf32>
    %213 = arith.addf %211, %212 : vector<40x32xf32>
    %214 = vector.extract_strided_slice %213 {offsets = [16, 0], sizes = [24, 32], strides = [1, 1]} : vector<40x32xf32> to vector<24x32xf32>
    %c936_119 = arith.constant 936 : index
    %c0_120 = arith.constant 0 : index
    %215 = vector.load %arg1[%c936_119, %c0_120] : memref<1136x128xf32, #tpu.memory_space<vmem>>, vector<32x64xf32>
    %cst_121 = arith.constant dense<0.000000e+00> : vector<24x64xf32>
    %216 = tpu.matmul %214, %215, %cst_121 {dimension_numbers = #tpu.dot_dimension_numbers<[1], [0], [0], [1], [0, 0, 1, 1], [], []>} : vector<24x32xf32>, vector<32x64xf32>, vector<24x64xf32> -> vector<24x64xf32>
    %c968_122 = arith.constant 968 : index
    %c0_123 = arith.constant 0 : index
    %217 = vector.load %arg1[%c968_122, %c0_123] : memref<1136x128xf32, #tpu.memory_space<vmem>>, vector<1x64xf32>
    %218 = vector.broadcast %217 : vector<1x64xf32> to vector<24x64xf32>
    %219 = arith.addf %216, %218 : vector<24x64xf32>
    %cst_124 = arith.constant 0.000000e+00 : f32
    %220 = vector.broadcast %cst_124 : f32 to vector<24x64xf32>
    %221 = arith.maximumf %219, %220 : vector<24x64xf32>
    %c976_125 = arith.constant 976 : index
    %c0_126 = arith.constant 0 : index
    %222 = vector.load %arg1[%c976_125, %c0_126] : memref<1136x128xf32, #tpu.memory_space<vmem>>, vector<24x64xf32>
    %223 = arith.mulf %221, %222 : vector<24x64xf32>
    %c1000_127 = arith.constant 1000 : index
    %c0_128 = arith.constant 0 : index
    %224 = vector.load %arg1[%c1000_127, %c0_128] : memref<1136x128xf32, #tpu.memory_space<vmem>>, vector<64x32xf32>
    %cst_129 = arith.constant dense<0.000000e+00> : vector<24x32xf32>
    %225 = tpu.matmul %223, %224, %cst_129 {dimension_numbers = #tpu.dot_dimension_numbers<[1], [0], [0], [1], [0, 0, 1, 1], [], []>} : vector<24x64xf32>, vector<64x32xf32>, vector<24x32xf32> -> vector<24x32xf32>
    %c1064_130 = arith.constant 1064 : index
    %c0_131 = arith.constant 0 : index
    %226 = vector.load %arg1[%c1064_130, %c0_131] : memref<1136x128xf32, #tpu.memory_space<vmem>>, vector<24x32xf32>
    %227 = arith.addf %225, %226 : vector<24x32xf32>
    %228 = vector.extract_strided_slice %227 {offsets = [0, 0], sizes = [8, 32], strides = [1, 1]} : vector<24x32xf32> to vector<8x32xf32>
    %229 = vector.extract_strided_slice %227 {offsets = [16, 0], sizes = [8, 32], strides = [1, 1]} : vector<24x32xf32> to vector<8x32xf32>
    %cst_132 = arith.constant dense<0.000000e+00> : vector<8x8xf32>
    %230 = tpu.matmul %229, %228, %cst_132 {dimension_numbers = #tpu.dot_dimension_numbers<[1], [1], [0], [0], [0, 0, 1, 0], [], []>} : vector<8x32xf32>, vector<8x32xf32>, vector<8x8xf32> -> vector<8x8xf32>
    %cst_133 = arith.constant dense<0xFF800000> : vector<8xf32>
    %231 = vector.multi_reduction <maximumf>, %230, %cst_133 [1] : vector<8x8xf32> to vector<8xf32>
    %232 = vector.shape_cast %231 : vector<8xf32> to vector<8x1xf32>
    %233 = vector.broadcast %232 : vector<8x1xf32> to vector<8x8xf32>
    %234 = arith.subf %230, %233 : vector<8x8xf32>
    %235 = math.exp %234 : vector<8x8xf32>
    %cst_134 = arith.constant dense<0.000000e+00> : vector<8xf32>
    %236 = vector.multi_reduction <add>, %235, %cst_134 [1] : vector<8x8xf32> to vector<8xf32>
    %237 = vector.shape_cast %236 : vector<8xf32> to vector<8x1xf32>
    %238 = tpu.reciprocal %237 {approx = true} : vector<8x1xf32> -> vector<8x1xf32>
    %239 = vector.broadcast %238 : vector<8x1xf32> to vector<8x8xf32>
    %240 = arith.mulf %235, %239 : vector<8x8xf32>
    %c1128_135 = arith.constant 1128 : index
    %c0_136 = arith.constant 0 : index
    %241 = vector.load %arg1[%c1128_135, %c0_136] : memref<1136x128xf32, #tpu.memory_space<vmem>>, vector<8x8xf32>
    %242 = arith.mulf %240, %241 : vector<8x8xf32>
    %c2_i32 = arith.constant 2 : i32
    %c0_137 = arith.constant 0 : index
    %c0_138 = arith.constant 0 : index
    %243 = vector.load %arg1[%c0_137, %c0_138] : memref<1136x128xf32, #tpu.memory_space<vmem>>, vector<32x64xf32>
    %cst_139 = arith.constant dense<0.000000e+00> : vector<40x64xf32>
    %244 = tpu.matmul %213, %243, %cst_139 {dimension_numbers = #tpu.dot_dimension_numbers<[1], [0], [0], [1], [0, 0, 1, 1], [], []>} : vector<40x32xf32>, vector<32x64xf32>, vector<40x64xf32> -> vector<40x64xf32>
    %c32_140 = arith.constant 32 : index
    %c0_141 = arith.constant 0 : index
    %245 = vector.load %arg1[%c32_140, %c0_141] : memref<1136x128xf32, #tpu.memory_space<vmem>>, vector<1x64xf32>
    %246 = vector.broadcast %245 : vector<1x64xf32> to vector<40x64xf32>
    %247 = arith.addf %244, %246 : vector<40x64xf32>
    %cst_142 = arith.constant 0.000000e+00 : f32
    %248 = vector.broadcast %cst_142 : f32 to vector<40x64xf32>
    %249 = arith.maximumf %247, %248 : vector<40x64xf32>
    %c40_143 = arith.constant 40 : index
    %c0_144 = arith.constant 0 : index
    %250 = vector.load %arg1[%c40_143, %c0_144] : memref<1136x128xf32, #tpu.memory_space<vmem>>, vector<40x64xf32>
    %251 = arith.mulf %249, %250 : vector<40x64xf32>
    %c80_145 = arith.constant 80 : index
    %c0_146 = arith.constant 0 : index
    %252 = vector.load %arg1[%c80_145, %c0_146] : memref<1136x128xf32, #tpu.memory_space<vmem>>, vector<64x8xf32>
    %cst_147 = arith.constant dense<0.000000e+00> : vector<40x8xf32>
    %253 = tpu.matmul %251, %252, %cst_147 {dimension_numbers = #tpu.dot_dimension_numbers<[1], [0], [0], [1], [0, 0, 1, 1], [], []>} : vector<40x64xf32>, vector<64x8xf32>, vector<40x8xf32> -> vector<40x8xf32>
    %c144_148 = arith.constant 144 : index
    %c0_149 = arith.constant 0 : index
    %254 = vector.load %arg1[%c144_148, %c0_149] : memref<1136x128xf32, #tpu.memory_space<vmem>>, vector<40x8xf32>
    %255 = arith.addf %253, %254 : vector<40x8xf32>
    %cst_150 = arith.constant 0.000000e+00 : f32
    %256 = vector.broadcast %cst_150 : f32 to vector<40x8xf32>
    %257 = arith.maximumf %255, %256 : vector<40x8xf32>
    %c40_151 = arith.constant 40 : index
    %c0_152 = arith.constant 0 : index
    %258 = vector.load %arg0[%c40_151, %c0_152] : memref<160x40xf32, #tpu.memory_space<vmem>>, vector<80x16xf32>
    %259 = vector.extract_strided_slice %257 {offsets = [24, 0], sizes = [16, 8], strides = [1, 1]} : vector<40x8xf32> to vector<16x8xf32>
    %cst_153 = arith.constant dense<0.000000e+00> : vector<80x8xf32>
    %260 = tpu.matmul %258, %259, %cst_153 {dimension_numbers = #tpu.dot_dimension_numbers<[1], [0], [0], [1], [0, 0, 1, 1], [], []>} : vector<80x16xf32>, vector<16x8xf32>, vector<80x8xf32> -> vector<80x8xf32>
    %261 = tpu.transpose %242, [1, 0] : vector<8x8xf32> -> vector<8x8xf32>
    %cst_154 = arith.constant 0.000000e+00 : f32
    %262 = vector.broadcast %cst_154 : f32 to vector<8x32xf32>
    %263 = tpu.concatenate %262, %261 in 1 : vector<8x32xf32>, vector<8x8xf32> -> vector<8x40xf32>
    %cst_155 = arith.constant 0.000000e+00 : f32
    %264 = vector.broadcast %cst_155 : f32 to vector<8x16xf32>
    %cst_156 = arith.constant 0.000000e+00 : f32
    %265 = vector.broadcast %cst_156 : f32 to vector<8x16xf32>
    %266 = tpu.concatenate %264, %242, %265 in 1 : vector<8x16xf32>, vector<8x8xf32>, vector<8x16xf32> -> vector<8x40xf32>
    %c120_157 = arith.constant 120 : index
    %c0_158 = arith.constant 0 : index
    %267 = vector.load %arg0[%c120_157, %c0_158] : memref<160x40xf32, #tpu.memory_space<vmem>>, vector<40x40xf32>
    %268 = vector.extract_strided_slice %267 {offsets = [0, 0], sizes = [16, 40], strides = [1, 1]} : vector<40x40xf32> to vector<16x40xf32>
    %269 = vector.extract_strided_slice %267 {offsets = [24, 0], sizes = [8, 40], strides = [1, 1]} : vector<40x40xf32> to vector<8x40xf32>
    %270 = tpu.concatenate %268, %263, %269, %266 in 0 : vector<16x40xf32>, vector<8x40xf32>, vector<8x40xf32>, vector<8x40xf32> -> vector<40x40xf32>
    %cst_159 = arith.constant dense<0.000000e+00> : vector<40x8xf32>
    %271 = tpu.matmul %270, %257, %cst_159 {dimension_numbers = #tpu.dot_dimension_numbers<[1], [0], [0], [1], [0, 0, 1, 1], [], []>} : vector<40x40xf32>, vector<40x8xf32>, vector<40x8xf32> -> vector<40x8xf32>
    %272 = vector.extract_strided_slice %260 {offsets = [0, 0], sizes = [40, 8], strides = [1, 1]} : vector<80x8xf32> to vector<40x8xf32>
    %273 = vector.extract_strided_slice %260 {offsets = [40, 0], sizes = [40, 8], strides = [1, 1]} : vector<80x8xf32> to vector<40x8xf32>
    %274 = tpu.concatenate %272, %273, %271 in 1 : vector<40x8xf32>, vector<40x8xf32>, vector<40x8xf32> -> vector<40x24xf32>
    %c184_160 = arith.constant 184 : index
    %c0_161 = arith.constant 0 : index
    %275 = vector.load %arg1[%c184_160, %c0_161] : memref<1136x128xf32, #tpu.memory_space<vmem>>, vector<24x96xf32>
    %cst_162 = arith.constant dense<0.000000e+00> : vector<40x96xf32>
    %276 = tpu.matmul %274, %275, %cst_162 {dimension_numbers = #tpu.dot_dimension_numbers<[1], [0], [0], [1], [0, 0, 1, 1], [], []>} : vector<40x24xf32>, vector<24x96xf32>, vector<40x96xf32> -> vector<40x96xf32>
    %c208_163 = arith.constant 208 : index
    %c0_164 = arith.constant 0 : index
    %277 = vector.load %arg1[%c208_163, %c0_164] : memref<1136x128xf32, #tpu.memory_space<vmem>>, vector<1x96xf32>
    %278 = vector.broadcast %277 : vector<1x96xf32> to vector<40x96xf32>
    %279 = arith.addf %276, %278 : vector<40x96xf32>
    %cst_165 = arith.constant 0.000000e+00 : f32
    %280 = vector.broadcast %cst_165 : f32 to vector<40x96xf32>
    %281 = arith.maximumf %279, %280 : vector<40x96xf32>
    %c216_166 = arith.constant 216 : index
    %c0_167 = arith.constant 0 : index
    %282 = vector.load %arg1[%c216_166, %c0_167] : memref<1136x128xf32, #tpu.memory_space<vmem>>, vector<40x96xf32>
    %283 = arith.mulf %281, %282 : vector<40x96xf32>
    %c256_168 = arith.constant 256 : index
    %c0_169 = arith.constant 0 : index
    %284 = vector.load %arg1[%c256_168, %c0_169] : memref<1136x128xf32, #tpu.memory_space<vmem>>, vector<96x32xf32>
    %cst_170 = arith.constant dense<0.000000e+00> : vector<40x32xf32>
    %285 = tpu.matmul %283, %284, %cst_170 {dimension_numbers = #tpu.dot_dimension_numbers<[1], [0], [0], [1], [0, 0, 1, 1], [], []>} : vector<40x96xf32>, vector<96x32xf32>, vector<40x32xf32> -> vector<40x32xf32>
    %c352_171 = arith.constant 352 : index
    %c0_172 = arith.constant 0 : index
    %286 = vector.load %arg1[%c352_171, %c0_172] : memref<1136x128xf32, #tpu.memory_space<vmem>>, vector<40x32xf32>
    %287 = arith.addf %285, %286 : vector<40x32xf32>
    %cst_173 = arith.constant 0.000000e+00 : f32
    %288 = vector.broadcast %cst_173 : f32 to vector<40x32xf32>
    %289 = arith.maximumf %287, %288 : vector<40x32xf32>
    %c896_174 = arith.constant 896 : index
    %c0_175 = arith.constant 0 : index
    %290 = vector.load %arg1[%c896_174, %c0_175] : memref<1136x128xf32, #tpu.memory_space<vmem>>, vector<40x128xf32>
    %291 = tpu.concatenate %289, %289, %289, %289 in 1 : vector<40x32xf32>, vector<40x32xf32>, vector<40x32xf32>, vector<40x32xf32> -> vector<40x128xf32>
    %292 = arith.mulf %291, %290 : vector<40x128xf32>
    %293 = tpu.concatenate %213, %213, %213, %213 in 1 : vector<40x32xf32>, vector<40x32xf32>, vector<40x32xf32>, vector<40x32xf32> -> vector<40x128xf32>
    %294 = arith.mulf %293, %290 : vector<40x128xf32>
    %c392_176 = arith.constant 392 : index
    %c0_177 = arith.constant 0 : index
    %295 = vector.load %arg1[%c392_176, %c0_177] : memref<1136x128xf32, #tpu.memory_space<vmem>>, vector<128x96xf32>
    %cst_178 = arith.constant dense<0.000000e+00> : vector<40x96xf32>
    %296 = tpu.matmul %292, %295, %cst_178 {dimension_numbers = #tpu.dot_dimension_numbers<[1], [0], [0], [1], [0, 0, 1, 1], [], []>} : vector<40x128xf32>, vector<128x96xf32>, vector<40x96xf32> -> vector<40x96xf32>
    %c520_179 = arith.constant 520 : index
    %c0_180 = arith.constant 0 : index
    %297 = vector.load %arg1[%c520_179, %c0_180] : memref<1136x128xf32, #tpu.memory_space<vmem>>, vector<40x96xf32>
    %298 = arith.addf %296, %297 : vector<40x96xf32>
    %c560_181 = arith.constant 560 : index
    %c0_182 = arith.constant 0 : index
    %299 = vector.load %arg1[%c560_181, %c0_182] : memref<1136x128xf32, #tpu.memory_space<vmem>>, vector<128x64xf32>
    %cst_183 = arith.constant dense<0.000000e+00> : vector<40x64xf32>
    %300 = tpu.matmul %294, %299, %cst_183 {dimension_numbers = #tpu.dot_dimension_numbers<[1], [0], [0], [1], [0, 0, 1, 1], [], []>} : vector<40x128xf32>, vector<128x64xf32>, vector<40x64xf32> -> vector<40x64xf32>
    %c688_184 = arith.constant 688 : index
    %c0_185 = arith.constant 0 : index
    %301 = vector.load %arg1[%c688_184, %c0_185] : memref<1136x128xf32, #tpu.memory_space<vmem>>, vector<40x64xf32>
    %302 = arith.addf %300, %301 : vector<40x64xf32>
    %303 = vector.extract_strided_slice %298 {offsets = [0, 0], sizes = [40, 64], strides = [1, 1]} : vector<40x96xf32> to vector<40x64xf32>
    %304 = arith.addf %303, %302 : vector<40x64xf32>
    %305 = arith.negf %304 : vector<40x64xf32>
    %306 = math.exp %305 : vector<40x64xf32>
    %cst_186 = arith.constant 1.000000e+00 : f32
    %307 = vector.broadcast %cst_186 : f32 to vector<40x64xf32>
    %308 = arith.addf %307, %306 : vector<40x64xf32>
    %309 = arith.divf %307, %308 : vector<40x64xf32>
    %310 = vector.extract_strided_slice %309 {offsets = [0, 0], sizes = [40, 32], strides = [1, 1]} : vector<40x64xf32> to vector<40x32xf32>
    %311 = vector.extract_strided_slice %309 {offsets = [0, 32], sizes = [40, 32], strides = [1, 1]} : vector<40x64xf32> to vector<40x32xf32>
    %312 = arith.mulf %311, %213 : vector<40x32xf32>
    %313 = tpu.concatenate %312, %312, %312, %312 in 1 : vector<40x32xf32>, vector<40x32xf32>, vector<40x32xf32>, vector<40x32xf32> -> vector<40x128xf32>
    %314 = arith.mulf %313, %290 : vector<40x128xf32>
    %315 = vector.extract_strided_slice %298 {offsets = [0, 64], sizes = [40, 32], strides = [1, 1]} : vector<40x96xf32> to vector<40x32xf32>
    %c728_187 = arith.constant 728 : index
    %c0_188 = arith.constant 0 : index
    %316 = vector.load %arg1[%c728_187, %c0_188] : memref<1136x128xf32, #tpu.memory_space<vmem>>, vector<128x32xf32>
    %cst_189 = arith.constant dense<0.000000e+00> : vector<40x32xf32>
    %317 = tpu.matmul %314, %316, %cst_189 {dimension_numbers = #tpu.dot_dimension_numbers<[1], [0], [0], [1], [0, 0, 1, 1], [], []>} : vector<40x128xf32>, vector<128x32xf32>, vector<40x32xf32> -> vector<40x32xf32>
    %318 = arith.addf %315, %317 : vector<40x32xf32>
    %c856_190 = arith.constant 856 : index
    %c0_191 = arith.constant 0 : index
    %319 = vector.load %arg1[%c856_190, %c0_191] : memref<1136x128xf32, #tpu.memory_space<vmem>>, vector<40x32xf32>
    %320 = arith.addf %318, %319 : vector<40x32xf32>
    %321 = math.tanh %320 : vector<40x32xf32>
    %cst_192 = arith.constant 1.000000e+00 : f32
    %322 = vector.broadcast %cst_192 : f32 to vector<40x32xf32>
    %323 = arith.subf %322, %310 : vector<40x32xf32>
    %324 = arith.mulf %323, %213 : vector<40x32xf32>
    %325 = arith.mulf %310, %321 : vector<40x32xf32>
    %326 = arith.addf %324, %325 : vector<40x32xf32>
    %327 = vector.extract_strided_slice %326 {offsets = [16, 0], sizes = [24, 32], strides = [1, 1]} : vector<40x32xf32> to vector<24x32xf32>
    %c936_193 = arith.constant 936 : index
    %c0_194 = arith.constant 0 : index
    %328 = vector.load %arg1[%c936_193, %c0_194] : memref<1136x128xf32, #tpu.memory_space<vmem>>, vector<32x64xf32>
    %cst_195 = arith.constant dense<0.000000e+00> : vector<24x64xf32>
    %329 = tpu.matmul %327, %328, %cst_195 {dimension_numbers = #tpu.dot_dimension_numbers<[1], [0], [0], [1], [0, 0, 1, 1], [], []>} : vector<24x32xf32>, vector<32x64xf32>, vector<24x64xf32> -> vector<24x64xf32>
    %c968_196 = arith.constant 968 : index
    %c0_197 = arith.constant 0 : index
    %330 = vector.load %arg1[%c968_196, %c0_197] : memref<1136x128xf32, #tpu.memory_space<vmem>>, vector<1x64xf32>
    %331 = vector.broadcast %330 : vector<1x64xf32> to vector<24x64xf32>
    %332 = arith.addf %329, %331 : vector<24x64xf32>
    %cst_198 = arith.constant 0.000000e+00 : f32
    %333 = vector.broadcast %cst_198 : f32 to vector<24x64xf32>
    %334 = arith.maximumf %332, %333 : vector<24x64xf32>
    %c976_199 = arith.constant 976 : index
    %c0_200 = arith.constant 0 : index
    %335 = vector.load %arg1[%c976_199, %c0_200] : memref<1136x128xf32, #tpu.memory_space<vmem>>, vector<24x64xf32>
    %336 = arith.mulf %334, %335 : vector<24x64xf32>
    %c1000_201 = arith.constant 1000 : index
    %c0_202 = arith.constant 0 : index
    %337 = vector.load %arg1[%c1000_201, %c0_202] : memref<1136x128xf32, #tpu.memory_space<vmem>>, vector<64x32xf32>
    %cst_203 = arith.constant dense<0.000000e+00> : vector<24x32xf32>
    %338 = tpu.matmul %336, %337, %cst_203 {dimension_numbers = #tpu.dot_dimension_numbers<[1], [0], [0], [1], [0, 0, 1, 1], [], []>} : vector<24x64xf32>, vector<64x32xf32>, vector<24x32xf32> -> vector<24x32xf32>
    %c1064_204 = arith.constant 1064 : index
    %c0_205 = arith.constant 0 : index
    %339 = vector.load %arg1[%c1064_204, %c0_205] : memref<1136x128xf32, #tpu.memory_space<vmem>>, vector<24x32xf32>
    %340 = arith.addf %338, %339 : vector<24x32xf32>
    %341 = vector.extract_strided_slice %340 {offsets = [0, 0], sizes = [8, 32], strides = [1, 1]} : vector<24x32xf32> to vector<8x32xf32>
    %342 = vector.extract_strided_slice %340 {offsets = [16, 0], sizes = [8, 32], strides = [1, 1]} : vector<24x32xf32> to vector<8x32xf32>
    %cst_206 = arith.constant dense<0.000000e+00> : vector<8x8xf32>
    %343 = tpu.matmul %342, %341, %cst_206 {dimension_numbers = #tpu.dot_dimension_numbers<[1], [1], [0], [0], [0, 0, 1, 0], [], []>} : vector<8x32xf32>, vector<8x32xf32>, vector<8x8xf32> -> vector<8x8xf32>
    %cst_207 = arith.constant dense<0xFF800000> : vector<8xf32>
    %344 = vector.multi_reduction <maximumf>, %343, %cst_207 [1] : vector<8x8xf32> to vector<8xf32>
    %345 = vector.shape_cast %344 : vector<8xf32> to vector<8x1xf32>
    %346 = vector.broadcast %345 : vector<8x1xf32> to vector<8x8xf32>
    %347 = arith.subf %343, %346 : vector<8x8xf32>
    %348 = math.exp %347 : vector<8x8xf32>
    %cst_208 = arith.constant dense<0.000000e+00> : vector<8xf32>
    %349 = vector.multi_reduction <add>, %348, %cst_208 [1] : vector<8x8xf32> to vector<8xf32>
    %350 = vector.shape_cast %349 : vector<8xf32> to vector<8x1xf32>
    %351 = tpu.reciprocal %350 {approx = true} : vector<8x1xf32> -> vector<8x1xf32>
    %352 = vector.broadcast %351 : vector<8x1xf32> to vector<8x8xf32>
    %353 = arith.mulf %348, %352 : vector<8x8xf32>
    %c1128_209 = arith.constant 1128 : index
    %c0_210 = arith.constant 0 : index
    %354 = vector.load %arg1[%c1128_209, %c0_210] : memref<1136x128xf32, #tpu.memory_space<vmem>>, vector<8x8xf32>
    %355 = arith.mulf %353, %354 : vector<8x8xf32>
    %c0_211 = arith.constant 0 : index
    %c0_212 = arith.constant 0 : index
    %356 = vector.load %arg2[%c0_211, %c0_212] : memref<8x8xf32, #tpu.memory_space<vmem>>, vector<8x8xf32>
    tpu.vector_store %arg2[%c0_211, %c0_212], %343 {strides = array<i32>} : memref<8x8xf32, #tpu.memory_space<vmem>>, vector<8x8xf32>,
    return
  }
}

</mosaic_0001>

<bundles_post_ra>
// kernel: forward.1
= control target key start
LH: loop header
LB: loop body
LE: loop exit
PB: predicated region body
PF: predicated region fallthrough
CT: control target
= control target key end

     0   :  { %7 = vsyncpa [#allocation3], 0  ;;  %s9448_s0 = inlined_call_operand.vmem [shape: f32[160,40], index: 0, kind: input, shape index: {}]   ;;  %s9449_s1 = inlined_call_operand.hbm [shape: f32[1136,128], index: 1, kind: input, shape index: {}]   ;;  %s9450_s2 = inlined_call_operand.hbm [shape: f32[8,8], index: 2, kind: output, shape index: {}]  }
   0x1   :  { %8 = vsyncpa [#allocation4], 0  ;;  %s7580_s9 = smov [#allocation2]   ;;  %s7532_s13 = scalar_lea.hbm %s9449_s1, 18176 }
   0x2   :  { %s16_s10 = sshll.u32 %s7580_s9, 4  ;;  %p7533_p0 = scmp.ne.s32.totalorder %s9449_s1, %s7532_s13  ;;  %s17_s10 = int_to_ptr.vmem [resolvable:$true] %s16_s10 }
   0x3   :  { %p7536_p1 = scmp.lt.u32.totalorder %s7532_s13, %s9449_s1 }
   0x5   :  { %p7538_p2 = pnand %p7536_p1, %p7533_p0 }
   0x7   :  { %7541 = shalt.err (!%p7538_p2)
}
   0x8   :  { %s7542_s18 = scalar_lea.vmem %s17_s10, 18176  ;;  %p7547_p4 = scmp.lt.s32.totalorder %s17_s10, %s17_s10 }
   0x9   :  { %p7543_p3 = scmp.ne.s32.totalorder %s17_s10, %s7542_s18  ;;  %p7548_p5 = scmp.lt.s32.totalorder %s7542_s18, %s7542_s18 }
   0xb   :  { %p7549_p6 = por %p7548_p5, %p7547_p4 }
   0xd   :  { %p7550_p7 = pnand %p7549_p6, %p7543_p3 }
   0xf   :  { %7553 = shalt.err (!%p7550_p7)
}
  0x10   :  { %s7581_s19 = smov 128   ;;  %s7582_s20 = smov 8  }
  0x11   :  { %22 = dma.hbm_to_vmem [thread:$0]  %s9449_s1, 18176, %s17_s10, [#allocation3], %s7581_s19, %s7581_s19, %s7582_s20  }
  0x12   :  { %7576 = dma.done.wait [#allocation3], 18176  }
  0x13   :  { %7577 = vsyncadd [#allocation3], 4294949120  ;;  %vm7583_vm0 = vmmov 0   ;;  %v9451_v0 = vmov 0.0   ;;  %v9459_v1 = vmov 0.0|0.0   ;;  %vm35_vm1 = vcmask 130048  }
  0x14   :  { %5851 = vmatprep.mubr.msk.f32.mxu1 %vm7583_vm0, %v9451_v0  ;;  %6885 = vmatprep.subr.bf16.mxu1 %v9459_v1  ;;  %v28_v2 = vld [vmem:[#allocation2 + $0x440] sm:$0xff]  ;;  %v29_v3 = vld [vmem:[#allocation2 + $0x448] sm:$0xff]  ;;  %v118_v10 = vld [vmem:[#allocation2 + $0x458] sm:$0xff]  ;;  %vm124_vm2 = vcmask 64512   ;;  %vm209_vm3 = vcmask 261120   ;;  %s7586_s4 = smov 32  }
  0x15   :  { %v26_v4 = vld [vmem:[%s9448_s0] sm:$0xff]  ;;  %v6881_v5 = vpack.c.bf16 %v29_v3, %v28_v2  ;;  %v201_v7 = vld [vmem:[#allocation2 + $0x8] sm:$0xff]  ;;  %v117_v11 = vld [vmem:[%s9448_s0 + $0x10] sm:$0xff]  ;;  %642 = vrot.lane.b32.xlu0 %v9451_v0, %s7586_s4  ;;  %vm343_vm4 = vcmask 523264   ;;  %vm649_vm5 = vcmask 326656   ;;  %s7587_s3 = smov 16  }
  0x16   :  { %5835 = vmatprep.mubr.msk.f32.mxu0 %vm35_vm1, %v26_v4  ;;  %v200_v6 = vld [vmem:[#allocation2] sm:$0xff]  ;;  %v27_v9 = vld [vmem:[%s9448_s0 + $0x8] sm:$0xff]  ;;  %v202_v12 = vld [vmem:[#allocation2 + $0x10] sm:$0xff]  ;;  %s7588_s5 = smov 64   ;;  %s7589_s6 = smov 96   ;;  %vm813_vm6 = vcmask 195584  }
  0x17   :  { %6882 = vmatprep.subr.bf16.mxu0 %v6881_v5  ;;  %v7626_v8 = vpack.c.bf16 %v201_v7, %v200_v6  ;;  %v203_v13 = vld [vmem:[#allocation2 + $0x18] sm:$0xff]  ;;  %v330_v15 = vld [vmem:[#allocation2 + $0x50] sm:$0xff]  ;;  %v332_v17 = vld [vmem:[#allocation2 + $0x60] sm:$0xff]  ;;  %vm951_vm7 = vcmask 785408  }
  0x18   :  { %6884 = vmatpush3.bf16.msra.mxu0 %v6881_v5  ;;  %v7644_v14 = vpack.c.bf16 %v203_v13, %v202_v12  ;;  %v331_v16 = vld [vmem:[#allocation2 + $0x58] sm:$0xff]  ;;  %v333_v19 = vld [vmem:[#allocation2 + $0x68] sm:$0xff]  ;;  %v5218_v21 = vld [vmem:[#allocation2 + $0x450] ss:$0 sm:$0xff] }
  0x19   :  { %5838 = vmatprep.subr.mxu0 %v9451_v0  ;;  %6887 = vmatpush3.bf16.msra.mxu1 %v7626_v8  ;;  %v7647_v18 = vpack.c.bf16 %v331_v16, %v330_v15  ;;  %v7650_v20 = vpack.c.bf16 %v333_v19, %v332_v17  ;;  %v5221_v26 = vld [vmem:[#allocation2 + $0x460] ss:$0 sm:$0xff]  ;;  %v7676_v30 = vld [vmem:[%s9448_s0 + $0x18] sm:$0xff]  ;;  %v334_v32 = vld [vmem:[#allocation2 + $0x70] sm:$0xff] }
  0x1a   :  { %6888 = vmatprep.subr.bf16.mxu1 %v9459_v1  ;;  %v7685_v31 = vld [vmem:[%s9448_s0 + $0x20] sm:$0xff]  ;;  %v335_v33 = vld [vmem:[#allocation2 + $0x78] sm:$0xff]  ;;  %v337_v36 = vld [vmem:[#allocation2 + $0x88] sm:$0xff] }
  0x1b   :  { %5836 = vmatmul.mubr.msk.f32.vlgmr.msra.gmra.mrb[0].mxu0 %vm35_vm1, %v27_v9  ;;  %v7689_v34 = vpack.c.bf16 %v335_v33, %v334_v32  ;;  %v336_v35 = vld [vmem:[#allocation2 + $0x80] sm:$0xff]  ;;  %v320_v42 = vld [vmem:[#allocation2 + $0x28] sm:$0xff]  ;;  %v321_v48 = vld [vmem:[#allocation2 + $0x30] sm:$0xff] }
  0x1c   :  { %5839 = vmatpush3.msra.mxu0 %v118_v10  ;;  %5840 = vmatprep.mubr.msk.f32.mxu0 %vm7583_vm0, %v9451_v0  ;;  %v7693_v37 = vpack.c.bf16 %v337_v36, %v336_v35  ;;  %v5223_v38 = vld [vmem:[#allocation2 + $0x20] ss:$0 sm:$0xff]  ;;  %v322_v54 = vld [vmem:[#allocation2 + $0x38] sm:$0xff]  ;;  %v324_v4 = vld [vmem:[#allocation2 + $0x48] sm:$0xff] }
  0x1d   :  { %6891 = vmatprep.subr.bf16.mxu0 %v9459_v1  ;;  %6890 = vmatpush3.bf16.msra.mxu1 %v7644_v14  ;;  %9491 = vst [vmem:[#allocation8_spill] sm:$0xff] %v7689_v34  ;;  %v323_v60 = vld [vmem:[#allocation2 + $0x40] sm:$0xff]  ;;  %v454_v7 = vld [vmem:[%s9448_s0 + $0x28] sm:$0xff]  ;;  %v338_v9 = vld [vmem:[#allocation2 + $0x90] sm:$0xff] }
  0x1e   :  { %9492 = vst [vmem:[#allocation9_spill] sm:$0xff] %v7693_v37  ;;  %v339_v12 = vld [vmem:[#allocation2 + $0x98] sm:$0xff] }
  0x1f   :  { %5841 = vmatmul.mubr.msk.f32.vlgmr.msra.gmra.mrb[2].mxu0 %vm124_vm2, %v117_v11 }
  0x20   :  { %5882 = vmatprep.mubr.msk.f32.mxu0 %vm7583_vm0, %v9451_v0  ;;  %6893 = vmatpush3.bf16.msra.mxu0 %v7647_v18 }
  0x21   :  { %6894 = vmatprep.subr.bf16.mxu0 %v9459_v1 }
  0x24   :  { %6896 = vmatpush3.bf16.msra.mxu0 %v7650_v20 }
  0x25   :  { %6897 = vmatprep.subr.bf16.mxu0 %v9459_v1 }
  0x28   :  { %6899 = vmatpush3.bf16.msra.mxu0 %v7689_v34 }
  0x29   :  { %6900 = vmatprep.subr.bf16.mxu0 %v9459_v1 }
  0x2c   :  { %6902 = vmatpush3.bf16.msra.mxu0 %v7693_v37 }
  0x2d   :  { %6907 = vmatprep.subr.bf16.mxu0 %v9459_v1 }
  0xee   :  { %v5837_v22 = vpop.f32.mrb[0].mxu0 }
  0xef   :  { %v108_v23 = vpop.f32.mrb[1].mxu0  ;;  %v7661_v28 = vadd.f32 %v5837_v22, %v5218_v21  ;;  %v340_v22 = vld [vmem:[#allocation2 + $0xa0] sm:$0xff] }
  0xf0   :  { %v7655_v24 = vadd.f32 %v5218_v21, %v108_v23 }
  0xf2   :  { %5852 = vmatmul.mubr.msk.f32.vlgmr.msra.gmra.mrb[0].mxu1 %vm209_vm3, %v7655_v24  ;;  %v194_v25 = vpop.f32.mrb[2].mxu0 }
  0xf3   :  { %5854 = vmatprep.mubr.msk.f32.mxu1 %vm7583_vm0, %v9451_v0  ;;  %v5842_v27 = vpop.f32.mrb[3].mxu0  ;;  %v7663_v29 = vadd.f32 %v5221_v26, %v194_v25 }
  0xf4   :  { %v341_v27 = vld [vmem:[#allocation2 + $0xa8] sm:$0xff] }
  0xf6   :  { %5855 = vmatmul.mubr.msk.f32.gmra.mrb[2].mxu1 %vm209_vm3, %v7661_v28 }
  0xf7   :  { %5857 = vmatprep.mubr.msk.f32.mxu1 %vm7583_vm0, %v9451_v0 }
  0xfa   :  { %5858 = vmatmul.mubr.msk.f32.gmra.mrb[4].mxu1 %vm209_vm3, %v7663_v29 }
  0xfb   :  { %5860 = vmatprep.mubr.msk.f32.mxu1 %vm7583_vm0, %v9451_v0 }
  0xfe   :  { %5861 = vmatmul.mubr.msk.f32.gmra.mrb[6].mxu1 %vm209_vm3, %v7676_v30 }
  0xff   :  { %5863 = vmatprep.mubr.msk.f32.mxu1 %vm7583_vm0, %v9451_v0 }
 0x102   :  { %5864 = vmatmul.mubr.msk.f32.gmra.mrb[8].mxu1 %vm209_vm3, %v7685_v31 }
 0x103   :  { %5901 = vmatprep.mubr.msk.f32.mxu1 %vm35_vm1, %v454_v7 }
 0x1c5   :  { %v291_v39 = vpop.f32.mrb[0].mxu1 }
 0x1c6   :  { %v292_v40 = vadd.f32 %v5223_v38, %v291_v39  ;;  %v5853_v41 = vpop.f32.mrb[1].mxu1 }
 0x1c8   :  { %v315_v43 = vmax.f32 %v292_v40, 0.0 }
 0x1c9   :  { %v296_v44 = vpop.f32.mrb[2].mxu1 }
 0x1ca   :  { %v325_v45 = vmul.f32 %v320_v42, %v315_v43  ;;  %v297_v46 = vadd.f32 %v5223_v38, %v296_v44  ;;  %v5856_v47 = vpop.f32.mrb[3].mxu1 }
 0x1cb   :  { %v646_v47 = vld [vmem:[%s9448_s0 + $0x78] sm:$0xff] }
 0x1cc   :  { %v316_v49 = vmax.f32 %v297_v46, 0.0  ;;  %5883 = vmatmul.mubr.msk.f32.vlgmr.msra.gmra.mrb[4].mxu0 %vm343_vm4, %v325_v45 }
 0x1cd   :  { %v301_v50 = vpop.f32.mrb[4].mxu1  ;;  %5885 = vmatprep.mubr.msk.f32.mxu0 %vm7583_vm0, %v9451_v0 }
 0x1ce   :  { %v326_v51 = vmul.f32 %v321_v48, %v316_v49  ;;  %v302_v52 = vadd.f32 %v5223_v38, %v301_v50  ;;  %v5859_v53 = vpop.f32.mrb[5].mxu1  ;;  %v455_v48 = vld [vmem:[%s9448_s0 + $0x30] sm:$0xff]  ;;  %v456_v49 = vld [vmem:[%s9448_s0 + $0x38] sm:$0xff]  ;;  %v647_v50 = vld [vmem:[%s9448_s0 + $0x80] sm:$0xff] }
 0x1cf   :  { %v458_v53 = vld [vmem:[%s9448_s0 + $0x48] sm:$0xff] }
 0x1d0   :  { %v317_v55 = vmax.f32 %v302_v52, 0.0  ;;  %5886 = vmatmul.mubr.msk.f32.gmra.mrb[6].mxu0 %vm343_vm4, %v326_v51  ;;  %v643_v51 = vpop.permute.xlu0 %642  ;;  %v457_v52 = vld [vmem:[%s9448_s0 + $0x40] sm:$0xff] }
 0x1d1   :  { %v306_v56 = vpop.f32.mrb[6].mxu1  ;;  %5888 = vmatprep.mubr.msk.f32.mxu0 %vm7583_vm0, %v9451_v0 }
 0x1d2   :  { %v327_v57 = vmul.f32 %v322_v54, %v317_v55  ;;  %v307_v58 = vadd.f32 %v5223_v38, %v306_v56  ;;  %v5862_v59 = vpop.f32.mrb[7].mxu1  ;;  %v645_v54 = vsel %vm209_vm3, 0.0, %v643_v51  ;;  %v459_v55 = vld [vmem:[%s9448_s0 + $0x50] sm:$0xff]  ;;  %v460_v56 = vld [vmem:[%s9448_s0 + $0x58] sm:$0xff] }
 0x1d3   :  { %v462_v59 = vld [vmem:[%s9448_s0 + $0x68] sm:$0xff] }
 0x1d4   :  { %v318_v61 = vmax.f32 %v307_v58, 0.0  ;;  %5889 = vmatmul.mubr.msk.f32.gmra.mrb[8].mxu0 %vm343_vm4, %v327_v57  ;;  %v648_v57 = vld [vmem:[%s9448_s0 + $0x90] sm:$0xff]  ;;  %v461_v58 = vld [vmem:[%s9448_s0 + $0x60] sm:$0xff] }
 0x1d5   :  { %v311_v62 = vpop.f32.mrb[8].mxu1  ;;  %5891 = vmatprep.mubr.msk.f32.mxu0 %vm7583_vm0, %v9451_v0 }
 0x1d6   :  { %v328_v63 = vmul.f32 %v323_v60, %v318_v61  ;;  %v312_v2 = vadd.f32 %v5223_v38, %v311_v62  ;;  %v5865_v3 = vpop.f32.mrb[9].mxu1  ;;  %v342_v38 = vld [vmem:[#allocation2 + $0xb0] sm:$0xff]  ;;  %v805_v61 = vld [vmem:[#allocation2 + $0xb8] sm:$0xff]  ;;  %v806_v62 = vld [vmem:[#allocation2 + $0xc0] sm:$0xff] }
 0x1d7   :  { %v463_v60 = vld [vmem:[%s9448_s0 + $0x70] sm:$0xff] }
 0x1d8   :  { %v319_v5 = vmax.f32 %v312_v2, 0.0  ;;  %5892 = vmatmul.mubr.msk.f32.gmra.mrb[10].mxu0 %vm343_vm4, %v328_v63  ;;  %v7785_v63 = vpack.c.bf16 %v806_v62, %v805_v61  ;;  %v807_v2 = vld [vmem:[#allocation2 + $0xc8] sm:$0xff] }
 0x1d9   :  { %5894 = vmatprep.mubr.msk.f32.mxu0 %vm7583_vm0, %v9451_v0 }
 0x1da   :  { %v329_v6 = vmul.f32 %v324_v4, %v319_v5 }
 0x1dc   :  { %5895 = vmatmul.mubr.msk.f32.gmra.mrb[12].mxu0 %vm343_vm4, %v329_v6 }
 0x1dd   :  { %5926 = vmatprep.mubr.msk.f32.mxu0 %vm7583_vm0, %v9451_v0 }
 0x29f   :  { %v425_v10 = vpop.f32.mrb[4].mxu0 }
 0x2a0   :  { %v5884_v11 = vpop.f32.mrb[5].mxu0  ;;  %v426_v13 = vadd.f32 %v425_v10, %v338_v9 }
 0x2a2   :  { %v449_v19 = vmax.f32 %v426_v13, 0.0 }
 0x2a3   :  { %v430_v15 = vpop.f32.mrb[6].mxu0 }
 0x2a4   :  { %v431_v16 = vadd.f32 %v430_v15, %v339_v12  ;;  %v5887_v17 = vpop.f32.mrb[7].mxu0 }
 0x2a6   :  { %v450_v21 = vmax.f32 %v431_v16, 0.0 }
 0x2a7   :  { %v435_v23 = vpop.f32.mrb[8].mxu0 }
 0x2a8   :  { %v6908_v25 = vpack.c.bf16 %v450_v21, %v449_v19  ;;  %v5890_v26 = vpop.f32.mrb[9].mxu0  ;;  %v436_v32 = vadd.f32 %v435_v23, %v340_v22 }
 0x2aa   :  { %6909 = vmatpush3.bf16.msra.mxu0 %v6908_v25  ;;  %v451_v39 = vmax.f32 %v436_v32, 0.0  ;;  %v934_v32 = vld [vmem:[#allocation2 + $0x100] sm:$0xff] }
 0x2ab   :  { %v440_v33 = vpop.f32.mrb[10].mxu0  ;;  %6910 = vmatprep.subr.bf16.mxu0 %v9459_v1 }
 0x2ac   :  { %v441_v35 = vadd.f32 %v440_v33, %v341_v27  ;;  %v5893_v36 = vpop.f32.mrb[11].mxu0  ;;  %v935_v33 = vld [vmem:[#allocation2 + $0x108] sm:$0xff] }
 0x2ad   :  { %v7822_v36 = vpack.c.bf16 %v935_v33, %v934_v32 }
 0x2ae   :  { %v452_v40 = vmax.f32 %v441_v35, 0.0  ;;  %v936_v35 = vld [vmem:[#allocation2 + $0x110] sm:$0xff] }
 0x2af   :  { %v445_v41 = vpop.f32.mrb[12].mxu0 }
 0x2b0   :  { %v6911_v42 = vpack.c.bf16 %v452_v40, %v451_v39  ;;  %v446_v43 = vadd.f32 %v445_v41, %v342_v38  ;;  %v5896_v44 = vpop.f32.mrb[13].mxu0  ;;  %v937_v38 = vld [vmem:[#allocation2 + $0x118] sm:$0xff]  ;;  %v939_v41 = vld [vmem:[#allocation2 + $0x128] sm:$0xff] }
 0x2b1   :  { %v7825_v39 = vpack.c.bf16 %v937_v38, %v936_v35  ;;  %v941_v44 = vld [vmem:[#allocation2 + $0x138] sm:$0xff]  ;;  %v1315_v35 = vld [vmem:[#allocation2 + $0x240] sm:$0xff]  ;;  %v1316_v38 = vld [vmem:[#allocation2 + $0x248] sm:$0xff] }
 0x2b2   :  { %v453_v45 = vmax.f32 %v446_v43, 0.0  ;;  %6912 = vmatpush3.bf16.msra.mxu0 %v6911_v42  ;;  %v940_v43 = vld [vmem:[#allocation2 + $0x130] sm:$0xff] }
 0x2b3   :  { %5924 = vmatprep.subr.mxu0 %v9451_v0 }
 0x2b4   :  { %v6903_v46 = vpack.c.bf16 %v453_v45, %v452_v40  ;;  %v938_v40 = vld [vmem:[#allocation2 + $0x120] sm:$0xff] }
 0x2b5   :  { %v7831_v42 = vpack.c.bf16 %v939_v41, %v938_v40 }
 0x2b6   :  { %6904 = vmatprep.subr.bf16.mxu1 %v6903_v46  ;;  %5925 = vmatpush3.msra.mxu0 %v453_v45  ;;  %v7837_v45 = vpack.c.bf16 %v941_v44, %v940_v43  ;;  %v925_v43 = vld [vmem:[#allocation2 + $0xe0] sm:$0xff] }
 0x2b7   :  { %6906 = vmatpush3.bf16.msra.mxu1 %v6903_v46  ;;  %5927 = vmatmul.mubr.msk.f32.vlgmr.msra.gmra.mrb[14].mxu0 %vm649_vm5, %v646_v47  ;;  %v942_v46 = vld [vmem:[#allocation2 + $0x140] sm:$0xff]  ;;  %v943_v47 = vld [vmem:[#allocation2 + $0x148] sm:$0xff] }
 0x2b8   :  { %5929 = vmatprep.mubr.msk.f32.mxu0 %vm7583_vm0, %v9451_v0  ;;  %6913 = vmatprep.subr.bf16.mxu1 %v9459_v1 }
 0x2b9   :  { %6916 = vmatprep.subr.bf16.mxu0 %v9459_v1 }
 0x2ba   :  { %5902 = vmatmul.mubr.msk.f32.vlgmr.msra.gmra.mrb[10].mxu1 %vm35_vm1, %v455_v48  ;;  %6918 = vmatpush3.bf16.msra.mxu0 %v7822_v36  ;;  %v7843_v48 = vpack.c.bf16 %v943_v47, %v942_v46  ;;  %v7906_v46 = vpack.c.bf16 %v1316_v38, %v1315_v35  ;;  %v1325_v38 = vld [vmem:[#allocation2 + $0x290] sm:$0xff] }
 0x2bb   :  { %5904 = vmatprep.mubr.msk.f32.mxu1 %vm35_vm1, %v456_v49  ;;  %5930 = vmatmul.mubr.msk.f32.gmra.mrb[16].mxu0 %vm649_vm5, %v647_v50 }
 0x2bc   :  { %5932 = vmatprep.mubr.msk.f32.mxu0 %vm7583_vm0, %v9451_v0  ;;  %6915 = vmatpush3.bf16.msra.mxu1 %v7785_v63  ;;  %9494 = vst [vmem:[#allocation11_spill] sm:$0xff] %v7906_v46 }
 0x2bd   :  { %5945 = vmatprep.subr.mxu1 %v9451_v0  ;;  %6919 = vmatprep.subr.bf16.mxu0 %v9459_v1 }
 0x2be   :  { %5905 = vmatmul.mubr.msk.f32.gmra.mrb[12].mxu1 %vm35_vm1, %v457_v52  ;;  %6921 = vmatpush3.bf16.msra.mxu0 %v7825_v39 }
 0x2bf   :  { %5907 = vmatprep.mubr.msk.f32.mxu1 %vm35_vm1, %v458_v53  ;;  %5933 = vmatmul.mubr.msk.f32.gmra.mrb[18].mxu0 %vm649_vm5, %v645_v54 }
 0x2c0   :  { %5935 = vmatprep.mubr.msk.f32.mxu0 %vm7583_vm0, %v9451_v0  ;;  %5946 = vmatpush3.msra.mxu1 %v807_v2 }
 0x2c1   :  { %6934 = vmatprep.subr.bf16.mxu1 %v9459_v1  ;;  %6922 = vmatprep.subr.bf16.mxu0 %v9459_v1 }
 0x2c2   :  { %5908 = vmatmul.mubr.msk.f32.gmra.mrb[14].mxu1 %vm35_vm1, %v459_v55  ;;  %6924 = vmatpush3.bf16.msra.mxu0 %v7831_v42 }
 0x2c3   :  { %5910 = vmatprep.mubr.msk.f32.mxu1 %vm35_vm1, %v460_v56  ;;  %5936 = vmatmul.mubr.msk.f32.gmra.mrb[20].mxu0 %vm649_vm5, %v648_v57 }
 0x2c4   :  { %5938 = vmatprep.mubr.msk.f32.mxu0 %vm7583_vm0, %v9451_v0  ;;  %6925 = vmatprep.subr.bf16.mxu0 %v9459_v1 }
 0x2c6   :  { %5911 = vmatmul.mubr.msk.f32.gmra.mrb[16].mxu1 %vm35_vm1, %v461_v58  ;;  %6927 = vmatpush3.bf16.msra.mxu0 %v7837_v45 }
 0x2c7   :  { %5913 = vmatprep.mubr.msk.f32.mxu1 %vm35_vm1, %v462_v59  ;;  %5939 = vmatmul.mubr.f32.gmra.mrb[22].mxu0 %v9451_v0 }
 0x2c8   :  { %5986 = vmatprep.mubr.msk.f32.mxu0 %vm7583_vm0, %v9451_v0  ;;  %6928 = vmatprep.subr.bf16.mxu0 %v9459_v1 }
 0x2ca   :  { %5914 = vmatmul.mubr.msk.f32.gmra.mrb[18].mxu1 %vm35_vm1, %v463_v60  ;;  %6930 = vmatpush3.bf16.msra.mxu0 %v7843_v48 }
 0x2cb   :  { %5947 = vmatprep.mubr.msk.f32.mxu1 %vm7583_vm0, %v9451_v0  ;;  %6931 = vmatprep.subr.bf16.mxu0 %v9459_v1 }
 0x38a   :  { %v731_v3 = vpop.f32.mrb[14].mxu0 }
 0x38b   :  { %780 = vrot.lane.b32.xlu1 %v731_v3, %s7587_s3  ;;  %v5928_v4 = vpop.f32.mrb[15].mxu0 }
 0x38d   :  { %v7791_v5 = vpop.f32.mrb[10].mxu1 }
 0x38e   :  { %v7793_v6 = vpop.f32.mrb[11].mxu1  ;;  %v736_v7 = vpop.f32.mrb[16].mxu0 }
 0x38f   :  { %v5931_v9 = vpop.f32.mrb[17].mxu0 }
 0x390   :  { %v944_v9 = vld [vmem:[#allocation2 + $0x150] sm:$0xff] }
 0x391   :  { %v7795_v10 = vpop.f32.mrb[12].mxu1 }
 0x392   :  { %v7797_v11 = vpop.f32.mrb[13].mxu1  ;;  %v741_v12 = vpop.f32.mrb[18].mxu0 }
 0x393   :  { %v5934_v13 = vpop.f32.mrb[19].mxu0 }
 0x395   :  { %v5909_v15 = vpop.f32.mrb[14].mxu1 }
 0x396   :  { %760 = vrot.lane.b32.xlu0 %v5909_v15, %s7582_s20  ;;  %v7800_v16 = vpop.f32.mrb[15].mxu1  ;;  %v746_v17 = vpop.f32.mrb[20].mxu0  ;;  %v5248_v15 = vld [vmem:[#allocation2 + $0xd0] ss:$0 sm:$0xff] }
 0x397   :  { %v5937_v19 = vpop.f32.mrb[21].mxu0 }
 0x399   :  { %v5912_v21 = vpop.f32.mrb[16].mxu1 }
 0x39a   :  { %782 = vrot.lane.b32.xlu0 %v736_v7, %s7587_s3  ;;  %v590_v22 = vpop.f32.mrb[17].mxu1  ;;  %v751_v23 = vpop.f32.mrb[22].mxu0 }
 0x39b   :  { %762 = vrot.lane.b32.xlu1 %v590_v22, %s7582_s20  ;;  %v5940_v25 = vpop.f32.mrb[23].mxu0  ;;  %v1314_v22 = vld [vmem:[#allocation2 + $0x238] sm:$0xff] }
 0x39d   :  { %v5915_v26 = vpop.f32.mrb[18].mxu1 }
 0x39e   :  { %784 = vrot.lane.b32.xlu0 %v741_v12, %s7587_s3  ;;  %v600_v27 = vpop.f32.mrb[19].mxu1 }
 0x39f   :  { %764 = vrot.lane.b32.xlu1 %v5912_v21, %s7582_s20  ;;  %v1313_v21 = vld [vmem:[#allocation2 + $0x230] sm:$0xff] }
 0x3a2   :  { %786 = vrot.lane.b32.xlu0 %v746_v17, %s7587_s3 }
 0x3a3   :  { %766 = vrot.lane.b32.xlu1 %v600_v27, %s7582_s20  ;;  %v7900_v27 = vpack.c.bf16 %v1314_v22, %v1313_v21  ;;  %v928_v21 = vld [vmem:[#allocation2 + $0xf8] sm:$0xff] }
 0x3a5   :  { %9493 = vst [vmem:[#allocation10_spill] sm:$0xff] %v7900_v27 }
 0x3a6   :  { %788 = vrot.lane.b32.xlu0 %v751_v23, %s7587_s3  ;;  %v924_v23 = vld [vmem:[#allocation2 + $0xd8] sm:$0xff] }
 0x3a7   :  { %768 = vrot.lane.b32.xlu1 %v5915_v26, %s7582_s20 }
 0x3aa   :  { %1137 = vrot.lane.b32.xlu0 %v7655_v24, %s7586_s4 }
 0x3ae   :  { %1152 = vrot.lane.b32.xlu0 %v7655_v24, %s7588_s5 }
 0x3b2   :  { %1167 = vrot.lane.b32.xlu0 %v7655_v24, %s7589_s6 }
 0x3b6   :  { %1139 = vrot.lane.b32.xlu0 %v7661_v28, %s7586_s4 }
 0x3ba   :  { %1154 = vrot.lane.b32.xlu0 %v7661_v28, %s7588_s5 }
 0x3be   :  { %1169 = vrot.lane.b32.xlu0 %v7661_v28, %s7589_s6 }
 0x3c2   :  { %1141 = vrot.lane.b32.xlu0 %v7663_v29, %s7586_s4 }
 0x3c6   :  { %1156 = vrot.lane.b32.xlu0 %v7663_v29, %s7588_s5 }
 0x3ca   :  { %1171 = vrot.lane.b32.xlu0 %v7663_v29, %s7589_s6 }
 0x3ce   :  { %1143 = vrot.lane.b32.xlu0 %v7676_v30, %s7586_s4 }
 0x3d2   :  { %1158 = vrot.lane.b32.xlu0 %v7676_v30, %s7588_s5 }
 0x3d6   :  { %1173 = vrot.lane.b32.xlu0 %v7676_v30, %s7589_s6 }
 0x3da   :  { %1145 = vrot.lane.b32.xlu0 %v7685_v31, %s7586_s4 }
 0x3de   :  { %1160 = vrot.lane.b32.xlu0 %v7685_v31, %s7588_s5 }
 0x3e2   :  { %1175 = vrot.lane.b32.xlu0 %v7685_v31, %s7589_s6 }
 0x3fd   :  { %v781_v49 = vpop.permute.xlu1 %780 }
 0x408   :  { %v761_v50 = vpop.permute.xlu0 %760 }
 0x409   :  { %v795_v51 = vsel %vm124_vm2, %v7793_v6, %v761_v50  ;;  %v1317_v50 = vld [vmem:[#allocation2 + $0x250] sm:$0xff] }
 0x40a   :  { %v800_v52 = vsel %vm35_vm1, %v795_v51, %v781_v49  ;;  %v1318_v51 = vld [vmem:[#allocation2 + $0x258] sm:$0xff] }
 0x40b   :  { %5948 = vmatmul.mubr.msk.f32.vlgmr.msra.gmra.mrb[20].mxu1 %vm813_vm6, %v800_v52 }
 0x40c   :  { %v783_v53 = vpop.permute.xlu0 %782  ;;  %5950 = vmatprep.mubr.msk.f32.mxu1 %vm7583_vm0, %v9451_v0 }
 0x40d   :  { %v763_v54 = vpop.permute.xlu1 %762 }
 0x40e   :  { %v796_v55 = vsel %vm124_vm2, %v7791_v5, %v763_v54 }
 0x40f   :  { %v801_v56 = vsel %vm35_vm1, %v796_v55, %v783_v53  ;;  %v926_v55 = vld [vmem:[#allocation2 + $0xe8] sm:$0xff] }
 0x410   :  { %v785_v57 = vpop.permute.xlu0 %784  ;;  %5951 = vmatmul.mubr.msk.f32.gmra.mrb[22].mxu1 %vm813_vm6, %v801_v56 }
 0x411   :  { %v765_v58 = vpop.permute.xlu1 %764  ;;  %5953 = vmatprep.mubr.msk.f32.mxu1 %vm7583_vm0, %v9451_v0 }
 0x412   :  { %v797_v59 = vsel %vm124_vm2, %v7797_v11, %v765_v58 }
 0x413   :  { %v802_v60 = vsel %vm35_vm1, %v797_v59, %v785_v57  ;;  %v7912_v57 = vpack.c.bf16 %v1318_v51, %v1317_v50  ;;  %v1319_v59 = vld [vmem:[#allocation2 + $0x260] sm:$0xff] }
 0x414   :  { %v787_v61 = vpop.permute.xlu0 %786  ;;  %5954 = vmatmul.mubr.msk.f32.gmra.mrb[24].mxu1 %vm813_vm6, %v802_v60  ;;  %v1320_v60 = vld [vmem:[#allocation2 + $0x268] sm:$0xff] }
 0x415   :  { %v767_v62 = vpop.permute.xlu1 %766  ;;  %5956 = vmatprep.mubr.msk.f32.mxu1 %vm7583_vm0, %v9451_v0  ;;  %9495 = vst [vmem:[#allocation12_spill] sm:$0xff] %v7912_v57 }
 0x416   :  { %v798_v2 = vsel %vm124_vm2, %v7795_v10, %v767_v62  ;;  %v945_v10 = vld [vmem:[#allocation2 + $0x158] sm:$0xff] }
 0x417   :  { %v803_v3 = vsel %vm35_vm1, %v798_v2, %v787_v61  ;;  %v7890_v11 = vpack.c.bf16 %v945_v10, %v944_v9  ;;  %v1321_v9 = vld [vmem:[#allocation2 + $0x270] sm:$0xff]  ;;  %v1322_v10 = vld [vmem:[#allocation2 + $0x278] sm:$0xff] }
 0x418   :  { %5957 = vmatmul.mubr.msk.f32.gmra.mrb[26].mxu1 %vm813_vm6, %v803_v3  ;;  %v789_v5 = vpop.permute.xlu0 %788 }
 0x419   :  { %v769_v4 = vpop.permute.xlu1 %768  ;;  %5959 = vmatprep.mubr.msk.f32.mxu1 %vm7583_vm0, %v9451_v0  ;;  %6933 = vmatpush3.bf16.msra.mxu0 %v7890_v11 }
 0x41a   :  { %v799_v6 = vsel %vm124_vm2, %v7800_v16, %v769_v4  ;;  %6958 = vmatprep.subr.bf16.mxu0 %v9459_v1  ;;  %v927_v4 = vld [vmem:[#allocation2 + $0xf0] sm:$0xff] }
 0x41b   :  { %v804_v7 = vsel %vm35_vm1, %v799_v6, %v789_v5  ;;  %v7919_v6 = vpack.c.bf16 %v1320_v60, %v1319_v59 }
 0x41c   :  { %5960 = vmatmul.mubr.msk.f32.gmra.mrb[28].mxu1 %vm813_vm6, %v804_v7  ;;  %v7894_v12 = vpop.permute.xlu0 %1137 }
 0x41d   :  { %6033 = vmatprep.mubr.msk.f32.mxu1 %vm7583_vm0, %v9451_v0  ;;  %9496 = vst [vmem:[#allocation13_spill] sm:$0xff] %v7919_v6  ;;  %v1182_v50 = vsel %vm209_vm3, %v7655_v24, %v7894_v12 }
 0x420   :  { %v7896_v13 = vpop.permute.xlu0 %1152 }
 0x424   :  { %v7898_v25 = vpop.permute.xlu0 %1167 }
 0x428   :  { %v7908_v47 = vpop.permute.xlu0 %1139 }
 0x42c   :  { %v1155_v3 = vpop.permute.xlu0 %1154 }
 0x4de   :  { %v895_v16 = vpop.f32.mrb[20].mxu1 }
 0x4df   :  { %v896_v17 = vadd.f32 %v5248_v15, %v895_v16  ;;  %v5949_v19 = vpop.f32.mrb[21].mxu1 }
 0x4e1   :  { %v919_v26 = vmax.f32 %v896_v17, 0.0 }
 0x4e3   :  { %v929_v32 = vmul.f32 %v924_v23, %v919_v26  ;;  %v900_v33 = vpop.f32.mrb[22].mxu1  ;;  %v7926_v23 = vpack.c.bf16 %v1322_v10, %v1321_v9  ;;  %v1170_v26 = vpop.permute.xlu0 %1169  ;;  %v1203_v9 = vld [vmem:[#allocation2 + $0x190] sm:$0xff]  ;;  %v1204_v10 = vld [vmem:[#allocation2 + $0x198] sm:$0xff] }
 0x4e4   :  { %v901_v40 = vadd.f32 %v5248_v15, %v900_v33  ;;  %v5952_v41 = vpop.f32.mrb[23].mxu1  ;;  %v1324_v33 = vld [vmem:[#allocation2 + $0x288] sm:$0xff] }
 0x4e5   :  { %5987 = vmatmul.mubr.msk.f32.vlgmr.msra.gmra.mrb[24].mxu0 %vm951_vm7, %v929_v32  ;;  %9497 = vst [vmem:[#allocation14_spill] sm:$0xff] %v7926_v23  ;;  %v1323_v32 = vld [vmem:[#allocation2 + $0x280] sm:$0xff] }
 0x4e6   :  { %v920_v44 = vmax.f32 %v901_v40, 0.0  ;;  %6960 = vmatpush3.bf16.msra.mxu0 %v7900_v27  ;;  %5989 = vmatprep.mubr.msk.f32.mxu0 %vm7583_vm0, %v9451_v0  ;;  %v1326_v40 = vld [vmem:[#allocation2 + $0x298] sm:$0xff] }
 0x4e7   :  { %v905_v49 = vpop.f32.mrb[24].mxu1  ;;  %6961 = vmatprep.subr.bf16.mxu0 %v9459_v1  ;;  %v7939_v41 = vpop.permute.xlu0 %1141 }
 0x4e8   :  { %v930_v52 = vmul.f32 %v925_v43, %v920_v44  ;;  %v906_v53 = vadd.f32 %v5248_v15, %v905_v49  ;;  %v5955_v54 = vpop.f32.mrb[25].mxu1  ;;  %v7942_v43 = vpack.c.bf16 %v1326_v40, %v1325_v38  ;;  %v1327_v44 = vld [vmem:[#allocation2 + $0x2a0] sm:$0xff]  ;;  %v1328_v49 = vld [vmem:[#allocation2 + $0x2a8] sm:$0xff]  ;;  %v1211_v40 = vld [vmem:[#allocation2 + $0x1d0] sm:$0xff] }
 0x4e9   :  { %v7949_v51 = vpack.c.bf16 %v1328_v49, %v1327_v44  ;;  %v7954_v54 = vld [vmem:[#allocation2 + $0x380] sm:$0xff]  ;;  %v1210_v38 = vld [vmem:[#allocation2 + $0x1c8] sm:$0xff]  ;;  %v1212_v49 = vld [vmem:[#allocation2 + $0x1d8] sm:$0xff] }
 0x4ea   :  { %v921_v56 = vmax.f32 %v906_v53, 0.0  ;;  %6963 = vmatpush3.bf16.msra.mxu0 %v7906_v46  ;;  %9499 = vst [vmem:[#allocation16_spill] sm:$0xff] %v7942_v43  ;;  %v7998_v44 = vpack.c.bf16 %v1211_v40, %v1210_v38 }
 0x4eb   :  { %5990 = vmatmul.mubr.msk.f32.gmra.mrb[26].mxu0 %vm951_vm7, %v930_v52  ;;  %v910_v58 = vpop.f32.mrb[26].mxu1  ;;  %6964 = vmatprep.subr.bf16.mxu0 %v9459_v1  ;;  %9500 = vst [vmem:[#allocation17_spill] sm:$0xff] %v7949_v51  ;;  %v1187_v52 = vsel %vm343_vm4, %v1182_v50, %v7896_v13  ;;  %v1157_v53 = vpop.permute.xlu0 %1156  ;;  %v7965_v13 = vld [vmem:[#allocation2 + $0x388] sm:$0xff]  ;;  %v1213_v50 = vld [vmem:[#allocation2 + $0x1e0] sm:$0xff] }
 0x4ec   :  { %v931_v61 = vmul.f32 %v926_v55, %v921_v56  ;;  %v911_v62 = vadd.f32 %v5248_v15, %v910_v58  ;;  %v5958_v2 = vpop.f32.mrb[27].mxu1  ;;  %5992 = vmatprep.mubr.msk.f32.mxu0 %vm7583_vm0, %v9451_v0  ;;  %v1192_v55 = vsel %vm951_vm7, %v1187_v52, %v7898_v25  ;;  %v1183_v56 = vsel %vm209_vm3, %v7661_v28, %v7908_v47 }
 0x4ed   :  { %v1197_v58 = vmul.f32 %v1192_v55, %v7954_v54  ;;  %v1188_v59 = vsel %vm343_vm4, %v1183_v56, %v1155_v3  ;;  %v1184_v25 = vsel %vm209_vm3, %v7663_v29, %v7939_v41  ;;  %v7975_v3 = vld [vmem:[#allocation2 + $0x390] sm:$0xff]  ;;  %9503 = vst [vmem:[#allocation20_spill] sm:$0xff] %v7998_v44  ;;  %v8003_v52 = vpack.c.bf16 %v1213_v50, %v1212_v49 }
 0x4ee   :  { %v922_v5 = vmax.f32 %v911_v62, 0.0  ;;  %6966 = vmatpush3.bf16.msra.mxu0 %v7912_v57  ;;  %v1193_v60 = vsel %vm951_vm7, %v1188_v59, %v1170_v26  ;;  %v1189_v2 = vsel %vm343_vm4, %v1184_v25, %v1157_v53  ;;  %v1214_v53 = vld [vmem:[#allocation2 + $0x1e8] sm:$0xff]  ;;  %v1215_v55 = vld [vmem:[#allocation2 + $0x1f0] sm:$0xff]  ;;  %v1216_v59 = vld [vmem:[#allocation2 + $0x1f8] sm:$0xff] }
 0x4ef   :  { %5993 = vmatmul.mubr.msk.f32.gmra.mrb[28].mxu0 %vm951_vm7, %v931_v61  ;;  %v915_v7 = vpop.f32.mrb[28].mxu1  ;;  %6967 = vmatprep.subr.bf16.mxu0 %v9459_v1  ;;  %v1172_v61 = vpop.permute.xlu0 %1171  ;;  %v1198_v62 = vmul.f32 %v1193_v60, %v7965_v13  ;;  %9504 = vst [vmem:[#allocation21_spill] sm:$0xff] %v8003_v52  ;;  %v8007_v56 = vpack.c.bf16 %v1215_v55, %v1214_v53  ;;  %v1217_v60 = vld [vmem:[#allocation2 + $0x200] sm:$0xff]  ;;  %v948_v49 = vld [vmem:[#allocation2 + $0x170] sm:$0xff] }
 0x4f0   :  { %v932_v16 = vmul.f32 %v927_v4, %v922_v5  ;;  %v916_v17 = vadd.f32 %v5248_v15, %v915_v7  ;;  %v5961_v19 = vpop.f32.mrb[29].mxu1  ;;  %5995 = vmatprep.mubr.msk.f32.mxu0 %vm7583_vm0, %v9451_v0  ;;  %v7933_v15 = vpack.c.bf16 %v1324_v33, %v1323_v32  ;;  %v1194_v4 = vsel %vm951_vm7, %v1189_v2, %v1172_v61  ;;  %v1202_v7 = vld [vmem:[#allocation2 + $0x188] sm:$0xff]  ;;  %v1208_v32 = vld [vmem:[#allocation2 + $0x1b8] sm:$0xff]  ;;  %v1209_v33 = vld [vmem:[#allocation2 + $0x1c0] sm:$0xff] }
 0x4f1   :  { %v1199_v5 = vmul.f32 %v1194_v4, %v7975_v3  ;;  %9505 = vst [vmem:[#allocation22_spill] sm:$0xff] %v8007_v56  ;;  %v8011_v61 = vpack.c.bf16 %v1217_v60, %v1216_v59 }
 0x4f2   :  { %v923_v22 = vmax.f32 %v916_v17, 0.0  ;;  %6969 = vmatpush3.bf16.msra.mxu0 %v7919_v6  ;;  %9498 = vst [vmem:[#allocation15_spill] sm:$0xff] %v7933_v15  ;;  %v1205_v17 = vld [vmem:[#allocation2 + $0x1a0] sm:$0xff] }
 0x4f3   :  { %5996 = vmatmul.mubr.msk.f32.gmra.mrb[30].mxu0 %vm951_vm7, %v932_v16  ;;  %6970 = vmatprep.subr.bf16.mxu0 %v9459_v1  ;;  %v7983_v16 = vpack.c.bf16 %v1203_v9, %v1202_v7  ;;  %v7986_v19 = vpack.c.bf16 %v1205_v17, %v1204_v10  ;;  %9506 = vst [vmem:[#allocation23_spill] sm:$0xff] %v8011_v61  ;;  %v947_v9 = vld [vmem:[#allocation2 + $0x168] sm:$0xff]  ;;  %v8029_v50 = vpop.permute.xlu0 %1143 }
 0x4f4   :  { %v933_v35 = vmul.f32 %v928_v21, %v923_v22  ;;  %5998 = vmatprep.mubr.msk.f32.mxu0 %vm7583_vm0, %v9451_v0  ;;  %v1206_v21 = vld [vmem:[#allocation2 + $0x1a8] sm:$0xff]  ;;  %v1207_v22 = vld [vmem:[#allocation2 + $0x1b0] sm:$0xff]  ;;  %v1185_v55 = vsel %vm209_vm3, %v7676_v30, %v8029_v50 }
 0x4f5   :  { %6936 = vmatpush3.bf16.msra.mxu1 %v7983_v16  ;;  %v7990_v26 = vpack.c.bf16 %v1207_v22, %v1206_v21 }
 0x4f6   :  { %6972 = vmatpush3.bf16.msra.mxu0 %v7926_v23  ;;  %6937 = vmatprep.subr.bf16.mxu1 %v9459_v1 }
 0x4f7   :  { %5999 = vmatmul.mubr.msk.f32.gmra.mrb[32].mxu0 %vm951_vm7, %v933_v35  ;;  %6973 = vmatprep.subr.bf16.mxu0 %v9459_v1  ;;  %9501 = vst [vmem:[#allocation18_spill] sm:$0xff] %v7990_v26  ;;  %v7994_v35 = vpack.c.bf16 %v1209_v33, %v1208_v32 }
 0x4f8   :  { %6080 = vmatprep.mubr.msk.f32.mxu0 %vm7583_vm0, %v9451_v0 }
 0x4f9   :  { %6939 = vmatpush3.bf16.msra.mxu1 %v7986_v19  ;;  %9502 = vst [vmem:[#allocation19_spill] sm:$0xff] %v7994_v35 }
 0x4fa   :  { %6975 = vmatpush3.bf16.msra.mxu0 %v7933_v15  ;;  %6940 = vmatprep.subr.bf16.mxu1 %v9459_v1 }
 0x4fb   :  { %6976 = vmatprep.subr.bf16.mxu0 %v9459_v1 }
 0x4fd   :  { %6942 = vmatpush3.bf16.msra.mxu1 %v7990_v26 }
 0x4fe   :  { %6978 = vmatpush3.bf16.msra.mxu0 %v7942_v43  ;;  %6943 = vmatprep.subr.bf16.mxu1 %v9459_v1 }
 0x4ff   :  { %6979 = vmatprep.subr.bf16.mxu0 %v9459_v1 }
 0x501   :  { %6945 = vmatpush3.bf16.msra.mxu1 %v7994_v35 }
 0x502   :  { %6981 = vmatpush3.bf16.msra.mxu0 %v7949_v51  ;;  %6946 = vmatprep.subr.bf16.mxu1 %v9459_v1 }
 0x503   :  { %7006 = vmatprep.subr.bf16.mxu0 %v9459_v1 }
 0x505   :  { %6081 = vmatmul.mubr.f32.vlgmr.msra.gmra.mrb[34].mxu0 %v1197_v58  ;;  %6948 = vmatpush3.bf16.msra.mxu1 %v7998_v44  ;;  %v946_v58 = vld [vmem:[#allocation2 + $0x160] sm:$0xff] }
 0x506   :  { %6083 = vmatprep.mubr.msk.f32.mxu0 %vm7583_vm0, %v9451_v0  ;;  %6949 = vmatprep.subr.bf16.mxu1 %v9459_v1 }
 0x509   :  { %6084 = vmatmul.mubr.f32.gmra.mrb[36].mxu0 %v1198_v62  ;;  %6951 = vmatpush3.bf16.msra.mxu1 %v8003_v52 }
 0x50a   :  { %6086 = vmatprep.mubr.msk.f32.mxu0 %vm7583_vm0, %v9451_v0  ;;  %6952 = vmatprep.subr.bf16.mxu1 %v9459_v1 }
 0x50d   :  { %6087 = vmatmul.mubr.f32.gmra.mrb[38].mxu0 %v1199_v5  ;;  %6954 = vmatpush3.bf16.msra.mxu1 %v8007_v56 }
 0x50e   :  { %6089 = vmatprep.mubr.msk.f32.mxu0 %vm7583_vm0, %v9451_v0  ;;  %6955 = vmatprep.subr.bf16.mxu1 %v9459_v1 }
 0x511   :  { %6957 = vmatpush3.bf16.msra.mxu1 %v8011_v61 }
 0x512   :  { %6982 = vmatprep.subr.bf16.mxu1 %v9459_v1 }
 0x5b8   :  { %v1033_v25 = vpop.f32.mrb[24].mxu0 }
 0x5b9   :  { %v1034_v62 = vadd.f32 %v1033_v25, %v946_v58  ;;  %v5988_v2 = vpop.f32.mrb[25].mxu0  ;;  %v1159_v58 = vpop.permute.xlu0 %1158 }
 0x5ba   :  { %v1190_v60 = vsel %vm343_vm4, %v1185_v55, %v1159_v58 }
 0x5bb   :  { %v8015_v4 = vmax.f32 %v1034_v62, 0.0  ;;  %v8038_v62 = vld [vmem:[#allocation2 + $0x398] sm:$0xff] }
 0x5bd   :  { %1072 = vrot.lane.b32.xlu1 %v8015_v4, %s7586_s4  ;;  %v1174_v25 = vpop.permute.xlu0 %1173 }
 0x5be   :  { %v1038_v5 = vpop.f32.mrb[26].mxu0  ;;  %v1195_v2 = vsel %vm951_vm7, %v1190_v60, %v1174_v25 }
 0x5bf   :  { %v5991_v7 = vpop.f32.mrb[27].mxu0  ;;  %v1039_v17 = vadd.f32 %v1038_v5, %v947_v9  ;;  %v1200_v5 = vmul.f32 %v1195_v2, %v8038_v62 }
 0x5c0   :  { %v949_v7 = vld [vmem:[#allocation2 + $0x178] sm:$0xff] }
 0x5c1   :  { %1087 = vrot.lane.b32.xlu1 %v8015_v4, %s7588_s5  ;;  %v8023_v32 = vmax.f32 %v1039_v17, 0.0  ;;  %v8045_v30 = vpop.permute.xlu0 %1145  ;;  %6090 = vmatmul.mubr.f32.gmra.mrb[40].mxu0 %v1200_v5 }
 0x5c2   :  { %v1043_v10 = vpop.f32.mrb[28].mxu0  ;;  %6092 = vmatprep.mubr.msk.f32.mxu0 %vm7583_vm0, %v9451_v0 }
 0x5c3   :  { %v5994_v21 = vpop.f32.mrb[29].mxu0  ;;  %v1044_v53 = vadd.f32 %v1043_v10, %v948_v49 }
 0x5c5   :  { %1102 = vrot.lane.b32.xlu1 %v8015_v4, %s7589_s6  ;;  %v1059_v59 = vmax.f32 %v1044_v53, 0.0  ;;  %v1161_v49 = vpop.permute.xlu0 %1160 }
 0x5c6   :  { %v1048_v22 = vpop.f32.mrb[30].mxu0 }
 0x5c7   :  { %v5997_v33 = vpop.f32.mrb[31].mxu0  ;;  %v1049_v17 = vadd.f32 %v1048_v22, %v949_v7  ;;  %v8059_v22 = vld [vmem:[#allocation2 + $0x3a0] sm:$0xff] }
 0x5c8   :  { %v950_v7 = vld [vmem:[#allocation2 + $0x180] sm:$0xff] }
 0x5c9   :  { %1074 = vrot.lane.b32.xlu1 %v8023_v32, %s7586_s4  ;;  %v1060_v53 = vmax.f32 %v1049_v17, 0.0  ;;  %v1176_v25 = vpop.permute.xlu0 %1175 }
 0x5ca   :  { %v1053_v38 = vpop.f32.mrb[32].mxu0 }
 0x5cb   :  { %v6000_v40 = vpop.f32.mrb[33].mxu0 }
 0x5cc   :  { %v1186_v40 = vsel %vm209_vm3, %v7685_v31, %v8045_v30  ;;  %v1054_v31 = vadd.f32 %v1053_v38, %v950_v7 }
 0x5cd   :  { %1089 = vrot.lane.b32.xlu1 %v8023_v32, %s7588_s5  ;;  %v1191_v58 = vsel %vm343_vm4, %v1186_v40, %v1161_v49 }
 0x5ce   :  { %v1196_v2 = vsel %vm951_vm7, %v1191_v58, %v1176_v25 }
 0x5cf   :  { %v1201_v5 = vmul.f32 %v1196_v2, %v8059_v22 }
 0x5d1   :  { %1104 = vrot.lane.b32.xlu1 %v8023_v32, %s7589_s6  ;;  %6093 = vmatmul.mubr.f32.gmra.mrb[42].mxu0 %v1201_v5 }
 0x5d2   :  { %6150 = vmatprep.mubr.msk.f32.mxu0 %vm7583_vm0, %v9451_v0 }
 0x5d5   :  { %1076 = vrot.lane.b32.xlu1 %v1059_v59, %s7586_s4 }
 0x5d8   :  { %v8042_v9 = vpop.f32.mrb[34].mxu0 }
 0x5d9   :  { %v6082_v10 = vpop.f32.mrb[35].mxu0  ;;  %1091 = vrot.lane.b32.xlu1 %v1059_v59, %s7588_s5 }
 0x5da   :  { %v1061_v10 = vmax.f32 %v1054_v31, 0.0 }
 0x5dc   :  { %v8049_v21 = vpop.f32.mrb[36].mxu0 }
 0x5dd   :  { %v6085_v33 = vpop.f32.mrb[37].mxu0  ;;  %1106 = vrot.lane.b32.xlu1 %v1059_v59, %s7589_s6 }
 0x5e0   :  { %v8055_v55 = vpop.f32.mrb[38].mxu0 }
 0x5e1   :  { %v6088_v60 = vpop.f32.mrb[39].mxu0  ;;  %1078 = vrot.lane.b32.xlu1 %v1060_v53, %s7586_s4 }
 0x5e5   :  { %1093 = vrot.lane.b32.xlu1 %v1060_v53, %s7588_s5 }
 0x5e9   :  { %1108 = vrot.lane.b32.xlu1 %v1060_v53, %s7589_s6 }
 0x5ed   :  { %1080 = vrot.lane.b32.xlu1 %v1061_v10, %s7586_s4 }
 0x5f1   :  { %1095 = vrot.lane.b32.xlu1 %v1061_v10, %s7588_s5 }
 0x5f5   :  { %1110 = vrot.lane.b32.xlu1 %v1061_v10, %s7589_s6 }
 0x62f   :  { %v1073_v17 = vpop.permute.xlu1 %1072 }
 0x630   :  { %v1117_v40 = vsel %vm209_vm3, %v8015_v4, %v1073_v17 }
 0x633   :  { %v1088_v33 = vpop.permute.xlu1 %1087 }
 0x634   :  { %v1122_v49 = vsel %vm343_vm4, %v1117_v40, %v1088_v33 }
 0x637   :  { %v1103_v58 = vpop.permute.xlu1 %1102 }
 0x638   :  { %v1127_v60 = vsel %vm951_vm7, %v1122_v49, %v1103_v58 }
 0x639   :  { %v1132_v38 = vmul.f32 %v1127_v60, %v7954_v54 }
 0x63b   :  { %6034 = vmatmul.mubr.f32.vlgmr.msra.gmra.mrb[30].mxu1 %v1132_v38  ;;  %v1075_v25 = vpop.permute.xlu1 %1074 }
 0x63c   :  { %6036 = vmatprep.mubr.msk.f32.mxu1 %vm7583_vm0, %v9451_v0  ;;  %v1118_v5 = vsel %vm209_vm3, %v8023_v32, %v1075_v25 }
 0x63f   :  { %v1090_v2 = vpop.permute.xlu1 %1089 }
 0x640   :  { %v1123_v7 = vsel %vm343_vm4, %v1118_v5, %v1090_v2 }
 0x643   :  { %v1105_v31 = vpop.permute.xlu1 %1104 }
 0x644   :  { %v1128_v4 = vsel %vm951_vm7, %v1123_v7, %v1105_v31 }
 0x645   :  { %v1133_v17 = vmul.f32 %v1128_v4, %v7965_v13 }
 0x647   :  { %6037 = vmatmul.mubr.f32.gmra.mrb[32].mxu1 %v1133_v17  ;;  %v1077_v33 = vpop.permute.xlu1 %1076 }
 0x648   :  { %6039 = vmatprep.mubr.msk.f32.mxu1 %vm7583_vm0, %v9451_v0  ;;  %v1119_v49 = vsel %vm209_vm3, %v1059_v59, %v1077_v33 }
 0x64b   :  { %v1092_v40 = vpop.permute.xlu1 %1091 }
 0x64c   :  { %v1124_v58 = vsel %vm343_vm4, %v1119_v49, %v1092_v40 }
 0x64f   :  { %v1107_v60 = vpop.permute.xlu1 %1106 }
 0x650   :  { %v1129_v32 = vsel %vm951_vm7, %v1124_v58, %v1107_v60 }
 0x651   :  { %v1134_v38 = vmul.f32 %v1129_v32, %v7975_v3 }
 0x653   :  { %6040 = vmatmul.mubr.f32.gmra.mrb[34].mxu1 %v1134_v38  ;;  %v1079_v25 = vpop.permute.xlu1 %1078 }
 0x654   :  { %6042 = vmatprep.mubr.msk.f32.mxu1 %vm7583_vm0, %v9451_v0  ;;  %v1120_v5 = vsel %vm209_vm3, %v1060_v53, %v1079_v25 }
 0x657   :  { %v1094_v2 = vpop.permute.xlu1 %1093 }
 0x658   :  { %v1125_v7 = vsel %vm343_vm4, %v1120_v5, %v1094_v2  ;;  %v1534_v5 = vld [vmem:[#allocation2 + $0x2d8] sm:$0xff] }
 0x65b   :  { %v1109_v31 = vpop.permute.xlu1 %1108 }
 0x65c   :  { %v1130_v59 = vsel %vm951_vm7, %v1125_v7, %v1109_v31  ;;  %v1535_v7 = vld [vmem:[#allocation2 + $0x2e0] sm:$0xff] }
 0x65d   :  { %v1135_v4 = vmul.f32 %v1130_v59, %v8038_v62  ;;  %v8106_v31 = vpack.c.bf16 %v1535_v7, %v1534_v5  ;;  %v1537_v59 = vld [vmem:[#allocation2 + $0x2f0] sm:$0xff]  ;;  %v1544_v5 = vld [vmem:[#allocation2 + $0x328] sm:$0xff] }
 0x65e   :  { %v1545_v7 = vld [vmem:[#allocation2 + $0x330] sm:$0xff] }
 0x65f   :  { %6043 = vmatmul.mubr.f32.gmra.mrb[36].mxu1 %v1135_v4  ;;  %v1081_v17 = vpop.permute.xlu1 %1080  ;;  %9507 = vst [vmem:[#allocation24_spill] sm:$0xff] %v8106_v31 }
 0x660   :  { %6045 = vmatprep.mubr.msk.f32.mxu1 %vm7583_vm0, %v9451_v0  ;;  %v1121_v40 = vsel %vm209_vm3, %v1061_v10, %v1081_v17  ;;  %v1536_v10 = vld [vmem:[#allocation2 + $0x2e8] sm:$0xff]  ;;  %6984 = vmatpush3.bf16.msra.mxu1 %v8106_v31  ;;  %v1538_v17 = vld [vmem:[#allocation2 + $0x2f8] sm:$0xff] }
 0x661   :  { %v8109_v4 = vpack.c.bf16 %v1537_v59, %v1536_v10  ;;  %6985 = vmatprep.subr.bf16.mxu1 %v9459_v1  ;;  %v8125_v10 = vpack.c.bf16 %v1545_v7, %v1544_v5  ;;  %v1329_v59 = vld [vmem:[#allocation2 + $0x2b0] sm:$0xff]  ;;  %v1330_v5 = vld [vmem:[#allocation2 + $0x2b8] sm:$0xff] }
 0x662   :  { %v1219_v7 = vld [vmem:[#allocation2 + $0x210] sm:$0xff] }
 0x663   :  { %v1096_v33 = vpop.permute.xlu1 %1095  ;;  %9508 = vst [vmem:[#allocation25_spill] sm:$0xff] %v8109_v4  ;;  %9512 = vst [vmem:[#allocation29_spill] sm:$0xff] %v8125_v10 }
 0x664   :  { %v1126_v49 = vsel %vm343_vm4, %v1121_v40, %v1096_v33  ;;  %v1539_v33 = vld [vmem:[#allocation2 + $0x300] sm:$0xff]  ;;  %6987 = vmatpush3.bf16.msra.mxu1 %v8109_v4 }
 0x665   :  { %v8113_v40 = vpack.c.bf16 %v1539_v33, %v1538_v17  ;;  %6988 = vmatprep.subr.bf16.mxu1 %v9459_v1  ;;  %v1218_v17 = vld [vmem:[#allocation2 + $0x208] sm:$0xff] }
 0x667   :  { %v1111_v58 = vpop.permute.xlu1 %1110  ;;  %9509 = vst [vmem:[#allocation26_spill] sm:$0xff] %v8113_v40 }
 0x668   :  { %v1131_v53 = vsel %vm951_vm7, %v1126_v49, %v1111_v58  ;;  %v1540_v49 = vld [vmem:[#allocation2 + $0x308] sm:$0xff]  ;;  %v1541_v58 = vld [vmem:[#allocation2 + $0x310] sm:$0xff]  ;;  %6990 = vmatpush3.bf16.msra.mxu1 %v8113_v40 }
 0x669   :  { %v1136_v60 = vmul.f32 %v1131_v53, %v8059_v22  ;;  %v8117_v53 = vpack.c.bf16 %v1541_v58, %v1540_v49  ;;  %6991 = vmatprep.subr.bf16.mxu1 %v9459_v1  ;;  %v1401_v49 = vadd.f32 %v8042_v9, %v1329_v59  ;;  %v1546_v59 = vld [vmem:[#allocation2 + $0x338] sm:$0xff] }
 0x66b   :  { %6046 = vmatmul.mubr.f32.gmra.mrb[38].mxu1 %v1136_v60  ;;  %9510 = vst [vmem:[#allocation27_spill] sm:$0xff] %v8117_v53  ;;  %v1542_v60 = vld [vmem:[#allocation2 + $0x318] sm:$0xff] }
 0x66c   :  { %6127 = vmatprep.mubr.msk.f32.mxu1 %vm7583_vm0, %v9451_v0  ;;  %6993 = vmatpush3.bf16.msra.mxu1 %v8117_v53  ;;  %v1406_v53 = vadd.f32 %v8049_v21, %v1330_v5  ;;  %v1548_v21 = vld [vmem:[#allocation2 + $0x348] sm:$0xff] }
 0x66d   :  { %6994 = vmatprep.subr.bf16.mxu1 %v9459_v1 }
 0x694   :  { %v8102_v32 = vpop.f32.mrb[40].mxu0 }
 0x695   :  { %v6091_v38 = vpop.f32.mrb[41].mxu0 }
 0x696   :  { %v1543_v38 = vld [vmem:[#allocation2 + $0x320] sm:$0xff] }
 0x6a4   :  { %v8104_v25 = vpop.f32.mrb[42].mxu0 }
 0x6a5   :  { %v6094_v2 = vpop.f32.mrb[43].mxu0 }
 0x6a6   :  { %v8121_v2 = vpack.c.bf16 %v1543_v38, %v1542_v60 }
 0x6a8   :  { %9511 = vst [vmem:[#allocation28_spill] sm:$0xff] %v8121_v2  ;;  %6996 = vmatpush3.bf16.msra.mxu1 %v8121_v2 }
 0x6a9   :  { %6997 = vmatprep.subr.bf16.mxu1 %v9459_v1 }
 0x6ac   :  { %6999 = vmatpush3.bf16.msra.mxu1 %v8125_v10 }
 0x6ad   :  { %7000 = vmatprep.subr.bf16.mxu1 %v9459_v1 }
 0x70e   :  { %v1289_v33 = vpop.f32.mrb[30].mxu1 }
 0x70f   :  { %v8131_v58 = vadd.f32 %v1289_v33, %v1218_v17  ;;  %v6035_v60 = vpop.f32.mrb[31].mxu1  ;;  %v1547_v17 = vld [vmem:[#allocation2 + $0x340] sm:$0xff] }
 0x710   :  { %v8138_v33 = vpack.c.bf16 %v1547_v17, %v1546_v59  ;;  %v9514_v60 = vmov 0.0|0.0  }
 0x711   :  { %v1424_v38 = vadd.f32 %v1401_v49, %v8131_v58  ;;  %v1220_v49 = vld [vmem:[#allocation2 + $0x218] sm:$0xff] }
 0x712   :  { %9513 = vst [vmem:[#allocation30_spill] sm:$0xff] %v8138_v33  ;;  %7002 = vmatpush3.bf16.msra.mxu1 %v8138_v33 }
 0x713   :  { %v5259_v0 = vmul.f32 -1.442695, %v1424_v38  ;;  %7003 = vmatprep.subr.bf16.mxu1 %v9514_v60 }
 0x715   :  { %7321 = vpow2.f32 %v5259_v0  ;;  %v1331_v0 = vld [vmem:[#allocation2 + $0x2c0] sm:$0xff] }
 0x71a   :  { %v1294_v2 = vpop.f32.mrb[32].mxu1 }
 0x71b   :  { %v8135_v10 = vadd.f32 %v1294_v2, %v1219_v7  ;;  %v6038_v1 = vpop.f32.mrb[33].mxu1  ;;  %v1549_v2 = vld [vmem:[#allocation2 + $0x350] sm:$0xff] }
 0x71c   :  { %v8142_v1 = vpack.c.bf16 %v1549_v2, %v1548_v21 }
 0x71d   :  { %v1425_v40 = vadd.f32 %v1406_v53, %v8135_v10 }
 0x71e   :  { %9515 = vst [vmem:[#allocation31_spill] sm:$0xff] %v8142_v1  ;;  %7005 = vmatpush3.bf16.msra.mxu1 %v8142_v1 }
 0x71f   :  { %v7322_v4 = vpop.eup %7321  ;;  %v5260_v31 = vmul.f32 -1.442695, %v1425_v40  ;;  %v1411_v40 = vadd.f32 %v8055_v55, %v1331_v0  ;;  %v1221_v55 = vld [vmem:[#allocation2 + $0x220] sm:$0xff]  ;;  %v1332_v0 = vld [vmem:[#allocation2 + $0x2c8] sm:$0xff] }
 0x720   :  { %v1444_v9 = vadd.f32 1.0, %v7322_v4 }
 0x721   :  { %7323 = vpow2.f32 %v5260_v31  ;;  %v9516_v31 = vmov 0.0  }
 0x722   :  { %7325 = vrcp.f32 %v1444_v9  ;;  %6184 = vmatprep.subr.mxu1 %v9516_v31 }
 0x726   :  { %v1299_v53 = vpop.f32.mrb[34].mxu1 }
 0x727   :  { %v8145_v4 = vadd.f32 %v1299_v53, %v1220_v49  ;;  %v6041_v38 = vpop.f32.mrb[35].mxu1  ;;  %v1416_v53 = vadd.f32 %v8102_v32, %v1332_v0  ;;  %v1222_v32 = vld [vmem:[#allocation2 + $0x228] sm:$0xff] }
 0x729   :  { %v1426_v5 = vadd.f32 %v1411_v40, %v8145_v4 }
 0x72b   :  { %v7324_v7 = vpop.eup %7323  ;;  %v5261_v9 = vmul.f32 -1.442695, %v1426_v5 }
 0x72c   :  { %v8150_v59 = vpop.eup %7325  ;;  %v1445_v17 = vadd.f32 1.0, %v7324_v7 }
 0x72d   :  { %7327 = vpow2.f32 %v5261_v9  ;;  %v1459_v21 = vmul.f32 %v8150_v59, %v7894_v12 }
 0x72e   :  { %7329 = vrcp.f32 %v1445_v17 }
 0x72f   :  { %1484 = vrot.lane.b32.xlu0 %v1459_v21, %s7586_s4  ;;  %1469 = vrot.lane.b32.xlu1 %v1459_v21, %s7589_s6 }
 0x732   :  { %v1304_v49 = vpop.f32.mrb[36].mxu1 }
 0x733   :  { %v8156_v2 = vadd.f32 %v1304_v49, %v1221_v55  ;;  %1499 = vrot.lane.b32.xlu1 %v1459_v21, %s7588_s5  ;;  %v6044_v40 = vpop.f32.mrb[37].mxu1  ;;  %v1333_v55 = vld [vmem:[#allocation2 + $0x2d0] sm:$0xff] }
 0x735   :  { %v1427_v38 = vadd.f32 %v1416_v53, %v8156_v2  ;;  %v1421_v53 = vadd.f32 %v8104_v25, %v1333_v55 }
 0x737   :  { %v7328_v5 = vpop.eup %7327  ;;  %v5262_v7 = vmul.f32 -1.442695, %v1427_v38 }
 0x738   :  { %v8161_v12 = vpop.eup %7329  ;;  %v1446_v9 = vadd.f32 1.0, %v7328_v5 }
 0x739   :  { %7331 = vpow2.f32 %v5262_v7  ;;  %v1460_v17 = vmul.f32 %v8161_v12, %v7908_v47 }
 0x73a   :  { %7333 = vrcp.f32 %v1446_v9 }
 0x73b   :  { %1486 = vrot.lane.b32.xlu1 %v1460_v17, %s7586_s4  ;;  %1471 = vrot.lane.b32.xlu0 %v1460_v17, %s7589_s6 }
 0x73e   :  { %v1309_v0 = vpop.f32.mrb[38].mxu1 }
 0x73f   :  { %v8167_v49 = vadd.f32 %v1309_v0, %v1222_v32  ;;  %1501 = vrot.lane.b32.xlu0 %v1460_v17, %s7588_s5  ;;  %v6047_v40 = vpop.f32.mrb[39].mxu1 }
 0x741   :  { %v1428_v38 = vadd.f32 %v1421_v53, %v8167_v49 }
 0x743   :  { %v7332_v5 = vpop.eup %7331  ;;  %v5263_v7 = vmul.f32 -1.442695, %v1428_v38 }
 0x744   :  { %v8172_v47 = vpop.eup %7333  ;;  %v1447_v9 = vadd.f32 1.0, %v7332_v5 }
 0x745   :  { %7335 = vpow2.f32 %v5263_v7  ;;  %v1461_v1 = vmul.f32 %v8172_v47, %v7939_v41 }
 0x746   :  { %7337 = vrcp.f32 %v1447_v9 }
 0x747   :  { %1488 = vrot.lane.b32.xlu0 %v1461_v1, %s7586_s4  ;;  %1473 = vrot.lane.b32.xlu1 %v1461_v1, %s7589_s6 }
 0x74b   :  { %1503 = vrot.lane.b32.xlu1 %v1461_v1, %s7588_s5 }
 0x74f   :  { %v7336_v25 = vpop.eup %7335 }
 0x750   :  { %v8179_v32 = vpop.eup %7337  ;;  %v1448_v55 = vadd.f32 1.0, %v7336_v25 }
 0x751   :  { %v1462_v0 = vmul.f32 %v8179_v32, %v8029_v50 }
 0x752   :  { %7339 = vrcp.f32 %v1448_v55 }
 0x753   :  { %1490 = vrot.lane.b32.xlu1 %v1462_v0, %s7586_s4  ;;  %1475 = vrot.lane.b32.xlu0 %v1462_v0, %s7589_s6 }
 0x757   :  { %1505 = vrot.lane.b32.xlu0 %v1462_v0, %s7588_s5 }
 0x75c   :  { %v8186_v41 = vpop.eup %7339 }
 0x75d   :  { %v1463_v53 = vmul.f32 %v8186_v41, %v8045_v30 }
 0x75f   :  { %1492 = vrot.lane.b32.xlu0 %v1463_v53, %s7586_s4  ;;  %1477 = vrot.lane.b32.xlu1 %v1463_v53, %s7589_s6 }
 0x763   :  { %1507 = vrot.lane.b32.xlu1 %v1463_v53, %s7588_s5 }
 0x7a1   :  { %v1470_v40 = vpop.permute.xlu1 %1469  ;;  %v1485_v50 = vpop.permute.xlu0 %1484 }
 0x7a2   :  { %v1514_v38 = vsel %vm209_vm3, %v1470_v40, %v1459_v21 }
 0x7a3   :  { %v1519_v5 = vsel %vm343_vm4, %v1514_v38, %v1485_v50 }
 0x7a5   :  { %v1500_v7 = vpop.permute.xlu1 %1499 }
 0x7a6   :  { %v1524_v9 = vsel %vm951_vm7, %v1519_v5, %v1500_v7 }
 0x7a7   :  { %v1529_v25 = vmul.f32 %v1524_v9, %v7954_v54 }
 0x7a9   :  { %6128 = vmatmul.mubr.f32.vlgmr.msra.gmra.mrb[40].mxu1 %v1529_v25 }
 0x7aa   :  { %6130 = vmatprep.mubr.msk.f32.mxu1 %vm7583_vm0, %v9516_v31 }
 0x7ad   :  { %v1472_v30 = vpop.permute.xlu0 %1471  ;;  %v1487_v55 = vpop.permute.xlu1 %1486 }
 0x7ae   :  { %v1515_v33 = vsel %vm209_vm3, %v1472_v30, %v1460_v17 }
 0x7af   :  { %v1520_v51 = vsel %vm343_vm4, %v1515_v33, %v1487_v55 }
 0x7b1   :  { %v1502_v43 = vpop.permute.xlu0 %1501 }
 0x7b2   :  { %v1525_v21 = vsel %vm951_vm7, %v1520_v51, %v1502_v43 }
 0x7b3   :  { %v1530_v40 = vmul.f32 %v1525_v21, %v7965_v13 }
 0x7b5   :  { %6131 = vmatmul.mubr.f32.gmra.mrb[42].mxu1 %v1530_v40 }
 0x7b6   :  { %6133 = vmatprep.mubr.msk.f32.mxu1 %vm7583_vm0, %v9516_v31 }
 0x7b9   :  { %v1474_v54 = vpop.permute.xlu1 %1473  ;;  %v1489_v50 = vpop.permute.xlu0 %1488 }
 0x7ba   :  { %v1516_v38 = vsel %vm209_vm3, %v1474_v54, %v1461_v1 }
 0x7bb   :  { %v1521_v5 = vsel %vm343_vm4, %v1516_v38, %v1489_v50  ;;  %v1668_v38 = vld [vmem:[#allocation2 + $0x370] sm:$0xff] }
 0x7bd   :  { %v1504_v7 = vpop.permute.xlu1 %1503 }
 0x7be   :  { %v1526_v17 = vsel %vm951_vm7, %v1521_v5, %v1504_v7  ;;  %v1669_v5 = vld [vmem:[#allocation2 + $0x378] sm:$0xff] }
 0x7bf   :  { %v1531_v33 = vmul.f32 %v1526_v17, %v7975_v3 }
 0x7c1   :  { %6134 = vmatmul.mubr.f32.gmra.mrb[44].mxu1 %v1531_v33 }
 0x7c2   :  { %6136 = vmatprep.mubr.msk.f32.mxu1 %vm7583_vm0, %v9516_v31 }
 0x7c5   :  { %v1476_v43 = vpop.permute.xlu0 %1475  ;;  %v1491_v51 = vpop.permute.xlu1 %1490 }
 0x7c6   :  { %v1517_v13 = vsel %vm209_vm3, %v1476_v43, %v1462_v0 }
 0x7c7   :  { %v1522_v9 = vsel %vm343_vm4, %v1517_v13, %v1491_v51 }
 0x7c9   :  { %v1506_v25 = vpop.permute.xlu0 %1505 }
 0x7ca   :  { %v1527_v1 = vsel %vm951_vm7, %v1522_v9, %v1506_v25 }
 0x7cb   :  { %v1532_v30 = vmul.f32 %v1527_v1, %v8038_v62  ;;  %v1667_v62 = vld [vmem:[#allocation2 + $0x368] sm:$0xff] }
 0x7cc   :  { %1679 = vrot.lane.b32.xlu1 %v1667_v62, %s7588_s5  ;;  %v1740_v1 = vld [vmem:[#allocation2 + $0x3a8] sm:$0xff] }
 0x7cd   :  { %6137 = vmatmul.mubr.f32.gmra.mrb[46].mxu1 %v1532_v30  ;;  %v1741_v30 = vld [vmem:[#allocation2 + $0x3b0] sm:$0xff] }
 0x7ce   :  { %6139 = vmatprep.mubr.msk.f32.mxu1 %vm7583_vm0, %v9516_v31 }
 0x7d0   :  { %1681 = vrot.lane.b32.xlu1 %v1668_v38, %s7588_s5 }
 0x7d1   :  { %v1478_v3 = vpop.permute.xlu1 %1477  ;;  %v1493_v55 = vpop.permute.xlu0 %1492 }
 0x7d2   :  { %v1518_v21 = vsel %vm209_vm3, %v1478_v3, %v1463_v53  ;;  %v8229_v3 = vpack.c.bf16 %v1741_v30, %v1740_v1  ;;  %v1666_v1 = vld [vmem:[#allocation2 + $0x360] sm:$0xff] }
 0x7d3   :  { %v1523_v40 = vsel %vm343_vm4, %v1518_v21, %v1493_v55 }
 0x7d4   :  { %1683 = vrot.lane.b32.xlu1 %v1669_v5, %s7588_s5  ;;  %9517 = vst [vmem:[#allocation32_spill] sm:$0xff] %v8229_v3  ;;  %7008 = vmatpush3.bf16.msra.mxu0 %v8229_v3 }
 0x7d5   :  { %v1508_v54 = vpop.permute.xlu1 %1507  ;;  %7009 = vmatprep.subr.bf16.mxu0 %v9514_v60 }
 0x7d6   :  { %v1528_v0 = vsel %vm951_vm7, %v1523_v40, %v1508_v54  ;;  %v1742_v54 = vld [vmem:[#allocation2 + $0x3b8] sm:$0xff] }
 0x7d7   :  { %v1533_v50 = vmul.f32 %v1528_v0, %v8059_v22  ;;  %v1743_v0 = vld [vmem:[#allocation2 + $0x3c0] sm:$0xff] }
 0x7d8   :  { %v8237_v62 = vpack.c.bf16 %v1743_v0, %v1742_v54  ;;  %v7415_v0 = vld [vmem:[%s9448_s0 + $0x18] sm:$0xff] }
 0x7d9   :  { %6140 = vmatmul.mubr.f32.gmra.mrb[48].mxu1 %v1533_v50 }
 0x7da   :  { %6186 = vmatprep.mubr.msk.f32.mxu1 %vm7583_vm0, %v9516_v31  ;;  %9518 = vst [vmem:[#allocation33_spill] sm:$0xff] %v8237_v62  ;;  %7011 = vmatpush3.bf16.msra.mxu0 %v8237_v62 }
 0x7db   :  { %7012 = vmatprep.subr.bf16.mxu0 %v9514_v60 }
 0x83e   :  { %v8233_v21 = vpop.permute.xlu1 %1679 }
 0x842   :  { %v8241_v5 = vpop.permute.xlu1 %1681 }
 0x87c   :  { %v1616_v53 = vpop.f32.mrb[40].mxu1 }
 0x87d   :  { %v6129_v7 = vpop.f32.mrb[41].mxu1 }
 0x888   :  { %v1621_v17 = vpop.f32.mrb[42].mxu1 }
 0x889   :  { %v6132_v33 = vpop.f32.mrb[43].mxu1 }
 0x894   :  { %v1626_v43 = vpop.f32.mrb[44].mxu1 }
 0x895   :  { %1649 = vrot.lane.b32.xlu0 %v1626_v43, %s7588_s5  ;;  %v6135_v22 = vpop.f32.mrb[45].mxu1 }
 0x896   :  { %v8246_v22 = vpop.permute.xlu1 %1683 }
 0x8a0   :  { %v1631_v51 = vpop.f32.mrb[46].mxu1 }
 0x8a1   :  { %1651 = vrot.lane.b32.xlu0 %v1631_v51, %s7588_s5  ;;  %v6138_v13 = vpop.f32.mrb[47].mxu1 }
 0x8ac   :  { %v1636_v9 = vpop.f32.mrb[48].mxu1 }
 0x8ad   :  { %1653 = vrot.lane.b32.xlu0 %v1636_v9, %s7588_s5  ;;  %v6141_v25 = vpop.f32.mrb[49].mxu1 }
 0x8ae   :  { %v1665_v25 = vld [vmem:[#allocation2 + $0x358] sm:$0xff] }
 0x907   :  { %v1650_v55 = vpop.permute.xlu0 %1649 }
 0x908   :  { %v1662_v40 = vadd.f32 %v1650_v55, %v8145_v4 }
 0x90a   :  { %v1692_v50 = vadd.f32 %v8233_v21, %v1662_v40 }
 0x90c   :  { %7341 = vtanh.f32 %v1692_v50 }
 0x913   :  { %v1652_v38 = vpop.permute.xlu0 %1651 }
 0x914   :  { %v1663_v7 = vadd.f32 %v1652_v38, %v8156_v2 }
 0x916   :  { %v7342_v33 = vpop.eup %7341  ;;  %v1693_v43 = vadd.f32 %v8241_v5, %v1663_v7 }
 0x917   :  { %1719 = vrot.lane.b32.xlu0 %v7342_v33, %s7588_s5 }
 0x918   :  { %7343 = vtanh.f32 %v1693_v43  ;;  %v7416_v43 = vld [vmem:[%s9448_s0 + $0x20] sm:$0xff] }
 0x91f   :  { %v1654_v4 = vpop.permute.xlu0 %1653 }
 0x920   :  { %v1664_v51 = vadd.f32 %v1654_v4, %v8167_v49  ;;  %v1702_v49 = vsub.f32 1.0, %v8172_v47 }
 0x922   :  { %v7344_v13 = vpop.eup %7343  ;;  %v1694_v9 = vadd.f32 %v8246_v22, %v1664_v51  ;;  %v1707_v55 = vmul.f32 %v1702_v49, %v7663_v29 }
 0x923   :  { %1721 = vrot.lane.b32.xlu1 %v7344_v13, %s7588_s5 }
 0x924   :  { %7345 = vtanh.f32 %v1694_v9 }
 0x927   :  { %1645 = vrot.lane.b32.xlu1 %v1616_v53, %s7588_s5  ;;  %v1703_v53 = vsub.f32 1.0, %v8179_v32 }
 0x929   :  { %v1708_v50 = vmul.f32 %v7415_v0, %v1703_v53  ;;  %v1850_v53 = vld [vmem:[#allocation2 + $0x400] sm:$0xff] }
 0x92b   :  { %1647 = vrot.lane.b32.xlu1 %v1621_v17, %s7588_s5 }
 0x92e   :  { %v7346_v2 = vpop.eup %7345 }
 0x92f   :  { %1723 = vrot.lane.b32.xlu0 %v7346_v2, %s7588_s5 }
 0x933   :  { %1675 = vrot.lane.b32.xlu0 %v1665_v25, %s7588_s5 }
 0x937   :  { %1677 = vrot.lane.b32.xlu0 %v1666_v1, %s7588_s5 }
 0x989   :  { %v1720_v30 = vpop.permute.xlu0 %1719 }
 0x98a   :  { %v1732_v40 = vmul.f32 %v8172_v47, %v1720_v30  ;;  %v1704_v47 = vsub.f32 1.0, %v8186_v41  ;;  %v1848_v30 = vld [vmem:[#allocation2 + $0x3f0] sm:$0xff] }
 0x98c   :  { %v8259_v54 = vadd.f32 %v1732_v40, %v1707_v55  ;;  %v1709_v4 = vmul.f32 %v7416_v43, %v1704_v47  ;;  %v1849_v55 = vld [vmem:[#allocation2 + $0x3f8] sm:$0xff] }
 0x98e   :  { %6151 = vmatmul.mubr.msk.f32.vlgmr.msra.gmra.mrb[44].mxu0 %vm209_vm3, %v8259_v54 }
 0x98f   :  { %6153 = vmatprep.mubr.msk.f32.mxu0 %vm7583_vm0, %v9516_v31 }
 0x995   :  { %v1722_v17 = vpop.permute.xlu1 %1721 }
 0x996   :  { %v1733_v29 = vmul.f32 %v8179_v32, %v1722_v17  ;;  %v8298_v17 = vpack.c.bf16 %v1850_v53, %v1849_v55  ;;  %v1842_v53 = vld [vmem:[#allocation2 + $0x3d8] sm:$0xff] }
 0x998   :  { %v8270_v38 = vadd.f32 %v1733_v29, %v1708_v50  ;;  %v1851_v50 = vld [vmem:[#allocation2 + $0x408] sm:$0xff]  ;;  %v1852_v29 = vld [vmem:[#allocation2 + $0x410] sm:$0xff] }
 0x999   :  { %v1646_v7 = vpop.permute.xlu1 %1645  ;;  %v8305_v47 = vpack.c.bf16 %v1852_v29, %v1851_v50 }
 0x99a   :  { %6154 = vmatmul.mubr.msk.f32.gmra.mrb[46].mxu0 %vm209_vm3, %v8270_v38  ;;  %v1660_v32 = vadd.f32 %v1646_v7, %v8131_v58  ;;  %v1853_v7 = vld [vmem:[#allocation2 + $0x418] sm:$0xff] }
 0x99b   :  { %6156 = vmatprep.mubr.msk.f32.mxu0 %vm7583_vm0, %v9516_v31 }
 0x99d   :  { %v1648_v9 = vpop.permute.xlu1 %1647 }
 0x99e   :  { %v1661_v1 = vadd.f32 %v1648_v9, %v8135_v10 }
 0x9a1   :  { %v1724_v33 = vpop.permute.xlu0 %1723 }
 0x9a2   :  { %v1734_v51 = vmul.f32 %v8186_v41, %v1724_v33  ;;  %v1847_v41 = vld [vmem:[#allocation2 + $0x3e8] sm:$0xff]  ;;  %v1854_v33 = vld [vmem:[#allocation2 + $0x420] sm:$0xff] }
 0x9a3   :  { %v8295_v40 = vpack.c.bf16 %v1848_v30, %v1847_v41  ;;  %v8309_v43 = vpack.c.bf16 %v1854_v33, %v1853_v7  ;;  %v1843_v33 = vld [vmem:[#allocation2 + $0x3e0] sm:$0xff] }
 0x9a4   :  { %v8282_v13 = vadd.f32 %v1734_v51, %v1709_v4  ;;  %v5264_v4 = vld [vmem:[#allocation2 + $0x3c8] ss:$0 sm:$0xff] }
 0x9a5   :  { %v8284_v2 = vpop.permute.xlu0 %1675  ;;  %7014 = vmatpush3.bf16.msra.mxu0 %v8295_v40 }
 0x9a6   :  { %v1690_v25 = vadd.f32 %v8284_v2, %v1660_v32  ;;  %6157 = vmatmul.mubr.msk.f32.gmra.mrb[48].mxu0 %vm209_vm3, %v8282_v13  ;;  %7015 = vmatprep.subr.bf16.mxu0 %v9514_v60 }
 0x9a7   :  { %6175 = vmatprep.mubr.msk.f32.mxu0 %vm7583_vm0, %v9516_v31 }
 0x9a8   :  { %7347 = vtanh.f32 %v1690_v25  ;;  %v1841_v25 = vld [vmem:[#allocation2 + $0x3d0] sm:$0xff] }
 0x9a9   :  { %v8292_v49 = vpop.permute.xlu0 %1677  ;;  %7017 = vmatpush3.bf16.msra.mxu0 %v8298_v17 }
 0x9aa   :  { %v1691_v58 = vadd.f32 %v8292_v49, %v1661_v1  ;;  %7018 = vmatprep.subr.bf16.mxu0 %v9514_v60 }
 0x9ac   :  { %7349 = vtanh.f32 %v1691_v58 }
 0x9ad   :  { %7020 = vmatpush3.bf16.msra.mxu0 %v8305_v47 }
 0x9ae   :  { %7021 = vmatprep.subr.bf16.mxu0 %v9514_v60 }
 0x9b1   :  { %7023 = vmatpush3.bf16.msra.mxu0 %v8309_v43 }
 0x9b2   :  { %v7348_v0 = vpop.eup %7347  ;;  %7030 = vmatprep.subr.bf16.mxu0 %v9514_v60 }
 0x9b3   :  { %1715 = vrot.lane.b32.xlu1 %v7348_v0, %s7588_s5 }
 0x9b6   :  { %v7350_v10 = vpop.eup %7349 }
 0x9b7   :  { %1717 = vrot.lane.b32.xlu0 %v7350_v10, %s7588_s5 }
 0xa61   :  { %v1824_v51 = vpop.f32.mrb[44].mxu0 }
 0xa62   :  { %v1825_v32 = vadd.f32 %v5264_v4, %v1824_v51  ;;  %v6152_v9 = vpop.f32.mrb[45].mxu0 }
 0xa63   :  { %v1855_v9 = vld [vmem:[#allocation2 + $0x428] sm:$0xff] }
 0xa64   :  { %v1838_v1 = vmax.f32 %v1825_v32, 0.0 }
 0xa66   :  { %v1844_v58 = vmul.f32 %v1841_v25, %v1838_v1 }
 0xa68   :  { %6176 = vmatmul.mubr.msk.f32.vlgmr.msra.gmra.mrb[50].mxu0 %vm343_vm4, %v1844_v58 }
 0xa69   :  { %6178 = vmatprep.mubr.msk.f32.mxu0 %vm7583_vm0, %v9516_v31  ;;  %7032 = vmatpush3.bf16.msra.mxu0 %v7647_v18 }
 0xa6a   :  { %7033 = vmatprep.subr.bf16.mxu0 %v9514_v60 }
 0xa6d   :  { %v1829_v41 = vpop.f32.mrb[46].mxu0  ;;  %7035 = vmatpush3.bf16.msra.mxu0 %v7650_v20 }
 0xa6e   :  { %v1830_v30 = vadd.f32 %v5264_v4, %v1829_v41  ;;  %v6155_v55 = vpop.f32.mrb[47].mxu0  ;;  %7036 = vmatprep.subr.bf16.mxu0 %v9514_v60 }
 0xa70   :  { %v1839_v0 = vmax.f32 %v1830_v30, 0.0 }
 0xa71   :  { %7038 = vmatpush3.bf16.msra.mxu0 %v7689_v34 }
 0xa72   :  { %v1845_v10 = vmul.f32 %v1842_v53, %v1839_v0  ;;  %7039 = vmatprep.subr.bf16.mxu0 %v9514_v60 }
 0xa74   :  { %6179 = vmatmul.mubr.msk.f32.gmra.mrb[52].mxu0 %vm343_vm4, %v1845_v10  ;;  %v1716_v10 = vpop.permute.xlu1 %1715 }
 0xa75   :  { %6181 = vmatprep.mubr.msk.f32.mxu0 %vm7583_vm0, %v9516_v31  ;;  %7041 = vmatpush3.bf16.msra.mxu0 %v7693_v37 }
 0xa76   :  { %7046 = vmatprep.subr.bf16.mxu0 %v9514_v60 }
 0xa79   :  { %v1834_v50 = vpop.f32.mrb[48].mxu0 }
 0xa7a   :  { %v1835_v29 = vadd.f32 %v5264_v4, %v1834_v50  ;;  %v6158_v7 = vpop.f32.mrb[49].mxu0  ;;  %v1856_v4 = vld [vmem:[#allocation2 + $0x438] sm:$0xff]  ;;  %v1700_v50 = vsub.f32 1.0, %v8150_v59 }
 0xa7b   :  { %v1718_v7 = vpop.permute.xlu0 %1717 }
 0xa7c   :  { %v1840_v51 = vmax.f32 %v1835_v29, 0.0  ;;  %v1730_v29 = vmul.f32 %v8150_v59, %v1716_v10 }
 0xa7e   :  { %v1846_v32 = vmul.f32 %v1843_v33, %v1840_v51  ;;  %v1705_v33 = vmul.f32 %v1700_v50, %v7655_v24  ;;  %v1701_v51 = vsub.f32 1.0, %v8161_v12  ;;  %v7417_v24 = vld [vmem:[%s9448_s0 + $0x28] sm:$0xff] }
 0xa80   :  { %6182 = vmatmul.mubr.msk.f32.gmra.mrb[54].mxu0 %vm343_vm4, %v1846_v32  ;;  %v8342_v32 = vadd.f32 %v1730_v29, %v1705_v33 }
 0xa81   :  { %6228 = vmatprep.mubr.msk.f32.mxu0 %vm7583_vm0, %v9516_v31 }
 0xb3b   :  { %v1932_v25 = vpop.f32.mrb[50].mxu0 }
 0xb3c   :  { %v1933_v1 = vadd.f32 %v1932_v25, %v1855_v9  ;;  %v6177_v58 = vpop.f32.mrb[51].mxu0  ;;  %v1731_v9 = vmul.f32 %v8161_v12, %v1718_v7  ;;  %v1706_v25 = vmul.f32 %v1701_v51, %v7661_v28  ;;  %v7420_v51 = vld [vmem:[#allocation2 + $0x30] sm:$0xff] }
 0xb3e   :  { %6185 = vmatpush3.xpose.msk.msra.mxu1 %vm209_vm3, %v1933_v1  ;;  %v8350_v59 = vadd.f32 %v1731_v9, %v1706_v25 }
 0xb3f   :  { %7024 = vmatprep.subr.bf16.mxu1 %v9514_v60 }
 0xb47   :  { %v1937_v41 = vpop.f32.mrb[52].mxu0 }
 0xb48   :  { %v6180_v30 = vpop.f32.mrb[53].mxu0  ;;  %v7418_v41 = vld [vmem:[#allocation2 + $0x20] ss:$0 sm:$0xff] }
 0xb53   :  { %v1941_v55 = vpop.f32.mrb[54].mxu0 }
 0xb54   :  { %v1942_v53 = vadd.f32 %v1941_v55, %v1856_v4  ;;  %v6183_v0 = vpop.f32.mrb[55].mxu0 }
 0xb55   :  { %v7419_v0 = vld [vmem:[#allocation2 + $0x28] sm:$0xff] }
 0xb56   :  { %6187 = vmatmul.mubr.msk.f32.vlgmr.msra.gmra.mrb[50].mxu1 %vm209_vm3, %v1942_v53 }
 0xb57   :  { %7026 = vmatpush3.bf16.msra.mxu1 %v7626_v8  ;;  %6197 = vmatprep.mubr.msk.f32.mxu1 %vm7583_vm0, %v9516_v31 }
 0xb58   :  { %7027 = vmatprep.subr.bf16.mxu1 %v9514_v60 }
 0xb5b   :  { %7029 = vmatpush3.bf16.msra.mxu1 %v7644_v14 }
 0xb5e   :  { %6198 = vmatmul.mubr.msk.f32.vlgmr.msra.gmra.mrb[52].mxu1 %vm209_vm3, %v8342_v32 }
 0xb5f   :  { %6200 = vmatprep.mubr.msk.f32.mxu1 %vm7583_vm0, %v9516_v31 }
 0xb62   :  { %6201 = vmatmul.mubr.msk.f32.gmra.mrb[54].mxu1 %vm209_vm3, %v8350_v59 }
 0xb63   :  { %6203 = vmatprep.mubr.msk.f32.mxu1 %vm7583_vm0, %v9516_v31 }
 0xb66   :  { %6204 = vmatmul.mubr.msk.f32.gmra.mrb[56].mxu1 %vm209_vm3, %v8259_v54 }
 0xb67   :  { %6206 = vmatprep.mubr.msk.f32.mxu1 %vm7583_vm0, %v9516_v31 }
 0xb6a   :  { %6207 = vmatmul.mubr.msk.f32.gmra.mrb[58].mxu1 %vm209_vm3, %v8270_v38 }
 0xb6b   :  { %6209 = vmatprep.mubr.msk.f32.mxu1 %vm7583_vm0, %v9516_v31 }
 0xb6e   :  { %6210 = vmatmul.mubr.msk.f32.gmra.mrb[60].mxu1 %vm209_vm3, %v8282_v13 }
 0xb6f   :  { %6247 = vmatprep.mubr.msk.f32.mxu1 %vm35_vm1, %v7417_v24 }
 0xc29   :  { %v2017_v28 = vpop.f32.mrb[50].mxu1 }
 0xc2a   :  { %v6188_v12 = vpop.f32.mrb[51].mxu1  ;;  %v2021_v1 = vsel %vm124_vm2, %v2017_v28, -inf }
 0xc2b   :  { %2022 = vmax.xlane.f32.xlu1 %v2021_v1 }
 0xc31   :  { %v2106_v58 = vpop.f32.mrb[52].mxu1 }
 0xc32   :  { %v2107_v30 = vadd.f32 %v7418_v41, %v2106_v58  ;;  %v6199_v4 = vpop.f32.mrb[53].mxu1  ;;  %v7421_v58 = vld [vmem:[#allocation2 + $0x38] sm:$0xff] }
 0xc34   :  { %v2130_v55 = vmax.f32 %v2107_v30, 0.0 }
 0xc35   :  { %v2111_v53 = vpop.f32.mrb[54].mxu1 }
 0xc36   :  { %v2135_v10 = vmul.f32 %v7419_v0, %v2130_v55  ;;  %v2112_v50 = vadd.f32 %v7418_v41, %v2111_v53  ;;  %v6202_v29 = vpop.f32.mrb[55].mxu1 }
 0xc38   :  { %v2131_v7 = vmax.f32 %v2112_v50, 0.0  ;;  %6229 = vmatmul.mubr.msk.f32.vlgmr.msra.gmra.mrb[56].mxu0 %vm343_vm4, %v2135_v10  ;;  %v7422_v10 = vld [vmem:[#allocation2 + $0x40] sm:$0xff] }
 0xc39   :  { %v2116_v33 = vpop.f32.mrb[56].mxu1  ;;  %6231 = vmatprep.mubr.msk.f32.mxu0 %vm7583_vm0, %v9516_v31 }
 0xc3a   :  { %v2136_v9 = vmul.f32 %v7420_v51, %v2131_v7  ;;  %v2117_v25 = vadd.f32 %v7418_v41, %v2116_v33  ;;  %v6205_v24 = vpop.f32.mrb[57].mxu1  ;;  %v7423_v51 = vld [vmem:[#allocation2 + $0x48] sm:$0xff] }
 0xc3c   :  { %v2132_v12 = vmax.f32 %v2117_v25, 0.0  ;;  %6232 = vmatmul.mubr.msk.f32.gmra.mrb[58].mxu0 %vm343_vm4, %v2136_v9 }
 0xc3d   :  { %v2121_v1 = vpop.f32.mrb[58].mxu1  ;;  %6234 = vmatprep.mubr.msk.f32.mxu0 %vm7583_vm0, %v9516_v31 }
 0xc3e   :  { %v2137_v30 = vmul.f32 %v7421_v58, %v2132_v12  ;;  %v2122_v4 = vadd.f32 %v7418_v41, %v2121_v1  ;;  %v6208_v55 = vpop.f32.mrb[59].mxu1 }
 0xc40   :  { %v2133_v53 = vmax.f32 %v2122_v4, 0.0  ;;  %6235 = vmatmul.mubr.msk.f32.gmra.mrb[60].mxu0 %vm343_vm4, %v2137_v30  ;;  %v7424_v4 = vld [vmem:[#allocation2 + $0x90] sm:$0xff] }
 0xc41   :  { %v2126_v0 = vpop.f32.mrb[60].mxu1  ;;  %6237 = vmatprep.mubr.msk.f32.mxu0 %vm7583_vm0, %v9516_v31 }
 0xc42   :  { %v2138_v50 = vmul.f32 %v7422_v10, %v2133_v53  ;;  %v2127_v29 = vadd.f32 %v7418_v41, %v2126_v0  ;;  %v6211_v7 = vpop.f32.mrb[61].mxu1  ;;  %v7425_v0 = vld [vmem:[#allocation2 + $0x98] sm:$0xff] }
 0xc44   :  { %v2134_v33 = vmax.f32 %v2127_v29, 0.0  ;;  %6238 = vmatmul.mubr.msk.f32.gmra.mrb[62].mxu0 %vm343_vm4, %v2138_v50 }
 0xc45   :  { %6240 = vmatprep.mubr.msk.f32.mxu0 %vm7583_vm0, %v9516_v31 }
 0xc46   :  { %v2139_v9 = vmul.f32 %v7423_v51, %v2134_v33 }
 0xc48   :  { %6241 = vmatmul.mubr.msk.f32.gmra.mrb[64].mxu0 %vm343_vm4, %v2139_v9  ;;  %v7426_v9 = vld [vmem:[#allocation2 + $0xa0] sm:$0xff] }
 0xc49   :  { %6272 = vmatprep.mubr.msk.f32.mxu0 %vm7583_vm0, %v9516_v31 }
 0xcb8   :  { %v2023_v25 = vpop.xlane.xlu1 %2022 }
 0xcb9   :  { %v2024_v24 = vsub.f32 %v2017_v28, %v2023_v25 }
 0xcbb   :  { %v2025_v12 = vmul.f32 1.442695, %v2024_v24 }
 0xcbd   :  { %7351 = vpow2.f32 %v2025_v12  ;;  %v7427_v12 = vld [vmem:[#allocation2 + $0xa8] sm:$0xff] }
 0xcc7   :  { %v8386_v1 = vpop.eup %7351 }
 0xcc8   :  { %v2027_v41 = vsel %vm124_vm2, %v8386_v1, 0.0 }
 0xcc9   :  { %2028 = vadd.xlane.f32.xlu0 %v2027_v41 }
 0xd0b   :  { %v2221_v58 = vpop.f32.mrb[56].mxu0 }
 0xd0c   :  { %v6230_v30 = vpop.f32.mrb[57].mxu0  ;;  %v2222_v55 = vadd.f32 %v7424_v4, %v2221_v58 }
 0xd0e   :  { %v2245_v29 = vmax.f32 %v2222_v55, 0.0 }
 0xd0f   :  { %v2226_v53 = vpop.f32.mrb[58].mxu0 }
 0xd10   :  { %v2227_v10 = vadd.f32 %v7425_v0, %v2226_v53  ;;  %v6233_v50 = vpop.f32.mrb[59].mxu0  ;;  %v7428_v53 = vld [vmem:[#allocation2 + $0xb0] sm:$0xff] }
 0xd12   :  { %v2246_v7 = vmax.f32 %v2227_v10, 0.0 }
 0xd13   :  { %v2231_v33 = vpop.f32.mrb[60].mxu0 }
 0xd14   :  { %v7047_v28 = vpack.c.bf16 %v2246_v7, %v2245_v29  ;;  %v6236_v51 = vpop.f32.mrb[61].mxu0  ;;  %v2232_v25 = vadd.f32 %v7426_v9, %v2231_v33  ;;  %v7429_v29 = vld [vmem:[%s9448_s0 + $0x78] sm:$0xff]  ;;  %v7432_v7 = vld [vmem:[%s9448_s0 + $0x80] sm:$0xff]  ;;  %v7436_v9 = vld [vmem:[%s9448_s0 + $0x50] sm:$0xff] }
 0xd15   :  { %v7433_v33 = vld [vmem:[%s9448_s0 + $0x40] sm:$0xff]  ;;  %v7435_v51 = vld [vmem:[#allocation2 + $0xc8] sm:$0xff] }
 0xd16   :  { %7048 = vmatpush3.bf16.msra.mxu0 %v7047_v28  ;;  %v2247_v37 = vmax.f32 %v2232_v25, 0.0  ;;  %v7434_v28 = vld [vmem:[%s9448_s0 + $0x48] sm:$0xff]  ;;  %v7437_v25 = vld [vmem:[%s9448_s0 + $0x58] sm:$0xff] }
 0xd17   :  { %v2236_v24 = vpop.f32.mrb[62].mxu0  ;;  %7049 = vmatprep.subr.bf16.mxu0 %v9514_v60 }
 0xd18   :  { %v2237_v41 = vadd.f32 %v7427_v12, %v2236_v24  ;;  %v6239_v30 = vpop.f32.mrb[63].mxu0  ;;  %v7438_v24 = vld [vmem:[%s9448_s0 + $0x60] sm:$0xff]  ;;  %v7439_v12 = vld [vmem:[%s9448_s0 + $0x68] sm:$0xff] }
 0xd1a   :  { %v2248_v58 = vmax.f32 %v2237_v41, 0.0  ;;  %v7440_v41 = vld [vmem:[%s9448_s0 + $0x70] sm:$0xff] }
 0xd1b   :  { %v2241_v4 = vpop.f32.mrb[64].mxu0 }
 0xd1c   :  { %v7050_v34 = vpack.c.bf16 %v2248_v58, %v2247_v37  ;;  %v2242_v0 = vadd.f32 %v7428_v53, %v2241_v4  ;;  %v6242_v55 = vpop.f32.mrb[65].mxu0  ;;  %v7431_v37 = vld [vmem:[%s9448_s0 + $0x38] sm:$0xff]  ;;  %v2032_v4 = vld [vmem:[#allocation2 + $0x468] sm:$0xff] }
 0xd1e   :  { %v2249_v10 = vmax.f32 %v2242_v0, 0.0  ;;  %7051 = vmatpush3.bf16.msra.mxu0 %v7050_v34  ;;  %v7430_v34 = vld [vmem:[%s9448_s0 + $0x30] sm:$0xff] }
 0xd1f   :  { %6270 = vmatprep.subr.mxu0 %v9516_v31 }
 0xd20   :  { %v7042_v50 = vpack.c.bf16 %v2249_v10, %v2248_v58 }
 0xd22   :  { %7043 = vmatprep.subr.bf16.mxu1 %v7042_v50  ;;  %6271 = vmatpush3.msra.mxu0 %v2249_v10 }
 0xd23   :  { %7045 = vmatpush3.bf16.msra.mxu1 %v7042_v50  ;;  %6273 = vmatmul.mubr.msk.f32.vlgmr.msra.gmra.mrb[66].mxu0 %vm649_vm5, %v7429_v29 }
 0xd24   :  { %6275 = vmatprep.mubr.msk.f32.mxu0 %vm7583_vm0, %v9516_v31  ;;  %7052 = vmatprep.subr.bf16.mxu1 %v9514_v60 }
 0xd25   :  { %7055 = vmatprep.subr.bf16.mxu0 %v9514_v60 }
 0xd26   :  { %6248 = vmatmul.mubr.msk.f32.vlgmr.msra.gmra.mrb[62].mxu1 %vm35_vm1, %v7430_v34  ;;  %7057 = vmatpush3.bf16.msra.mxu0 %v7822_v36 }
 0xd27   :  { %6250 = vmatprep.mubr.msk.f32.mxu1 %vm35_vm1, %v7431_v37  ;;  %6276 = vmatmul.mubr.msk.f32.gmra.mrb[68].mxu0 %vm649_vm5, %v7432_v7 }
 0xd28   :  { %6278 = vmatprep.mubr.msk.f32.mxu0 %vm7583_vm0, %v9516_v31  ;;  %7054 = vmatpush3.bf16.msra.mxu1 %v7785_v63 }
 0xd29   :  { %6291 = vmatprep.subr.mxu1 %v9516_v31  ;;  %7058 = vmatprep.subr.bf16.mxu0 %v9514_v60 }
 0xd2a   :  { %6251 = vmatmul.mubr.msk.f32.gmra.mrb[64].mxu1 %vm35_vm1, %v7433_v33  ;;  %7060 = vmatpush3.bf16.msra.mxu0 %v7825_v39 }
 0xd2b   :  { %6253 = vmatprep.mubr.msk.f32.mxu1 %vm35_vm1, %v7434_v28  ;;  %7061 = vmatprep.subr.bf16.mxu0 %v9514_v60 }
 0xd2c   :  { %6292 = vmatpush3.msra.mxu1 %v7435_v51 }
 0xd2d   :  { %7073 = vmatprep.subr.bf16.mxu1 %v9514_v60 }
 0xd2e   :  { %6254 = vmatmul.mubr.msk.f32.gmra.mrb[66].mxu1 %vm35_vm1, %v7436_v9  ;;  %7063 = vmatpush3.bf16.msra.mxu0 %v7831_v42 }
 0xd2f   :  { %6256 = vmatprep.mubr.msk.f32.mxu1 %vm35_vm1, %v7437_v25  ;;  %7064 = vmatprep.subr.bf16.mxu0 %v9514_v60 }
 0xd32   :  { %6257 = vmatmul.mubr.msk.f32.gmra.mrb[68].mxu1 %vm35_vm1, %v7438_v24  ;;  %7066 = vmatpush3.bf16.msra.mxu0 %v7837_v45 }
 0xd33   :  { %6259 = vmatprep.mubr.msk.f32.mxu1 %vm35_vm1, %v7439_v12  ;;  %7067 = vmatprep.subr.bf16.mxu0 %v9514_v60 }
 0xd36   :  { %6260 = vmatmul.mubr.msk.f32.gmra.mrb[70].mxu1 %vm35_vm1, %v7440_v41  ;;  %7069 = vmatpush3.bf16.msra.mxu0 %v7843_v48 }
 0xd37   :  { %6293 = vmatprep.mubr.msk.f32.mxu1 %vm7583_vm0, %v9516_v31  ;;  %7070 = vmatprep.subr.bf16.mxu0 %v9514_v60 }
 0xd3a   :  { %7072 = vmatpush3.bf16.msra.mxu0 %v7890_v11 }
 0xd3b   :  { %7097 = vmatprep.subr.bf16.mxu0 %v9514_v60 }
 0xd56   :  { %v2029_v30 = vpop.xlane.xlu0 %2028 }
 0xd57   :  { %7353 = vrcp.f32 %v2029_v30 }
 0xd61   :  { %v7354_v58 = vpop.eup %7353 }
 0xd62   :  { %v2031_v53 = vmul.f32 %v7354_v58, %v8386_v1 }
 0xd64   :  { %v2033_v0 = vmul.f32 %v2032_v4, %v2031_v53  ;;  %v7441_v53 = vld [vmem:[%s9448_s0 + $0x90] sm:$0xff] }
 0xd66   :  { %2365 = vxpose.xlu0.b32.start.end [1/1] (short) (narrow) %v2033_v0, 8 }
 0xde6   :  { %v2381_v55 = vpop.trf.xlu0 }
 0xde7   :  { %2398 = vrot.lane.b32.xlu1 %v2381_v55, %s7586_s4 }
 0xdeb   :  { %2403 = vrot.lane.b32.xlu1 %v2033_v0, %s7587_s3 }
 0xdf6   :  { %v2480_v10 = vpop.f32.mrb[66].mxu0 }
 0xdf7   :  { %2529 = vrot.lane.b32.xlu1 %v2480_v10, %s7587_s3  ;;  %v6274_v50 = vpop.f32.mrb[67].mxu0 }
 0xdf9   :  { %v6249_v29 = vpop.f32.mrb[62].mxu1 }
 0xdfa   :  { %v2485_v34 = vpop.f32.mrb[68].mxu0  ;;  %v2316_v37 = vpop.f32.mrb[63].mxu1 }
 0xdfb   :  { %2531 = vrot.lane.b32.xlu1 %v2485_v34, %s7587_s3  ;;  %v6277_v7 = vpop.f32.mrb[69].mxu0 }
 0xdfd   :  { %v8464_v33 = vpop.f32.mrb[64].mxu1 }
 0xdfe   :  { %v8466_v1 = vpop.f32.mrb[65].mxu1 }
 0xe01   :  { %v6255_v28 = vpop.f32.mrb[66].mxu1 }
 0xe02   :  { %2509 = vrot.lane.b32.xlu1 %v6255_v28, %s7582_s20  ;;  %v8469_v51 = vpop.f32.mrb[67].mxu1 }
 0xe05   :  { %v6258_v9 = vpop.f32.mrb[68].mxu1 }
 0xe06   :  { %v2346_v25 = vpop.f32.mrb[69].mxu1  ;;  %2513 = vrot.lane.b32.xlu1 %v6258_v9, %s7582_s20 }
 0xe09   :  { %v6261_v24 = vpop.f32.mrb[70].mxu1 }
 0xe0a   :  { %v2356_v12 = vpop.f32.mrb[71].mxu1  ;;  %2511 = vrot.lane.b32.xlu1 %v2346_v25, %s7582_s20 }
 0xe0b   :  { %2515 = vrot.lane.b32.xlu0 %v2356_v12, %s7582_s20 }
 0xe0e   :  { %2517 = vrot.lane.b32.xlu1 %v6261_v24, %s7582_s20 }
 0xe0f   :  { %2851 = vrot.lane.b32.xlu0 %v8350_v59, %s7586_s4 }
 0xe13   :  { %2866 = vrot.lane.b32.xlu0 %v8350_v59, %s7588_s5 }
 0xe17   :  { %2881 = vrot.lane.b32.xlu0 %v8350_v59, %s7589_s6 }
 0xe1b   :  { %2853 = vrot.lane.b32.xlu0 %v8259_v54, %s7586_s4 }
 0xe1f   :  { %2868 = vrot.lane.b32.xlu0 %v8259_v54, %s7588_s5 }
 0xe23   :  { %2883 = vrot.lane.b32.xlu0 %v8259_v54, %s7589_s6 }
 0xe27   :  { %2855 = vrot.lane.b32.xlu0 %v8270_v38, %s7586_s4 }
 0xe2b   :  { %2870 = vrot.lane.b32.xlu0 %v8270_v38, %s7588_s5 }
 0xe2f   :  { %2885 = vrot.lane.b32.xlu0 %v8270_v38, %s7589_s6 }
 0xe33   :  { %2857 = vrot.lane.b32.xlu0 %v8282_v13, %s7586_s4 }
 0xe37   :  { %2872 = vrot.lane.b32.xlu0 %v8282_v13, %s7588_s5 }
 0xe3b   :  { %2887 = vrot.lane.b32.xlu0 %v8282_v13, %s7589_s6 }
 0xe59   :  { %v2399_v41 = vpop.permute.xlu1 %2398 }
 0xe5a   :  { %v2401_v30 = vsel %vm209_vm3, 0.0, %v2399_v41 }
 0xe5b   :  { %6279 = vmatmul.mubr.msk.f32.gmra.mrb[70].mxu0 %vm649_vm5, %v2401_v30 }
 0xe5c   :  { %6281 = vmatprep.mubr.msk.f32.mxu0 %vm7583_vm0, %v9516_v31 }
 0xe5d   :  { %v2404_v58 = vpop.permute.xlu1 %2403 }
 0xe5e   :  { %v2406_v4 = vsel %vm35_vm1, 0.0, %v2404_v58 }
 0xe5f   :  { %6282 = vmatmul.mubr.msk.f32.gmra.mrb[72].mxu0 %vm649_vm5, %v7441_v53  ;;  %v2407_v0 = vsel %vm813_vm6, %v2406_v4, 0.0  ;;  %v8551_v53 = vld [vmem:[#allocation2 + $0xd0] ss:$0 sm:$0xff] }
 0xe60   :  { %6284 = vmatprep.mubr.msk.f32.mxu0 %vm7583_vm0, %v9516_v31 }
 0xe63   :  { %6285 = vmatmul.mubr.msk.f32.gmra.mrb[74].mxu0 %vm649_vm5, %v2407_v0 }
 0xe64   :  { %6332 = vmatprep.mubr.msk.f32.mxu0 %vm7583_vm0, %v9516_v31 }
 0xe69   :  { %v2530_v55 = vpop.permute.xlu1 %2529 }
 0xe6d   :  { %v2532_v10 = vpop.permute.xlu1 %2531 }
 0xe74   :  { %v2510_v50 = vpop.permute.xlu1 %2509 }
 0xe75   :  { %v2544_v34 = vsel %vm124_vm2, %v2316_v37, %v2510_v50  ;;  %v7443_v50 = vld [vmem:[#allocation2 + $0xd8] sm:$0xff] }
 0xe76   :  { %v2549_v7 = vsel %vm35_vm1, %v2544_v34, %v2530_v55 }
 0xe77   :  { %6294 = vmatmul.mubr.msk.f32.vlgmr.msra.gmra.mrb[72].mxu1 %vm813_vm6, %v2549_v7 }
 0xe78   :  { %v8517_v28 = vpop.permute.xlu1 %2513  ;;  %6296 = vmatprep.mubr.msk.f32.mxu1 %vm7583_vm0, %v9516_v31  ;;  %7075 = vmatpush3.bf16.msra.mxu1 %v7983_v16 }
 0xe79   :  { %7076 = vmatprep.subr.bf16.mxu1 %v9514_v60 }
 0xe7c   :  { %v2512_v9 = vpop.permute.xlu1 %2511  ;;  %7078 = vmatpush3.bf16.msra.mxu1 %v7986_v19 }
 0xe7d   :  { %v2545_v25 = vsel %vm124_vm2, %v6249_v29, %v2512_v9  ;;  %7079 = vmatprep.subr.bf16.mxu1 %v9514_v60 }
 0xe7e   :  { %v2550_v37 = vsel %vm35_vm1, %v2545_v25, %v2532_v10 }
 0xe7f   :  { %6297 = vmatmul.mubr.msk.f32.gmra.mrb[74].mxu1 %vm813_vm6, %v2550_v37 }
 0xe80   :  { %6299 = vmatprep.mubr.msk.f32.mxu1 %vm7583_vm0, %v9516_v31  ;;  %7081 = vmatpush3.bf16.msra.mxu1 %v7990_v26 }
 0xe81   :  { %7082 = vmatprep.subr.bf16.mxu1 %v9514_v60 }
 0xe84   :  { %7084 = vmatpush3.bf16.msra.mxu1 %v7994_v35 }
 0xe85   :  { %7085 = vmatprep.subr.bf16.mxu1 %v9514_v60 }
 0xe88   :  { %7087 = vmatpush3.bf16.msra.mxu1 %v7998_v44 }
 0xe89   :  { %7088 = vmatprep.subr.bf16.mxu1 %v9514_v60 }
 0xe8c   :  { %7090 = vmatpush3.bf16.msra.mxu1 %v8003_v52 }
 0xe8d   :  { %7091 = vmatprep.subr.bf16.mxu1 %v9514_v60 }
 0xe90   :  { %7093 = vmatpush3.bf16.msra.mxu1 %v8007_v56  ;;  %v7461_v56 = vld [vmem:[#allocation2 + $0x210] sm:$0xff] }
 0xe91   :  { %7094 = vmatprep.subr.bf16.mxu1 %v9514_v60 }
 0xe94   :  { %7096 = vmatpush3.bf16.msra.mxu1 %v8011_v61 }
 0xe95   :  { %7121 = vmatprep.subr.bf16.mxu1 %v9514_v60 }
 0xf2e   :  { %v2490_v29 = vpop.f32.mrb[70].mxu0 }
 0xf2f   :  { %2533 = vrot.lane.b32.xlu1 %v2490_v29, %s7587_s3  ;;  %v6280_v24 = vpop.f32.mrb[71].mxu0  ;;  %v7444_v29 = vld [vmem:[#allocation2 + $0xe0] sm:$0xff] }
 0xf32   :  { %v2495_v12 = vpop.f32.mrb[72].mxu0 }
 0xf33   :  { %2535 = vrot.lane.b32.xlu1 %v2495_v12, %s7587_s3  ;;  %v6283_v41 = vpop.f32.mrb[73].mxu0  ;;  %v9519_v12 = vld [vmem:[#allocation16_spill] sm:$0xff] }
 0xf34   :  { %v9520_v41 = vld [vmem:[#allocation17_spill] sm:$0xff] }
 0xf36   :  { %v2500_v30 = vpop.f32.mrb[74].mxu0 }
 0xf37   :  { %v6286_v58 = vpop.f32.mrb[75].mxu0  ;;  %2537 = vrot.lane.b32.xlu1 %v2500_v30, %s7587_s3  ;;  %v2518_v30 = vpop.permute.xlu1 %2517 }
 0xf38   :  { %v2546_v58 = vsel %vm124_vm2, %v8466_v1, %v8517_v28  ;;  %v2548_v1 = vsel %vm124_vm2, %v8469_v51, %v2518_v30  ;;  %v7446_v51 = vld [vmem:[#allocation2 + $0x168] sm:$0xff] }
 0xf3b   :  { %2849 = vrot.lane.b32.xlu1 %v8342_v32, %s7586_s4 }
 0xf3f   :  { %2864 = vrot.lane.b32.xlu1 %v8342_v32, %s7588_s5 }
 0xf43   :  { %2879 = vrot.lane.b32.xlu1 %v8342_v32, %s7589_s6 }
 0xf4a   :  { %v2635_v4 = vpop.f32.mrb[72].mxu1 }
 0xf4b   :  { %v2636_v0 = vadd.f32 %v8551_v53, %v2635_v4  ;;  %v6295_v55 = vpop.f32.mrb[73].mxu1 }
 0xf4c   :  { %v2516_v55 = vpop.permute.xlu0 %2515 }
 0xf4d   :  { %v2659_v10 = vmax.f32 %v2636_v0, 0.0 }
 0xf4f   :  { %v2664_v34 = vmul.f32 %v7443_v50, %v2659_v10  ;;  %v2547_v10 = vsel %vm124_vm2, %v8464_v33, %v2516_v55 }
 0xf51   :  { %6333 = vmatmul.mubr.msk.f32.vlgmr.msra.gmra.mrb[76].mxu0 %vm951_vm7, %v2664_v34 }
 0xf52   :  { %v2640_v7 = vpop.f32.mrb[74].mxu1  ;;  %6335 = vmatprep.mubr.msk.f32.mxu0 %vm7583_vm0, %v9516_v31  ;;  %7099 = vmatpush3.bf16.msra.mxu0 %v7900_v27 }
 0xf53   :  { %v2641_v9 = vadd.f32 %v8551_v53, %v2640_v7  ;;  %v6298_v25 = vpop.f32.mrb[75].mxu1  ;;  %7100 = vmatprep.subr.bf16.mxu0 %v9514_v60 }
 0xf55   :  { %v2660_v37 = vmax.f32 %v2641_v9, 0.0  ;;  %v7445_v9 = vld [vmem:[#allocation2 + $0x160] sm:$0xff] }
 0xf56   :  { %7102 = vmatpush3.bf16.msra.mxu0 %v7906_v46  ;;  %v7448_v46 = vld [vmem:[#allocation2 + $0xf0] sm:$0xff] }
 0xf57   :  { %v2665_v24 = vmul.f32 %v7444_v29, %v2660_v37  ;;  %7103 = vmatprep.subr.bf16.mxu0 %v9514_v60 }
 0xf59   :  { %6336 = vmatmul.mubr.msk.f32.gmra.mrb[78].mxu0 %vm951_vm7, %v2665_v24 }
 0xf5a   :  { %7105 = vmatpush3.bf16.msra.mxu0 %v7912_v57  ;;  %6338 = vmatprep.mubr.msk.f32.mxu0 %vm7583_vm0, %v9516_v31 }
 0xf5b   :  { %7106 = vmatprep.subr.bf16.mxu0 %v9514_v60 }
 0xf5e   :  { %7108 = vmatpush3.bf16.msra.mxu0 %v7919_v6 }
 0xf5f   :  { %7109 = vmatprep.subr.bf16.mxu0 %v9514_v60 }
 0xf62   :  { %7111 = vmatpush3.bf16.msra.mxu0 %v7926_v23 }
 0xf63   :  { %7112 = vmatprep.subr.bf16.mxu0 %v9514_v60 }
 0xf66   :  { %7114 = vmatpush3.bf16.msra.mxu0 %v7933_v15 }
 0xf67   :  { %7115 = vmatprep.subr.bf16.mxu0 %v9514_v60 }
 0xf6a   :  { %7117 = vmatpush3.bf16.msra.mxu0 %v9519_v12 }
 0xf6b   :  { %7118 = vmatprep.subr.bf16.mxu0 %v9514_v60 }
 0xf6e   :  { %7120 = vmatpush3.bf16.msra.mxu0 %v9520_v41 }
 0xf6f   :  { %7145 = vmatprep.subr.bf16.mxu0 %v9514_v60 }
 0xfa1   :  { %v2534_v4 = vpop.permute.xlu1 %2533 }
 0xfa2   :  { %v2551_v0 = vsel %vm35_vm1, %v2546_v58, %v2534_v4 }
 0xfa3   :  { %6300 = vmatmul.mubr.msk.f32.gmra.mrb[76].mxu1 %vm813_vm6, %v2551_v0  ;;  %v8612_v0 = vpop.permute.xlu0 %2851 }
 0xfa4   :  { %6302 = vmatprep.mubr.msk.f32.mxu1 %vm7583_vm0, %v9516_v31 }
 0xfa5   :  { %v2536_v50 = vpop.permute.xlu1 %2535 }
 0xfa6   :  { %v2552_v34 = vsel %vm35_vm1, %v2547_v10, %v2536_v50 }
 0xfa7   :  { %6303 = vmatmul.mubr.msk.f32.gmra.mrb[78].mxu1 %vm813_vm6, %v2552_v34  ;;  %v2867_v55 = vpop.permute.xlu0 %2866 }
 0xfa8   :  { %6305 = vmatprep.mubr.msk.f32.mxu1 %vm7583_vm0, %v9516_v31 }
 0xfa9   :  { %v2538_v28 = vpop.permute.xlu1 %2537 }
 0xfaa   :  { %v2553_v7 = vsel %vm35_vm1, %v2548_v1, %v2538_v28 }
 0xfab   :  { %6306 = vmatmul.mubr.msk.f32.gmra.mrb[80].mxu1 %vm813_vm6, %v2553_v7  ;;  %v2882_v10 = vpop.permute.xlu0 %2881 }
 0xfac   :  { %6379 = vmatprep.mubr.msk.f32.mxu1 %vm7583_vm0, %v9516_v31 }
 0xfad   :  { %v8618_v7 = vpop.permute.xlu1 %2849 }
 0xfaf   :  { %v8614_v50 = vpop.permute.xlu0 %2853 }
 0xfb3   :  { %v2869_v34 = vpop.permute.xlu0 %2868 }
 0xfb7   :  { %v2884_v1 = vpop.permute.xlu0 %2883 }
 0xfbb   :  { %v8616_v28 = vpop.permute.xlu0 %2855 }
0x1024   :  { %v2750_v33 = vpop.f32.mrb[76].mxu0 }
0x1025   :  { %v2751_v25 = vadd.f32 %v7445_v9, %v2750_v33  ;;  %v6334_v37 = vpop.f32.mrb[77].mxu0 }
0x1026   :  { %v2871_v37 = vpop.permute.xlu0 %2870 }
0x1027   :  { %v8596_v29 = vmax.f32 %v2751_v25, 0.0 }
0x1029   :  { %2784 = vrot.lane.b32.xlu1 %v8596_v29, %s7586_s4 }
0x102a   :  { %v2886_v57 = vpop.permute.xlu0 %2885 }
0x102c   :  { %v2755_v24 = vpop.f32.mrb[78].mxu0 }
0x102d   :  { %2799 = vrot.lane.b32.xlu1 %v8596_v29, %s7588_s5  ;;  %v2756_v30 = vadd.f32 %v7446_v51, %v2755_v24  ;;  %v6337_v58 = vpop.f32.mrb[79].mxu0 }
0x102e   :  { %v7447_v58 = vld [vmem:[#allocation2 + $0xe8] sm:$0xff] }
0x102f   :  { %v8602_v4 = vmax.f32 %v2756_v30, 0.0  ;;  %v2865_v30 = vpop.permute.xlu1 %2864 }
0x1031   :  { %2814 = vrot.lane.b32.xlu1 %v8596_v29, %s7589_s6 }
0x1033   :  { %v2880_v27 = vpop.permute.xlu1 %2879 }
0x1035   :  { %2786 = vrot.lane.b32.xlu1 %v8602_v4, %s7586_s4 }
0x1039   :  { %2801 = vrot.lane.b32.xlu1 %v8602_v4, %s7588_s5 }
0x103d   :  { %2816 = vrot.lane.b32.xlu1 %v8602_v4, %s7589_s6 }
0x1076   :  { %v2645_v33 = vpop.f32.mrb[76].mxu1 }
0x1077   :  { %v2646_v9 = vadd.f32 %v8551_v53, %v2645_v33  ;;  %v6301_v25 = vpop.f32.mrb[77].mxu1 }
0x1079   :  { %v2661_v24 = vmax.f32 %v2646_v9, 0.0 }
0x107a   :  { %v2650_v51 = vpop.f32.mrb[78].mxu1 }
0x107b   :  { %v2666_v41 = vmul.f32 %v7447_v58, %v2661_v24  ;;  %v2651_v12 = vadd.f32 %v8551_v53, %v2650_v51  ;;  %v6304_v15 = vpop.f32.mrb[79].mxu1  ;;  %v8643_v51 = vld [vmem:[#allocation2 + $0x380] sm:$0xff]  ;;  %v8653_v58 = vld [vmem:[#allocation2 + $0x388] sm:$0xff] }
0x107c   :  { %v2894_v15 = vsel %vm209_vm3, %v8342_v32, %v8618_v7 }
0x107d   :  { %v2662_v23 = vmax.f32 %v2651_v12, 0.0  ;;  %6339 = vmatmul.mubr.msk.f32.gmra.mrb[80].mxu0 %vm951_vm7, %v2666_v41  ;;  %v2899_v12 = vsel %vm343_vm4, %v2894_v15, %v2865_v30  ;;  %v7449_v41 = vld [vmem:[#allocation2 + $0xf8] sm:$0xff]  ;;  %v8665_v15 = vld [vmem:[#allocation2 + $0x390] sm:$0xff] }
0x107e   :  { %v2655_v6 = vpop.f32.mrb[80].mxu1  ;;  %6341 = vmatprep.mubr.msk.f32.mxu0 %vm7583_vm0, %v9516_v31 }
0x107f   :  { %v2667_v33 = vmul.f32 %v7448_v46, %v2662_v23  ;;  %v2656_v25 = vadd.f32 %v8551_v53, %v2655_v6  ;;  %v6307_v9 = vpop.f32.mrb[81].mxu1  ;;  %v2904_v46 = vsel %vm951_vm7, %v2899_v12, %v2880_v27  ;;  %v8634_v23 = vpop.permute.xlu0 %2857  ;;  %v2895_v6 = vsel %vm209_vm3, %v8350_v59, %v8612_v0 }
0x1080   :  { %v2900_v53 = vsel %vm343_vm4, %v2895_v6, %v2867_v55  ;;  %v2909_v30 = vmul.f32 %v8643_v51, %v2904_v46  ;;  %v2896_v27 = vsel %vm209_vm3, %v8259_v54, %v8614_v50  ;;  %v2897_v9 = vsel %vm209_vm3, %v8270_v38, %v8616_v28  ;;  %v8676_v46 = vld [vmem:[#allocation2 + $0x398] sm:$0xff] }
0x1081   :  { %v2663_v61 = vmax.f32 %v2656_v25, 0.0  ;;  %6342 = vmatmul.mubr.msk.f32.gmra.mrb[82].mxu0 %vm951_vm7, %v2667_v33  ;;  %v2901_v33 = vsel %vm343_vm4, %v2896_v27, %v2869_v34  ;;  %v2902_v34 = vsel %vm343_vm4, %v2897_v9, %v2871_v37 }
0x1082   :  { %6344 = vmatprep.mubr.msk.f32.mxu0 %vm7583_vm0, %v9516_v31 }
0x1083   :  { %v2668_v24 = vmul.f32 %v7449_v41, %v2663_v61  ;;  %v2905_v61 = vsel %vm951_vm7, %v2900_v53, %v2882_v10  ;;  %v2873_v25 = vpop.permute.xlu0 %2872  ;;  %v2906_v10 = vsel %vm951_vm7, %v2901_v33, %v2884_v1  ;;  %v2907_v1 = vsel %vm951_vm7, %v2902_v34, %v2886_v57  ;;  %v8683_v57 = vld [vmem:[#allocation2 + $0x3a0] sm:$0xff]  ;;  %v9521_v34 = vld [vmem:[#allocation24_spill] sm:$0xff] }
0x1084   :  { %v2910_v55 = vmul.f32 %v8653_v58, %v2905_v61  ;;  %v2911_v12 = vmul.f32 %v8665_v15, %v2906_v10  ;;  %v2912_v6 = vmul.f32 %v8676_v46, %v2907_v1 }
0x1085   :  { %6345 = vmatmul.mubr.msk.f32.gmra.mrb[84].mxu0 %vm951_vm7, %v2668_v24  ;;  %v2898_v24 = vsel %vm209_vm3, %v8282_v13, %v8634_v23 }
0x1086   :  { %6426 = vmatprep.mubr.msk.f32.mxu0 %vm7583_vm0, %v9516_v31  ;;  %v2903_v53 = vsel %vm343_vm4, %v2898_v24, %v2873_v25 }
0x1087   :  { %v2888_v41 = vpop.permute.xlu0 %2887 }
0x1088   :  { %v2908_v37 = vsel %vm951_vm7, %v2903_v53, %v2888_v41  ;;  %v9522_v41 = vld [vmem:[#allocation25_spill] sm:$0xff] }
0x1089   :  { %6427 = vmatmul.mubr.f32.vlgmr.msra.gmra.mrb[86].mxu0 %v2909_v30  ;;  %v2913_v30 = vmul.f32 %v8683_v57, %v2908_v37  ;;  %v9523_v37 = vld [vmem:[#allocation26_spill] sm:$0xff] }
0x108a   :  { %6429 = vmatprep.mubr.msk.f32.mxu0 %vm7583_vm0, %v9516_v31  ;;  %7147 = vmatpush3.bf16.msra.mxu0 %v8229_v3 }
0x108b   :  { %7148 = vmatprep.subr.bf16.mxu0 %v9514_v60 }
0x108d   :  { %6430 = vmatmul.mubr.f32.gmra.mrb[88].mxu0 %v2910_v55 }
0x108e   :  { %6432 = vmatprep.mubr.msk.f32.mxu0 %vm7583_vm0, %v9516_v31  ;;  %7150 = vmatpush3.bf16.msra.mxu0 %v8237_v62 }
0x108f   :  { %7151 = vmatprep.subr.bf16.mxu0 %v9514_v60 }
0x1091   :  { %6433 = vmatmul.mubr.f32.gmra.mrb[90].mxu0 %v2911_v12 }
0x1092   :  { %6435 = vmatprep.mubr.msk.f32.mxu0 %vm7583_vm0, %v9516_v31 }
0x1095   :  { %6436 = vmatmul.mubr.f32.gmra.mrb[92].mxu0 %v2912_v6 }
0x1096   :  { %6438 = vmatprep.mubr.msk.f32.mxu0 %vm7583_vm0, %v9516_v31 }
0x1099   :  { %6439 = vmatmul.mubr.f32.gmra.mrb[94].mxu0 %v2913_v30 }
0x109a   :  { %6496 = vmatprep.mubr.msk.f32.mxu0 %vm7583_vm0, %v9516_v31 }
0x109b   :  { %v2785_v61 = vpop.permute.xlu1 %2784 }
0x109c   :  { %v2829_v27 = vsel %vm209_vm3, %v8596_v29, %v2785_v61  ;;  %v9525_v61 = vld [vmem:[#allocation28_spill] sm:$0xff] }
0x109f   :  { %v2800_v55 = vpop.permute.xlu1 %2799 }
0x10a0   :  { %v2834_v33 = vsel %vm343_vm4, %v2829_v27, %v2800_v55  ;;  %v9526_v27 = vld [vmem:[#allocation29_spill] sm:$0xff]  ;;  %v9527_v55 = vld [vmem:[#allocation30_spill] sm:$0xff] }
0x10a3   :  { %v2815_v25 = vpop.permute.xlu1 %2814 }
0x10a4   :  { %v2839_v10 = vsel %vm951_vm7, %v2834_v33, %v2815_v25  ;;  %v9528_v33 = vld [vmem:[#allocation31_spill] sm:$0xff] }
0x10a5   :  { %v2844_v9 = vmul.f32 %v8643_v51, %v2839_v10  ;;  %v7455_v10 = vld [vmem:[#allocation2 + $0x170] sm:$0xff] }
0x10a7   :  { %6380 = vmatmul.mubr.f32.vlgmr.msra.gmra.mrb[82].mxu1 %v2844_v9  ;;  %v2787_v12 = vpop.permute.xlu1 %2786 }
0x10a8   :  { %6382 = vmatprep.mubr.msk.f32.mxu1 %vm7583_vm0, %v9516_v31  ;;  %7123 = vmatpush3.bf16.msra.mxu1 %v9521_v34  ;;  %v2830_v29 = vsel %vm209_vm3, %v8602_v4, %v2787_v12  ;;  %v9524_v4 = vld [vmem:[#allocation27_spill] sm:$0xff] }
0x10a9   :  { %7124 = vmatprep.subr.bf16.mxu1 %v9514_v60 }
0x10ab   :  { %v2802_v1 = vpop.permute.xlu1 %2801 }
0x10ac   :  { %7126 = vmatpush3.bf16.msra.mxu1 %v9522_v41  ;;  %v2835_v24 = vsel %vm343_vm4, %v2830_v29, %v2802_v1  ;;  %v7460_v41 = vld [vmem:[#allocation2 + $0x2b8] sm:$0xff] }
0x10ad   :  { %7127 = vmatprep.subr.bf16.mxu1 %v9514_v60 }
0x10af   :  { %v2817_v6 = vpop.permute.xlu1 %2816 }
0x10b0   :  { %v2840_v53 = vsel %vm951_vm7, %v2835_v24, %v2817_v6  ;;  %7129 = vmatpush3.bf16.msra.mxu1 %v9523_v37 }
0x10b1   :  { %v2845_v30 = vmul.f32 %v8653_v58, %v2840_v53  ;;  %7130 = vmatprep.subr.bf16.mxu1 %v9514_v60 }
0x10b3   :  { %6383 = vmatmul.mubr.f32.gmra.mrb[84].mxu1 %v2845_v30  ;;  %v7456_v30 = vld [vmem:[#allocation2 + $0x178] sm:$0xff] }
0x10b4   :  { %6385 = vmatprep.mubr.msk.f32.mxu1 %vm7583_vm0, %v9516_v31  ;;  %7132 = vmatpush3.bf16.msra.mxu1 %v9524_v4 }
0x10b5   :  { %7133 = vmatprep.subr.bf16.mxu1 %v9514_v60 }
0x10b8   :  { %7135 = vmatpush3.bf16.msra.mxu1 %v9525_v61 }
0x10b9   :  { %7136 = vmatprep.subr.bf16.mxu1 %v9514_v60 }
0x10bc   :  { %7138 = vmatpush3.bf16.msra.mxu1 %v9526_v27 }
0x10bd   :  { %7139 = vmatprep.subr.bf16.mxu1 %v9514_v60 }
0x10c0   :  { %7141 = vmatpush3.bf16.msra.mxu1 %v9527_v55 }
0x10c1   :  { %7142 = vmatprep.subr.bf16.mxu1 %v9514_v60 }
0x10c4   :  { %7144 = vmatpush3.bf16.msra.mxu1 %v9528_v33  ;;  %v7457_v33 = vld [vmem:[#allocation2 + $0x180] sm:$0xff] }
0x10c5   :  { %6530 = vmatprep.subr.mxu1 %v9516_v31 }
0x1150   :  { %v2760_v25 = vpop.f32.mrb[80].mxu0 }
0x1151   :  { %v2761_v9 = vadd.f32 %v7455_v10, %v2760_v25  ;;  %v6340_v12 = vpop.f32.mrb[81].mxu0 }
0x1153   :  { %v8718_v29 = vmax.f32 %v2761_v9, 0.0 }
0x1154   :  { %v2765_v1 = vpop.f32.mrb[82].mxu0 }
0x1155   :  { %2788 = vrot.lane.b32.xlu1 %v8718_v29, %s7586_s4  ;;  %v6343_v24 = vpop.f32.mrb[83].mxu0  ;;  %v2766_v62 = vadd.f32 %v7456_v30, %v2765_v1 }
0x1157   :  { %v8726_v10 = vmax.f32 %v2766_v62, 0.0 }
0x1158   :  { %v2770_v6 = vpop.f32.mrb[84].mxu0 }
0x1159   :  { %2803 = vrot.lane.b32.xlu1 %v8718_v29, %s7588_s5  ;;  %v6346_v53 = vpop.f32.mrb[85].mxu0  ;;  %v2771_v1 = vadd.f32 %v7457_v33, %v2770_v6  ;;  %v7459_v33 = vld [vmem:[#allocation2 + $0x208] sm:$0xff] }
0x115c   :  { %v3070_v3 = vpop.f32.mrb[86].mxu0 }
0x115d   :  { %2818 = vrot.lane.b32.xlu1 %v8718_v29, %s7589_s6  ;;  %v6428_v25 = vpop.f32.mrb[87].mxu0 }
0x115e   :  { %v2778_v25 = vmax.f32 %v2771_v1, 0.0 }
0x1160   :  { %v3075_v9 = vpop.f32.mrb[88].mxu0 }
0x1161   :  { %2790 = vrot.lane.b32.xlu1 %v8726_v10, %s7586_s4  ;;  %v6431_v12 = vpop.f32.mrb[89].mxu0  ;;  %v3076_v34 = vadd.f32 %v7460_v41, %v3075_v9 }
0x1164   :  { %v8730_v24 = vpop.f32.mrb[90].mxu0 }
0x1165   :  { %2805 = vrot.lane.b32.xlu1 %v8726_v10, %s7588_s5  ;;  %v6434_v53 = vpop.f32.mrb[91].mxu0 }
0x1166   :  { %v7458_v53 = vld [vmem:[#allocation2 + $0x2b0] sm:$0xff] }
0x1167   :  { %v3071_v61 = vadd.f32 %v7458_v53, %v3070_v3 }
0x1168   :  { %v8734_v30 = vpop.f32.mrb[92].mxu0 }
0x1169   :  { %2820 = vrot.lane.b32.xlu1 %v8726_v10, %s7589_s6  ;;  %v6437_v62 = vpop.f32.mrb[93].mxu0 }
0x116c   :  { %v8738_v55 = vpop.f32.mrb[94].mxu0 }
0x116d   :  { %2792 = vrot.lane.b32.xlu1 %v2778_v25, %s7586_s4  ;;  %v6440_v12 = vpop.f32.mrb[95].mxu0 }
0x1171   :  { %2807 = vrot.lane.b32.xlu1 %v2778_v25, %s7588_s5 }
0x1175   :  { %2822 = vrot.lane.b32.xlu1 %v2778_v25, %s7589_s6 }
0x117a   :  { %v2980_v27 = vpop.f32.mrb[82].mxu1 }
0x117b   :  { %v8743_v6 = vadd.f32 %v7459_v33, %v2980_v27  ;;  %v6381_v4 = vpop.f32.mrb[83].mxu1 }
0x117d   :  { %v3094_v37 = vadd.f32 %v3071_v61, %v8743_v6 }
0x117f   :  { %v5308_v62 = vmul.f32 -1.442695, %v3094_v37 }
0x1181   :  { %7355 = vpow2.f32 %v5308_v62 }
0x1186   :  { %v2985_v1 = vpop.f32.mrb[84].mxu1 }
0x1187   :  { %v8746_v12 = vadd.f32 %v7461_v56, %v2985_v1  ;;  %v6384_v52 = vpop.f32.mrb[85].mxu1 }
0x1189   :  { %v3095_v44 = vadd.f32 %v3076_v34, %v8746_v12 }
0x118b   :  { %v7356_v35 = vpop.eup %7355  ;;  %v5309_v26 = vmul.f32 -1.442695, %v3095_v44 }
0x118c   :  { %v3114_v3 = vadd.f32 1.0, %v7356_v35 }
0x118d   :  { %7357 = vpow2.f32 %v5309_v26 }
0x118e   :  { %7359 = vrcp.f32 %v3114_v3 }
0x1197   :  { %v7358_v27 = vpop.eup %7357 }
0x1198   :  { %v8749_v4 = vpop.eup %7359  ;;  %v3115_v61 = vadd.f32 1.0, %v7358_v27 }
0x1199   :  { %v3129_v37 = vmul.f32 %v8749_v4, %v8618_v7 }
0x119a   :  { %7361 = vrcp.f32 %v3115_v61 }
0x119b   :  { %3154 = vrot.lane.b32.xlu0 %v3129_v37, %s7586_s4  ;;  %3139 = vrot.lane.b32.xlu1 %v3129_v37, %s7589_s6 }
0x119f   :  { %3169 = vrot.lane.b32.xlu1 %v3129_v37, %s7588_s5 }
0x11a4   :  { %v8756_v52 = vpop.eup %7361 }
0x11a5   :  { %v3130_v26 = vmul.f32 %v8756_v52, %v8612_v0 }
0x11a7   :  { %3156 = vrot.lane.b32.xlu1 %v3130_v26, %s7586_s4  ;;  %3141 = vrot.lane.b32.xlu0 %v3130_v26, %s7589_s6 }
0x11ab   :  { %3171 = vrot.lane.b32.xlu0 %v3130_v26, %s7588_s5 }
0x11c7   :  { %v2789_v35 = vpop.permute.xlu1 %2788 }
0x11c8   :  { %v2831_v56 = vsel %vm209_vm3, %v8718_v29, %v2789_v35 }
0x11cb   :  { %v2804_v44 = vpop.permute.xlu1 %2803 }
0x11cc   :  { %v2836_v7 = vsel %vm343_vm4, %v2831_v56, %v2804_v44 }
0x11cf   :  { %v2819_v34 = vpop.permute.xlu1 %2818 }
0x11d0   :  { %v2841_v41 = vsel %vm951_vm7, %v2836_v7, %v2819_v34 }
0x11d1   :  { %v2846_v9 = vmul.f32 %v8665_v15, %v2841_v41 }
0x11d3   :  { %6386 = vmatmul.mubr.f32.gmra.mrb[86].mxu1 %v2846_v9  ;;  %v2791_v0 = vpop.permute.xlu1 %2790 }
0x11d4   :  { %6388 = vmatprep.mubr.msk.f32.mxu1 %vm7583_vm0, %v9516_v31  ;;  %v2832_v33 = vsel %vm209_vm3, %v8726_v10, %v2791_v0 }
0x11d7   :  { %v2806_v53 = vpop.permute.xlu1 %2805 }
0x11d8   :  { %v2837_v62 = vsel %vm343_vm4, %v2832_v33, %v2806_v53 }
0x11db   :  { %v2821_v1 = vpop.permute.xlu1 %2820 }
0x11dc   :  { %v2842_v29 = vsel %vm951_vm7, %v2837_v62, %v2821_v1 }
0x11dd   :  { %v2847_v3 = vmul.f32 %v8676_v46, %v2842_v29 }
0x11df   :  { %6389 = vmatmul.mubr.f32.gmra.mrb[88].mxu1 %v2847_v3  ;;  %v2793_v27 = vpop.permute.xlu1 %2792 }
0x11e0   :  { %6391 = vmatprep.mubr.msk.f32.mxu1 %vm7583_vm0, %v9516_v31  ;;  %v2833_v35 = vsel %vm209_vm3, %v2778_v25, %v2793_v27 }
0x11e3   :  { %v2808_v61 = vpop.permute.xlu1 %2807 }
0x11e4   :  { %v2838_v44 = vsel %vm343_vm4, %v2833_v35, %v2808_v61  ;;  %v7462_v35 = vld [vmem:[#allocation2 + $0x2c0] sm:$0xff] }
0x11e7   :  { %v2823_v56 = vpop.permute.xlu1 %2822 }
0x11e8   :  { %v2843_v10 = vsel %vm951_vm7, %v2838_v44, %v2823_v56  ;;  %v3081_v44 = vadd.f32 %v7462_v35, %v8730_v24  ;;  %v7463_v56 = vld [vmem:[#allocation2 + $0x218] sm:$0xff] }
0x11e9   :  { %v2848_v7 = vmul.f32 %v8683_v57, %v2843_v10 }
0x11eb   :  { %6392 = vmatmul.mubr.f32.gmra.mrb[90].mxu1 %v2848_v7 }
0x11ec   :  { %6473 = vmatprep.mubr.msk.f32.mxu1 %vm7583_vm0, %v9516_v31 }
0x120d   :  { %v3140_v34 = vpop.permute.xlu1 %3139  ;;  %v3155_v41 = vpop.permute.xlu0 %3154 }
0x120e   :  { %v3184_v9 = vsel %vm209_vm3, %v3140_v34, %v3129_v37 }
0x120f   :  { %v3189_v0 = vsel %vm343_vm4, %v3184_v9, %v3155_v41  ;;  %v7464_v9 = vld [vmem:[#allocation2 + $0x2c8] sm:$0xff] }
0x1211   :  { %v3170_v53 = vpop.permute.xlu1 %3169 }
0x1212   :  { %v3194_v25 = vsel %vm951_vm7, %v3189_v0, %v3170_v53  ;;  %v7465_v0 = vld [vmem:[#allocation2 + $0x220] sm:$0xff] }
0x1213   :  { %v3199_v33 = vmul.f32 %v8643_v51, %v3194_v25 }
0x1215   :  { %6474 = vmatmul.mubr.f32.vlgmr.msra.gmra.mrb[92].mxu1 %v3199_v33 }
0x1216   :  { %6476 = vmatprep.mubr.msk.f32.mxu1 %vm7583_vm0, %v9516_v31 }
0x1219   :  { %v3142_v62 = vpop.permute.xlu0 %3141  ;;  %v3157_v1 = vpop.permute.xlu1 %3156 }
0x121a   :  { %v3185_v29 = vsel %vm209_vm3, %v3142_v62, %v3130_v26 }
0x121b   :  { %v3190_v3 = vsel %vm343_vm4, %v3185_v29, %v3157_v1 }
0x121d   :  { %v3172_v27 = vpop.permute.xlu0 %3171 }
0x121e   :  { %v3195_v37 = vsel %vm951_vm7, %v3190_v3, %v3172_v27  ;;  %v7466_v3 = vld [vmem:[#allocation2 + $0x2d0] sm:$0xff] }
0x121f   :  { %v3200_v61 = vmul.f32 %v8653_v58, %v3195_v37  ;;  %v3086_v58 = vadd.f32 %v7464_v9, %v8734_v30  ;;  %v3091_v27 = vadd.f32 %v7466_v3, %v8738_v55  ;;  %v7467_v37 = vld [vmem:[#allocation2 + $0x228] sm:$0xff] }
0x1221   :  { %6477 = vmatmul.mubr.f32.gmra.mrb[94].mxu1 %v3200_v61 }
0x1222   :  { %6479 = vmatprep.mubr.msk.f32.mxu1 %vm7583_vm0, %v9516_v31 }
0x12a6   :  { %v2990_v51 = vpop.f32.mrb[86].mxu1 }
0x12a7   :  { %v8796_v10 = vadd.f32 %v7463_v56, %v2990_v51  ;;  %v6387_v7 = vpop.f32.mrb[87].mxu1 }
0x12a9   :  { %v3096_v26 = vadd.f32 %v3081_v44, %v8796_v10 }
0x12ab   :  { %v5310_v34 = vmul.f32 -1.442695, %v3096_v26 }
0x12ad   :  { %7363 = vpow2.f32 %v5310_v34 }
0x12b2   :  { %v2995_v41 = vpop.f32.mrb[88].mxu1 }
0x12b3   :  { %v8800_v53 = vadd.f32 %v7465_v0, %v2995_v41  ;;  %v6390_v25 = vpop.f32.mrb[89].mxu1 }
0x12b5   :  { %v3097_v33 = vadd.f32 %v3086_v58, %v8800_v53 }
0x12b7   :  { %v7364_v62 = vpop.eup %7363  ;;  %v5311_v24 = vmul.f32 -1.442695, %v3097_v33 }
0x12b8   :  { %v3116_v1 = vadd.f32 1.0, %v7364_v62 }
0x12b9   :  { %7365 = vpow2.f32 %v5311_v24 }
0x12ba   :  { %7367 = vrcp.f32 %v3116_v1 }
0x12be   :  { %v3000_v29 = vpop.f32.mrb[90].mxu1 }
0x12bf   :  { %v8804_v61 = vadd.f32 %v7467_v37, %v3000_v29  ;;  %v6393_v51 = vpop.f32.mrb[91].mxu1 }
0x12c1   :  { %v3098_v30 = vadd.f32 %v3091_v27, %v8804_v61 }
0x12c3   :  { %v7366_v35 = vpop.eup %7365  ;;  %v5312_v44 = vmul.f32 -1.442695, %v3098_v30 }
0x12c4   :  { %v8807_v56 = vpop.eup %7367  ;;  %v3117_v7 = vadd.f32 1.0, %v7366_v35 }
0x12c5   :  { %7369 = vpow2.f32 %v5312_v44  ;;  %v3131_v26 = vmul.f32 %v8807_v56, %v8614_v50 }
0x12c6   :  { %7371 = vrcp.f32 %v3117_v7 }
0x12c7   :  { %3158 = vrot.lane.b32.xlu0 %v3131_v26, %s7586_s4  ;;  %3143 = vrot.lane.b32.xlu1 %v3131_v26, %s7589_s6 }
0x12cb   :  { %3173 = vrot.lane.b32.xlu1 %v3131_v26, %s7588_s5 }
0x12cf   :  { %v7370_v55 = vpop.eup %7369 }
0x12d0   :  { %v8814_v34 = vpop.eup %7371  ;;  %v3118_v41 = vadd.f32 1.0, %v7370_v55 }
0x12d1   :  { %v3132_v9 = vmul.f32 %v8814_v34, %v8616_v28 }
0x12d2   :  { %7373 = vrcp.f32 %v3118_v41 }
0x12d3   :  { %3160 = vrot.lane.b32.xlu1 %v3132_v9, %s7586_s4  ;;  %3145 = vrot.lane.b32.xlu0 %v3132_v9, %s7589_s6 }
0x12d7   :  { %3175 = vrot.lane.b32.xlu0 %v3132_v9, %s7588_s5 }
0x12dc   :  { %v8821_v50 = vpop.eup %7373 }
0x12dd   :  { %v3133_v58 = vmul.f32 %v8821_v50, %v8634_v23 }
0x12df   :  { %3162 = vrot.lane.b32.xlu0 %v3133_v58, %s7586_s4  ;;  %3147 = vrot.lane.b32.xlu1 %v3133_v58, %s7589_s6 }
0x12e3   :  { %3177 = vrot.lane.b32.xlu1 %v3133_v58, %s7588_s5 }
0x12e8   :  { %v3270_v0 = vpop.f32.mrb[92].mxu1 }
0x12e9   :  { %v6475_v28 = vpop.f32.mrb[93].mxu1 }
0x12f4   :  { %v3275_v25 = vpop.f32.mrb[94].mxu1 }
0x12f5   :  { %v6478_v33 = vpop.f32.mrb[95].mxu1 }
0x1339   :  { %v3144_v62 = vpop.permute.xlu1 %3143  ;;  %v3159_v24 = vpop.permute.xlu0 %3158 }
0x133a   :  { %v3186_v1 = vsel %vm209_vm3, %v3144_v62, %v3131_v26 }
0x133b   :  { %v3191_v29 = vsel %vm343_vm4, %v3186_v1, %v3159_v24 }
0x133d   :  { %v3174_v3 = vpop.permute.xlu1 %3173 }
0x133e   :  { %v3196_v27 = vsel %vm951_vm7, %v3191_v29, %v3174_v3 }
0x133f   :  { %v3201_v23 = vmul.f32 %v8665_v15, %v3196_v27 }
0x1341   :  { %6480 = vmatmul.mubr.f32.gmra.mrb[96].mxu1 %v3201_v23 }
0x1342   :  { %6482 = vmatprep.mubr.msk.f32.mxu1 %vm7583_vm0, %v9516_v31 }
0x1345   :  { %v3146_v37 = vpop.permute.xlu0 %3145  ;;  %v3161_v51 = vpop.permute.xlu1 %3160 }
0x1346   :  { %v3187_v30 = vsel %vm209_vm3, %v3146_v37, %v3132_v9 }
0x1347   :  { %v3192_v35 = vsel %vm343_vm4, %v3187_v30, %v3161_v51 }
0x1349   :  { %v3176_v44 = vpop.permute.xlu0 %3175 }
0x134a   :  { %v3197_v7 = vsel %vm951_vm7, %v3192_v35, %v3176_v44 }
0x134b   :  { %v3202_v26 = vmul.f32 %v8676_v46, %v3197_v7 }
0x134d   :  { %6483 = vmatmul.mubr.f32.gmra.mrb[98].mxu1 %v3202_v26 }
0x134e   :  { %6485 = vmatprep.mubr.msk.f32.mxu1 %vm7583_vm0, %v9516_v31 }
0x1351   :  { %v3148_v15 = vpop.permute.xlu1 %3147  ;;  %v3163_v55 = vpop.permute.xlu0 %3162 }
0x1352   :  { %v3188_v41 = vsel %vm209_vm3, %v3148_v15, %v3133_v58 }
0x1353   :  { %v3193_v28 = vsel %vm343_vm4, %v3188_v41, %v3163_v55 }
0x1355   :  { %v3178_v33 = vpop.permute.xlu1 %3177 }
0x1356   :  { %v3198_v9 = vsel %vm951_vm7, %v3193_v28, %v3178_v33 }
0x1357   :  { %v3203_v62 = vmul.f32 %v8683_v57, %v3198_v9 }
0x1359   :  { %6486 = vmatmul.mubr.f32.gmra.mrb[100].mxu1 %v3203_v62 }
0x135a   :  { %6532 = vmatprep.mubr.msk.f32.mxu1 %vm7583_vm0, %v9516_v31 }
0x1414   :  { %v3280_v46 = vpop.f32.mrb[96].mxu1 }
0x1415   :  { %3303 = vrot.lane.b32.xlu0 %v3280_v46, %s7588_s5  ;;  %v6481_v24 = vpop.f32.mrb[97].mxu1 }
0x1420   :  { %v3285_v1 = vpop.f32.mrb[98].mxu1 }
0x1421   :  { %3305 = vrot.lane.b32.xlu1 %v3285_v1, %s7588_s5  ;;  %v6484_v29 = vpop.f32.mrb[99].mxu1 }
0x142c   :  { %v3290_v58 = vpop.f32.mrb[100].mxu1 }
0x142d   :  { %3307 = vrot.lane.b32.xlu0 %v3290_v58, %s7588_s5  ;;  %v6487_v3 = vpop.f32.mrb[101].mxu1 }
0x1487   :  { %v3304_v27 = vpop.permute.xlu0 %3303 }
0x1488   :  { %v3316_v23 = vadd.f32 %v3304_v27, %v8796_v10  ;;  %v7468_v27 = vld [vmem:[#allocation2 + $0x3c8] ss:$0 sm:$0xff] }
0x148a   :  { %v3321_v57 = vadd.f32 %v3316_v23, %v8233_v21 }
0x148c   :  { %7375 = vtanh.f32 %v3321_v57 }
0x1493   :  { %v3306_v37 = vpop.permute.xlu1 %3305 }
0x1494   :  { %v3317_v51 = vadd.f32 %v3306_v37, %v8800_v53  ;;  %v3331_v53 = vsub.f32 1.0, %v8807_v56  ;;  %v7469_v37 = vld [vmem:[#allocation2 + $0x3d0] sm:$0xff] }
0x1496   :  { %v7376_v30 = vpop.eup %7375  ;;  %v3322_v35 = vadd.f32 %v3317_v51, %v8241_v5  ;;  %v3336_v41 = vmul.f32 %v3331_v53, %v8259_v54 }
0x1497   :  { %3348 = vrot.lane.b32.xlu1 %v7376_v30, %s7588_s5 }
0x1498   :  { %7377 = vtanh.f32 %v3322_v35 }
0x149f   :  { %v3308_v44 = vpop.permute.xlu0 %3307 }
0x14a0   :  { %v3318_v7 = vadd.f32 %v3308_v44, %v8804_v61 }
0x14a2   :  { %v7378_v26 = vpop.eup %7377  ;;  %v3323_v15 = vadd.f32 %v3318_v7, %v8246_v22  ;;  %v7470_v7 = vld [vmem:[#allocation2 + $0x3d8] sm:$0xff] }
0x14a3   :  { %3350 = vrot.lane.b32.xlu0 %v7378_v26, %s7588_s5 }
0x14a4   :  { %7379 = vtanh.f32 %v3323_v15 }
0x14a7   :  { %3299 = vrot.lane.b32.xlu0 %v3270_v0, %s7588_s5  ;;  %v3332_v0 = vsub.f32 1.0, %v8814_v34 }
0x14ae   :  { %v7380_v10 = vpop.eup %7379 }
0x14af   :  { %3352 = vrot.lane.b32.xlu1 %v7380_v10, %s7588_s5 }
0x14b3   :  { %3301 = vrot.lane.b32.xlu1 %v3275_v25, %s7588_s5 }
0x1509   :  { %v3349_v55 = vpop.permute.xlu1 %3348 }
0x150a   :  { %v3361_v61 = vmul.f32 %v8807_v56, %v3349_v55  ;;  %v3337_v56 = vmul.f32 %v3332_v0, %v8270_v38 }
0x150c   :  { %v8863_v28 = vadd.f32 %v3361_v61, %v3336_v41 }
0x150e   :  { %6497 = vmatmul.mubr.msk.f32.vlgmr.msra.gmra.mrb[96].mxu0 %vm209_vm3, %v8863_v28 }
0x150f   :  { %6499 = vmatprep.mubr.msk.f32.mxu0 %vm7583_vm0, %v9516_v31  ;;  %7153 = vmatpush3.bf16.msra.mxu0 %v8295_v40 }
0x1510   :  { %7154 = vmatprep.subr.bf16.mxu0 %v9514_v60 }
0x1513   :  { %7156 = vmatpush3.bf16.msra.mxu0 %v8298_v17 }
0x1514   :  { %7157 = vmatprep.subr.bf16.mxu0 %v9514_v60 }
0x1515   :  { %v3351_v54 = vpop.permute.xlu0 %3350 }
0x1516   :  { %v3362_v25 = vmul.f32 %v8814_v34, %v3351_v54  ;;  %v3333_v34 = vsub.f32 1.0, %v8821_v50 }
0x1517   :  { %7159 = vmatpush3.bf16.msra.mxu0 %v8305_v47 }
0x1518   :  { %v8877_v33 = vadd.f32 %v3362_v25, %v3337_v56  ;;  %7160 = vmatprep.subr.bf16.mxu0 %v9514_v60  ;;  %v3338_v24 = vmul.f32 %v3333_v34, %v8282_v13  ;;  %v3330_v25 = vsub.f32 1.0, %v8756_v52 }
0x1519   :  { %v3300_v9 = vpop.permute.xlu0 %3299 }
0x151a   :  { %v3314_v62 = vadd.f32 %v3300_v9, %v8743_v6  ;;  %6500 = vmatmul.mubr.msk.f32.gmra.mrb[98].mxu0 %vm209_vm3, %v8877_v33 }
0x151b   :  { %6502 = vmatprep.mubr.msk.f32.mxu0 %vm7583_vm0, %v9516_v31  ;;  %7162 = vmatpush3.bf16.msra.mxu0 %v8309_v43 }
0x151c   :  { %v3319_v38 = vadd.f32 %v3314_v62, %v8284_v2  ;;  %7163 = vmatprep.subr.bf16.mxu0 %v9514_v60 }
0x151e   :  { %7381 = vtanh.f32 %v3319_v38  ;;  %v3335_v38 = vmul.f32 %v3330_v25, %v8350_v59  ;;  %v7472_v59 = vld [vmem:[%s9448_s0 + $0x28] sm:$0xff] }
0x1521   :  { %v3353_v46 = vpop.permute.xlu1 %3352 }
0x1522   :  { %v3363_v6 = vmul.f32 %v8821_v50, %v3353_v46 }
0x1524   :  { %v8891_v1 = vadd.f32 %v3363_v6, %v3338_v24 }
0x1525   :  { %v3302_v29 = vpop.permute.xlu1 %3301 }
0x1526   :  { %v3315_v58 = vadd.f32 %v3302_v29, %v8746_v12  ;;  %6503 = vmatmul.mubr.msk.f32.gmra.mrb[100].mxu0 %vm209_vm3, %v8891_v1 }
0x1527   :  { %6521 = vmatprep.mubr.msk.f32.mxu0 %vm7583_vm0, %v9516_v31 }
0x1528   :  { %v7382_v2 = vpop.eup %7381  ;;  %v3320_v3 = vadd.f32 %v3315_v58, %v8292_v49  ;;  %v7474_v58 = vld [vmem:[#allocation2 + $0x438] sm:$0xff] }
0x1529   :  { %3344 = vrot.lane.b32.xlu0 %v7382_v2, %s7588_s5 }
0x152a   :  { %7383 = vtanh.f32 %v3320_v3 }
0x1534   :  { %v7384_v13 = vpop.eup %7383 }
0x1535   :  { %3346 = vrot.lane.b32.xlu1 %v7384_v13, %s7588_s5 }
0x159b   :  { %v3345_v55 = vpop.permute.xlu0 %3344 }
0x159c   :  { %v3359_v61 = vmul.f32 %v8749_v4, %v3345_v55  ;;  %v7477_v55 = vld [vmem:[#allocation2 + $0x30] sm:$0xff] }
0x15a7   :  { %v3347_v54 = vpop.permute.xlu1 %3346 }
0x15a8   :  { %v3360_v62 = vmul.f32 %v8756_v52, %v3347_v54  ;;  %v7473_v52 = vld [vmem:[#allocation2 + $0x428] sm:$0xff] }
0x15e1   :  { %v3444_v50 = vpop.f32.mrb[96].mxu0 }
0x15e2   :  { %v3445_v23 = vadd.f32 %v7468_v27, %v3444_v50  ;;  %v6498_v57 = vpop.f32.mrb[97].mxu0 }
0x15e4   :  { %v3458_v12 = vmax.f32 %v3445_v23, 0.0  ;;  %v7475_v23 = vld [vmem:[#allocation2 + $0x20] ss:$0 sm:$0xff] }
0x15e6   :  { %v3461_v51 = vmul.f32 %v7469_v37, %v3458_v12  ;;  %v9529_v37 = vld [vmem:[#allocation8_spill] sm:$0xff] }
0x15e8   :  { %6522 = vmatmul.mubr.msk.f32.vlgmr.msra.gmra.mrb[102].mxu0 %vm343_vm4, %v3461_v51 }
0x15e9   :  { %6524 = vmatprep.mubr.msk.f32.mxu0 %vm7583_vm0, %v9516_v31  ;;  %7165 = vmatpush3.bf16.msra.mxu0 %v7626_v8  ;;  %v3329_v8 = vsub.f32 1.0, %v8749_v4 }
0x15ea   :  { %7166 = vmatprep.subr.bf16.mxu0 %v9514_v60 }
0x15eb   :  { %v3334_v56 = vmul.f32 %v3329_v8, %v8342_v32  ;;  %v8925_v32 = vadd.f32 %v3360_v62, %v3335_v38  ;;  %v7479_v62 = vld [vmem:[#allocation2 + $0x40] sm:$0xff] }
0x15ed   :  { %v3449_v49 = vpop.f32.mrb[98].mxu0  ;;  %7168 = vmatpush3.bf16.msra.mxu0 %v7644_v14  ;;  %v7471_v14 = vld [vmem:[#allocation2 + $0x3e0] sm:$0xff]  ;;  %v8917_v9 = vadd.f32 %v3359_v61, %v3334_v56 }
0x15ee   :  { %v3450_v30 = vadd.f32 %v7468_v27, %v3449_v49  ;;  %v6501_v35 = vpop.f32.mrb[99].mxu0 }
0x15ef   :  { %v9530_v35 = vld [vmem:[#allocation9_spill] sm:$0xff] }
0x15f0   :  { %v3459_v44 = vmax.f32 %v3450_v30, 0.0 }
0x15f2   :  { %v3462_v26 = vmul.f32 %v7470_v7, %v3459_v44  ;;  %v7476_v7 = vld [vmem:[#allocation2 + $0x28] sm:$0xff] }
0x15f4   :  { %6525 = vmatmul.mubr.msk.f32.gmra.mrb[104].mxu0 %vm343_vm4, %v3462_v26 }
0x15f5   :  { %6527 = vmatprep.mubr.msk.f32.mxu0 %vm7583_vm0, %v9516_v31 }
0x15f9   :  { %v3454_v15 = vpop.f32.mrb[100].mxu0 }
0x15fa   :  { %v3455_v10 = vadd.f32 %v7468_v27, %v3454_v15  ;;  %v6504_v53 = vpop.f32.mrb[101].mxu0 }
0x15fc   :  { %v3460_v41 = vmax.f32 %v3455_v10, 0.0 }
0x15fe   :  { %v3463_v0 = vmul.f32 %v7471_v14, %v3460_v41 }
0x1600   :  { %6528 = vmatmul.mubr.msk.f32.gmra.mrb[106].mxu0 %vm343_vm4, %v3463_v0  ;;  %v7478_v0 = vld [vmem:[#allocation2 + $0x38] sm:$0xff] }
0x1601   :  { %6543 = vmatprep.mubr.msk.f32.mxu0 %vm7583_vm0, %v9516_v31 }
0x1604   :  { %6544 = vmatmul.mubr.msk.f32.vlgmr.msra.gmra.mrb[108].mxu0 %vm209_vm3, %v8917_v9 }
0x1605   :  { %6546 = vmatprep.mubr.msk.f32.mxu0 %vm7583_vm0, %v9516_v31 }
0x1608   :  { %6547 = vmatmul.mubr.msk.f32.gmra.mrb[110].mxu0 %vm209_vm3, %v8925_v32 }
0x1609   :  { %6549 = vmatprep.mubr.msk.f32.mxu0 %vm7583_vm0, %v9516_v31 }
0x160c   :  { %6550 = vmatmul.mubr.msk.f32.gmra.mrb[112].mxu0 %vm209_vm3, %v8863_v28 }
0x160d   :  { %6552 = vmatprep.mubr.msk.f32.mxu0 %vm7583_vm0, %v9516_v31 }
0x1610   :  { %6553 = vmatmul.mubr.msk.f32.gmra.mrb[114].mxu0 %vm209_vm3, %v8877_v33 }
0x1611   :  { %6555 = vmatprep.mubr.msk.f32.mxu0 %vm7583_vm0, %v9516_v31 }
0x1614   :  { %6556 = vmatmul.mubr.msk.f32.gmra.mrb[116].mxu0 %vm209_vm3, %v8891_v1 }
0x1615   :  { %6593 = vmatprep.mubr.msk.f32.mxu0 %vm35_vm1, %v7472_v59 }
0x16bb   :  { %v3539_v4 = vpop.f32.mrb[102].mxu0 }
0x16bc   :  { %v3540_v34 = vadd.f32 %v7473_v52, %v3539_v4  ;;  %v6523_v46 = vpop.f32.mrb[103].mxu0  ;;  %v7480_v4 = vld [vmem:[#allocation2 + $0x48] sm:$0xff] }
0x16be   :  { %6531 = vmatpush3.xpose.msk.msra.mxu1 %vm209_vm3, %v3540_v34 }
0x16bf   :  { %7169 = vmatprep.subr.bf16.mxu1 %v9514_v60 }
0x16c7   :  { %v3544_v24 = vpop.f32.mrb[104].mxu0 }
0x16c8   :  { %v6526_v6 = vpop.f32.mrb[105].mxu0 }
0x16d3   :  { %v3548_v29 = vpop.f32.mrb[106].mxu0 }
0x16d4   :  { %v3549_v2 = vadd.f32 %v7474_v58, %v3548_v29  ;;  %v6529_v3 = vpop.f32.mrb[107].mxu0  ;;  %v7481_v58 = vld [vmem:[#allocation2 + $0x90] sm:$0xff] }
0x16d6   :  { %6533 = vmatmul.mubr.msk.f32.vlgmr.msra.gmra.mrb[102].mxu1 %vm209_vm3, %v3549_v2 }
0x16d7   :  { %7171 = vmatpush3.bf16.msra.mxu1 %v7647_v18  ;;  %v3712_v13 = vpop.f32.mrb[108].mxu0  ;;  %6574 = vmatprep.mubr.msk.f32.mxu1 %vm7583_vm0, %v9516_v31 }
0x16d8   :  { %v6545_v50 = vpop.f32.mrb[109].mxu0  ;;  %7172 = vmatprep.subr.bf16.mxu1 %v9514_v60  ;;  %v3713_v57 = vadd.f32 %v7475_v23, %v3712_v13  ;;  %v7482_v13 = vld [vmem:[#allocation2 + $0x98] sm:$0xff] }
0x16da   :  { %v3736_v49 = vmax.f32 %v3713_v57, 0.0 }
0x16db   :  { %7174 = vmatpush3.bf16.msra.mxu1 %v7650_v20  ;;  %v3717_v27 = vpop.f32.mrb[110].mxu0 }
0x16dc   :  { %v6548_v12 = vpop.f32.mrb[111].mxu0  ;;  %7175 = vmatprep.subr.bf16.mxu1 %v9514_v60  ;;  %v3718_v18 = vadd.f32 %v7475_v23, %v3717_v27  ;;  %v3741_v26 = vmul.f32 %v7476_v7, %v3736_v49  ;;  %v7483_v49 = vld [vmem:[#allocation2 + $0xa0] sm:$0xff] }
0x16de   :  { %v3737_v20 = vmax.f32 %v3718_v18, 0.0 }
0x16df   :  { %7177 = vmatpush3.bf16.msra.mxu1 %v9529_v37  ;;  %v3722_v51 = vpop.f32.mrb[112].mxu0 }
0x16e0   :  { %v6551_v30 = vpop.f32.mrb[113].mxu0  ;;  %7178 = vmatprep.subr.bf16.mxu1 %v9514_v60  ;;  %v3723_v15 = vadd.f32 %v7475_v23, %v3722_v51  ;;  %v3742_v8 = vmul.f32 %v7477_v55, %v3737_v20 }
0x16e2   :  { %v3738_v41 = vmax.f32 %v3723_v15, 0.0 }
0x16e3   :  { %7180 = vmatpush3.bf16.msra.mxu1 %v9530_v35  ;;  %v3727_v44 = vpop.f32.mrb[114].mxu0  ;;  %v7484_v35 = vld [vmem:[#allocation2 + $0xa8] sm:$0xff] }
0x16e4   :  { %v6554_v10 = vpop.f32.mrb[115].mxu0  ;;  %7185 = vmatprep.subr.bf16.mxu1 %v9514_v60  ;;  %v3728_v61 = vadd.f32 %v7475_v23, %v3727_v44  ;;  %v3743_v54 = vmul.f32 %v7478_v0, %v3738_v41  ;;  %v7487_v0 = vld [vmem:[%s9448_s0 + $0x30] sm:$0xff] }
0x16e6   :  { %6575 = vmatmul.mubr.msk.f32.vlgmr.msra.gmra.mrb[104].mxu1 %vm343_vm4, %v3741_v26  ;;  %v3739_v56 = vmax.f32 %v3728_v61, 0.0 }
0x16e7   :  { %v3732_v53 = vpop.f32.mrb[116].mxu0  ;;  %6577 = vmatprep.mubr.msk.f32.mxu1 %vm7583_vm0, %v9516_v31 }
0x16e8   :  { %v6557_v14 = vpop.f32.mrb[117].mxu0  ;;  %v3733_v25 = vadd.f32 %v7475_v23, %v3732_v53  ;;  %v3744_v38 = vmul.f32 %v7479_v62, %v3739_v56  ;;  %v7485_v53 = vld [vmem:[#allocation2 + $0xb0] sm:$0xff]  ;;  %v7489_v56 = vld [vmem:[%s9448_s0 + $0x80] sm:$0xff] }
0x16e9   :  { %v7486_v14 = vld [vmem:[%s9448_s0 + $0x78] sm:$0xff]  ;;  %v7493_v62 = vld [vmem:[%s9448_s0 + $0x50] sm:$0xff] }
0x16ea   :  { %6578 = vmatmul.mubr.msk.f32.gmra.mrb[106].mxu1 %vm343_vm4, %v3742_v8  ;;  %v3740_v59 = vmax.f32 %v3733_v25, 0.0  ;;  %v7491_v25 = vld [vmem:[%s9448_s0 + $0x48] sm:$0xff] }
0x16eb   :  { %6580 = vmatprep.mubr.msk.f32.mxu1 %vm7583_vm0, %v9516_v31 }
0x16ec   :  { %v3745_v52 = vmul.f32 %v7480_v4, %v3740_v59  ;;  %v7497_v59 = vld [vmem:[%s9448_s0 + $0x70] sm:$0xff] }
0x16ee   :  { %6581 = vmatmul.mubr.msk.f32.gmra.mrb[108].mxu1 %vm343_vm4, %v3743_v54  ;;  %v7488_v54 = vld [vmem:[%s9448_s0 + $0x38] sm:$0xff] }
0x16ef   :  { %6583 = vmatprep.mubr.msk.f32.mxu1 %vm7583_vm0, %v9516_v31 }
0x16f2   :  { %6584 = vmatmul.mubr.msk.f32.gmra.mrb[110].mxu1 %vm343_vm4, %v3744_v38  ;;  %v7495_v38 = vld [vmem:[%s9448_s0 + $0x60] sm:$0xff] }
0x16f3   :  { %6586 = vmatprep.mubr.msk.f32.mxu1 %vm7583_vm0, %v9516_v31 }
0x16f6   :  { %6587 = vmatmul.mubr.msk.f32.gmra.mrb[112].mxu1 %vm343_vm4, %v3745_v52 }
0x16f7   :  { %6618 = vmatprep.mubr.msk.f32.mxu1 %vm7583_vm0, %v9516_v31 }
0x17a9   :  { %v8973_v34 = vpop.f32.mrb[102].mxu1 }
0x17aa   :  { %v6534_v46 = vpop.f32.mrb[103].mxu1  ;;  %v3628_v24 = vsel %vm124_vm2, %v8973_v34, -inf }
0x17ab   :  { %3629 = vmax.xlane.f32.xlu0 %v3628_v24 }
0x17b9   :  { %v3827_v6 = vpop.f32.mrb[104].mxu1 }
0x17ba   :  { %v6576_v29 = vpop.f32.mrb[105].mxu1  ;;  %v3828_v2 = vadd.f32 %v7481_v58, %v3827_v6  ;;  %v7498_v58 = vld [vmem:[#allocation2 + $0x468] sm:$0xff] }
0x17bc   :  { %v3851_v23 = vmax.f32 %v3828_v2, 0.0 }
0x17bd   :  { %v3832_v3 = vpop.f32.mrb[106].mxu1 }
0x17be   :  { %v3833_v50 = vadd.f32 %v7482_v13, %v3832_v3  ;;  %v6579_v27 = vpop.f32.mrb[107].mxu1 }
0x17c0   :  { %v3852_v57 = vmax.f32 %v3833_v50, 0.0 }
0x17c1   :  { %v3837_v12 = vpop.f32.mrb[108].mxu1 }
0x17c2   :  { %v7186_v37 = vpack.c.bf16 %v3852_v57, %v3851_v23  ;;  %v6582_v51 = vpop.f32.mrb[109].mxu1  ;;  %v3838_v18 = vadd.f32 %v7483_v49, %v3837_v12 }
0x17c4   :  { %7187 = vmatpush3.bf16.msra.mxu1 %v7186_v37  ;;  %v3853_v26 = vmax.f32 %v3838_v18, 0.0 }
0x17c5   :  { %v3842_v30 = vpop.f32.mrb[110].mxu1  ;;  %7188 = vmatprep.subr.bf16.mxu1 %v9514_v60 }
0x17c6   :  { %v3843_v44 = vadd.f32 %v7484_v35, %v3842_v30  ;;  %v6585_v7 = vpop.f32.mrb[111].mxu1 }
0x17c8   :  { %v3854_v20 = vmax.f32 %v3843_v44, 0.0 }
0x17c9   :  { %v3847_v15 = vpop.f32.mrb[112].mxu1 }
0x17ca   :  { %v7189_v10 = vpack.c.bf16 %v3854_v20, %v3853_v26  ;;  %v3848_v55 = vadd.f32 %v7485_v53, %v3847_v15  ;;  %v6588_v8 = vpop.f32.mrb[113].mxu1  ;;  %v7499_v15 = vld [vmem:[%s9448_s0 + $0x90] sm:$0xff] }
0x17cc   :  { %v3855_v41 = vmax.f32 %v3848_v55, 0.0  ;;  %7190 = vmatpush3.bf16.msra.mxu1 %v7189_v10 }
0x17cd   :  { %6616 = vmatprep.subr.mxu1 %v9516_v31 }
0x17ce   :  { %v7181_v61 = vpack.c.bf16 %v3855_v41, %v3854_v20 }
0x17d0   :  { %7182 = vmatprep.subr.bf16.mxu0 %v7181_v61  ;;  %6617 = vmatpush3.msra.mxu1 %v3855_v41 }
0x17d1   :  { %7184 = vmatpush3.bf16.msra.mxu0 %v7181_v61  ;;  %6619 = vmatmul.mubr.msk.f32.vlgmr.msra.gmra.mrb[114].mxu1 %vm649_vm5, %v7486_v14 }
0x17d2   :  { %6621 = vmatprep.mubr.msk.f32.mxu1 %vm7583_vm0, %v9516_v31  ;;  %7191 = vmatprep.subr.bf16.mxu0 %v9514_v60 }
0x17d3   :  { %7194 = vmatprep.subr.bf16.mxu1 %v9514_v60 }
0x17d4   :  { %6594 = vmatmul.mubr.msk.f32.vlgmr.msra.gmra.mrb[118].mxu0 %vm35_vm1, %v7487_v0  ;;  %7196 = vmatpush3.bf16.msra.mxu1 %v7822_v36  ;;  %v7490_v36 = vld [vmem:[%s9448_s0 + $0x40] sm:$0xff] }
0x17d5   :  { %6596 = vmatprep.mubr.msk.f32.mxu0 %vm35_vm1, %v7488_v54  ;;  %6622 = vmatmul.mubr.msk.f32.gmra.mrb[116].mxu1 %vm649_vm5, %v7489_v56  ;;  %v9531_v56 = vld [vmem:[#allocation18_spill] sm:$0xff] }
0x17d6   :  { %6624 = vmatprep.mubr.msk.f32.mxu1 %vm7583_vm0, %v9516_v31  ;;  %7193 = vmatpush3.bf16.msra.mxu0 %v7785_v63  ;;  %v7492_v63 = vld [vmem:[#allocation2 + $0xc8] sm:$0xff] }
0x17d7   :  { %6637 = vmatprep.subr.mxu0 %v9516_v31  ;;  %7197 = vmatprep.subr.bf16.mxu1 %v9514_v60 }
0x17d8   :  { %6597 = vmatmul.mubr.msk.f32.gmra.mrb[120].mxu0 %vm35_vm1, %v7490_v36  ;;  %7199 = vmatpush3.bf16.msra.mxu1 %v7825_v39  ;;  %v7494_v39 = vld [vmem:[%s9448_s0 + $0x58] sm:$0xff] }
0x17d9   :  { %6599 = vmatprep.mubr.msk.f32.mxu0 %vm35_vm1, %v7491_v25  ;;  %7200 = vmatprep.subr.bf16.mxu1 %v9514_v60  ;;  %v9533_v36 = vld [vmem:[#allocation20_spill] sm:$0xff]  ;;  %v9535_v25 = vld [vmem:[#allocation22_spill] sm:$0xff] }
0x17da   :  { %6638 = vmatpush3.msra.mxu0 %v7492_v63  ;;  %v9536_v63 = vld [vmem:[#allocation23_spill] sm:$0xff] }
0x17db   :  { %7212 = vmatprep.subr.bf16.mxu0 %v9514_v60 }
0x17dc   :  { %6600 = vmatmul.mubr.msk.f32.gmra.mrb[122].mxu0 %vm35_vm1, %v7493_v62  ;;  %7202 = vmatpush3.bf16.msra.mxu1 %v7831_v42  ;;  %v7496_v42 = vld [vmem:[%s9448_s0 + $0x68] sm:$0xff]  ;;  %s7590_s0 = smov [#allocation5]  }
0x17dd   :  { %6602 = vmatprep.mubr.msk.f32.mxu0 %vm35_vm1, %v7494_v39  ;;  %7203 = vmatprep.subr.bf16.mxu1 %v9514_v60 }
0x17e0   :  { %6603 = vmatmul.mubr.msk.f32.gmra.mrb[124].mxu0 %vm35_vm1, %v7495_v38  ;;  %7205 = vmatpush3.bf16.msra.mxu1 %v7837_v45 }
0x17e1   :  { %6605 = vmatprep.mubr.msk.f32.mxu0 %vm35_vm1, %v7496_v42  ;;  %7206 = vmatprep.subr.bf16.mxu1 %v9514_v60 }
0x17e4   :  { %6606 = vmatmul.mubr.msk.f32.gmra.mrb[126].mxu0 %vm35_vm1, %v7497_v59  ;;  %7208 = vmatpush3.bf16.msra.mxu1 %v7843_v48 }
0x17e5   :  { %6639 = vmatprep.mubr.msk.f32.mxu0 %vm7583_vm0, %v9516_v31  ;;  %7209 = vmatprep.subr.bf16.mxu1 %v9514_v60 }
0x17e8   :  { %7211 = vmatpush3.bf16.msra.mxu1 %v7890_v11 }
0x17e9   :  { %7260 = vmatprep.subr.bf16.mxu1 %v9514_v60 }
0x1838   :  { %v3630_v45 = vpop.xlane.xlu0 %3629 }
0x1839   :  { %v3631_v4 = vsub.f32 %v8973_v34, %v3630_v45 }
0x183b   :  { %v3632_v52 = vmul.f32 1.442695, %v3631_v4 }
0x183d   :  { %7385 = vpow2.f32 %v3632_v52  ;;  %v9113_v52 = vld [vmem:[#allocation2 + $0xd0] ss:$0 sm:$0xff] }
0x1847   :  { %v7386_v46 = vpop.eup %7385 }
0x1848   :  { %v3634_v24 = vsel %vm124_vm2, %v7386_v46, 0.0 }
0x1849   :  { %3635 = vadd.xlane.f32.xlu1 %v3634_v24 }
0x18a4   :  { %v4086_v27 = vpop.f32.mrb[114].mxu1 }
0x18a5   :  { %v6620_v23 = vpop.f32.mrb[115].mxu1 }
0x18a6   :  { %v7502_v23 = vld [vmem:[#allocation2 + $0xe0] sm:$0xff] }
0x18a7   :  { %v6595_v3 = vpop.f32.mrb[118].mxu0 }
0x18a8   :  { %v3922_v11 = vpop.f32.mrb[119].mxu0  ;;  %v4091_v51 = vpop.f32.mrb[116].mxu1 }
0x18a9   :  { %v6623_v49 = vpop.f32.mrb[117].mxu1 }
0x18aa   :  { %v9541_v49 = vld [vmem:[#allocation28_spill] sm:$0xff] }
0x18ab   :  { %v9048_v13 = vpop.f32.mrb[120].mxu0 }
0x18ac   :  { %v9050_v50 = vpop.f32.mrb[121].mxu0 }
0x18af   :  { %v6601_v34 = vpop.f32.mrb[122].mxu0 }
0x18b0   :  { %v9052_v57 = vpop.f32.mrb[123].mxu0 }
0x18b3   :  { %v6604_v12 = vpop.f32.mrb[124].mxu0 }
0x18b4   :  { %v3952_v37 = vpop.f32.mrb[125].mxu0 }
0x18b7   :  { %v6607_v30 = vpop.f32.mrb[126].mxu0 }
0x18b8   :  { %v3962_v35 = vpop.f32.mrb[127].mxu0 }
0x18d6   :  { %v3636_v6 = vpop.xlane.xlu1 %3635 }
0x18d7   :  { %7387 = vrcp.f32 %v3636_v6 }
0x18e1   :  { %v7388_v48 = vpop.eup %7387 }
0x18e2   :  { %v3638_v29 = vmul.f32 %v7388_v48, %v7386_v46  ;;  %v7501_v48 = vld [vmem:[#allocation2 + $0xd8] sm:$0xff] }
0x18e4   :  { %v3639_v2 = vmul.f32 %v7498_v58, %v3638_v29 }
0x18e6   :  { %3971 = vxpose.xlu0.b32.start.end [1/1] (short) (narrow) %v3639_v2, 8 }
0x1966   :  { %v3987_v18 = vpop.trf.xlu0 }
0x1967   :  { %4004 = vrot.lane.b32.xlu1 %v3987_v18, %s7586_s4  ;;  %v9542_v18 = vld [vmem:[#allocation29_spill] sm:$0xff] }
0x196b   :  { %4009 = vrot.lane.b32.xlu1 %v3639_v2, %s7587_s3  ;;  %v9537_v2 = vld [vmem:[#allocation24_spill] sm:$0xff] }
0x196f   :  { %4115 = vrot.lane.b32.xlu1 %v6601_v34, %s7582_s20 }
0x1973   :  { %4135 = vrot.lane.b32.xlu1 %v4086_v27, %s7587_s3  ;;  %v9538_v27 = vld [vmem:[#allocation25_spill] sm:$0xff] }
0x1977   :  { %4117 = vrot.lane.b32.xlu1 %v3952_v37, %s7582_s20  ;;  %v9539_v37 = vld [vmem:[#allocation26_spill] sm:$0xff] }
0x197b   :  { %4137 = vrot.lane.b32.xlu1 %v4091_v51, %s7587_s3  ;;  %v9540_v51 = vld [vmem:[#allocation27_spill] sm:$0xff] }
0x197f   :  { %4119 = vrot.lane.b32.xlu1 %v6604_v12, %s7582_s20 }
0x1983   :  { %4121 = vrot.lane.b32.xlu1 %v3962_v35, %s7582_s20  ;;  %v9544_v35 = vld [vmem:[#allocation31_spill] sm:$0xff] }
0x1987   :  { %4123 = vrot.lane.b32.xlu1 %v6607_v30, %s7582_s20  ;;  %v9543_v30 = vld [vmem:[#allocation30_spill] sm:$0xff]  ;;  %s5209_s20 = sshll.u32 %s7590_s0, 4  ;;  %s5210_s20 = int_to_ptr.vmem [resolvable:$true] %s5209_s20 }
0x1988   :  { %p7559_p9 = scmp.lt.s32.totalorder %s5210_s20, %s5210_s20 }
0x19d9   :  { %v4005_v44 = vpop.permute.xlu1 %4004 }
0x19da   :  { %v4007_v7 = vsel %vm209_vm3, 0.0, %v4005_v44 }
0x19db   :  { %6625 = vmatmul.mubr.msk.f32.gmra.mrb[118].mxu1 %vm649_vm5, %v4007_v7 }
0x19dc   :  { %6627 = vmatprep.mubr.msk.f32.mxu1 %vm7583_vm0, %v9516_v31 }
0x19dd   :  { %v4010_v26 = vpop.permute.xlu1 %4009 }
0x19de   :  { %v4012_v20 = vsel %vm35_vm1, 0.0, %v4010_v26 }
0x19df   :  { %6628 = vmatmul.mubr.msk.f32.gmra.mrb[120].mxu1 %vm649_vm5, %v7499_v15  ;;  %v4013_v53 = vsel %vm813_vm6, %v4012_v20, 0.0 }
0x19e0   :  { %6630 = vmatprep.mubr.msk.f32.mxu1 %vm7583_vm0, %v9516_v31 }
0x19e1   :  { %v4116_v10 = vpop.permute.xlu1 %4115 }
0x19e2   :  { %v4150_v55 = vsel %vm124_vm2, %v3922_v11, %v4116_v10 }
0x19e3   :  { %6631 = vmatmul.mubr.msk.f32.gmra.mrb[122].mxu1 %vm649_vm5, %v4013_v53 }
0x19e4   :  { %6678 = vmatprep.mubr.msk.f32.mxu1 %vm7583_vm0, %v9516_v31 }
0x19e5   :  { %v4136_v8 = vpop.permute.xlu1 %4135 }
0x19e6   :  { %v4155_v41 = vsel %vm35_vm1, %v4150_v55, %v4136_v8 }
0x19e7   :  { %6640 = vmatmul.mubr.msk.f32.vlgmr.msra.gmra.mrb[128].mxu0 %vm813_vm6, %v4155_v41 }
0x19e8   :  { %6642 = vmatprep.mubr.msk.f32.mxu0 %vm7583_vm0, %v9516_v31  ;;  %7214 = vmatpush3.bf16.msra.mxu0 %v7983_v16  ;;  %v9532_v16 = vld [vmem:[#allocation19_spill] sm:$0xff] }
0x19e9   :  { %v4118_v61 = vpop.permute.xlu1 %4117  ;;  %7215 = vmatprep.subr.bf16.mxu0 %v9514_v60 }
0x19ea   :  { %v4151_v14 = vsel %vm124_vm2, %v6595_v3, %v4118_v61 }
0x19ec   :  { %7217 = vmatpush3.bf16.msra.mxu0 %v7986_v19  ;;  %v9534_v19 = vld [vmem:[#allocation21_spill] sm:$0xff] }
0x19ed   :  { %v4138_v0 = vpop.permute.xlu1 %4137  ;;  %7218 = vmatprep.subr.bf16.mxu0 %v9514_v60 }
0x19ee   :  { %v4156_v54 = vsel %vm35_vm1, %v4151_v14, %v4138_v0  ;;  %v7503_v14 = vld [vmem:[#allocation2 + $0x160] sm:$0xff] }
0x19ef   :  { %6643 = vmatmul.mubr.msk.f32.gmra.mrb[130].mxu0 %vm813_vm6, %v4156_v54 }
0x19f0   :  { %6645 = vmatprep.mubr.msk.f32.mxu0 %vm7583_vm0, %v9516_v31  ;;  %7220 = vmatpush3.bf16.msra.mxu0 %v9531_v56 }
0x19f1   :  { %7221 = vmatprep.subr.bf16.mxu0 %v9514_v60  ;;  %v4120_v44 = vpop.permute.xlu1 %4119 }
0x19f2   :  { %v4152_v26 = vsel %vm124_vm2, %v9050_v50, %v4120_v44 }
0x19f4   :  { %7223 = vmatpush3.bf16.msra.mxu0 %v9532_v16 }
0x19f5   :  { %7224 = vmatprep.subr.bf16.mxu0 %v9514_v60  ;;  %v4122_v7 = vpop.permute.xlu1 %4121 }
0x19f6   :  { %v4153_v53 = vsel %vm124_vm2, %v9048_v13, %v4122_v7  ;;  %v9545_v7 = vld [vmem:[#allocation10_spill] sm:$0xff] }
0x19f8   :  { %7226 = vmatpush3.bf16.msra.mxu0 %v9533_v36  ;;  %v7504_v36 = vld [vmem:[#allocation2 + $0x168] sm:$0xff] }
0x19f9   :  { %7227 = vmatprep.subr.bf16.mxu0 %v9514_v60  ;;  %v4124_v20 = vpop.permute.xlu1 %4123 }
0x19fa   :  { %v4154_v50 = vsel %vm124_vm2, %v9052_v57, %v4124_v20 }
0x19fc   :  { %7229 = vmatpush3.bf16.msra.mxu0 %v9534_v19 }
0x19fd   :  { %7230 = vmatprep.subr.bf16.mxu0 %v9514_v60 }
0x1a00   :  { %7232 = vmatpush3.bf16.msra.mxu0 %v9535_v25 }
0x1a01   :  { %7233 = vmatprep.subr.bf16.mxu0 %v9514_v60 }
0x1a04   :  { %7235 = vmatpush3.bf16.msra.mxu0 %v9536_v63 }
0x1a05   :  { %7236 = vmatprep.subr.bf16.mxu0 %v9514_v60 }
0x1aae   :  { %v4096_v62 = vpop.f32.mrb[118].mxu1 }
0x1aaf   :  { %4139 = vrot.lane.b32.xlu0 %v4096_v62, %s7587_s3  ;;  %v6626_v39 = vpop.f32.mrb[119].mxu1 }
0x1ab2   :  { %v4101_v38 = vpop.f32.mrb[120].mxu1 }
0x1ab3   :  { %4470 = vrot.lane.b32.xlu0 %v8917_v9, %s7588_s5  ;;  %4141 = vrot.lane.b32.xlu1 %v4101_v38, %s7587_s3  ;;  %v6629_v42 = vpop.f32.mrb[121].mxu1 }
0x1ab6   :  { %v4106_v59 = vpop.f32.mrb[122].mxu1 }
0x1ab7   :  { %4457 = vrot.lane.b32.xlu0 %v8925_v32, %s7586_s4  ;;  %4143 = vrot.lane.b32.xlu1 %v4106_v59, %s7587_s3  ;;  %v6632_v45 = vpop.f32.mrb[123].mxu1  ;;  %v7505_v59 = vld [vmem:[#allocation2 + $0xe8] sm:$0xff] }
0x1aba   :  { %v4241_v4 = vpop.f32.mrb[128].mxu0 }
0x1abb   :  { %4455 = vrot.lane.b32.xlu1 %v8917_v9, %s7586_s4  ;;  %v4242_v46 = vadd.f32 %v9113_v52, %v4241_v4  ;;  %v6641_v24 = vpop.f32.mrb[129].mxu0 }
0x1abd   :  { %v4265_v6 = vmax.f32 %v4242_v46, 0.0 }
0x1abf   :  { %4485 = vrot.lane.b32.xlu1 %v8917_v9, %s7589_s6  ;;  %v4270_v29 = vmul.f32 %v7501_v48, %v4265_v6  ;;  %v7506_v48 = vld [vmem:[#allocation2 + $0xf0] sm:$0xff] }
0x1ac1   :  { %6679 = vmatmul.mubr.msk.f32.vlgmr.msra.gmra.mrb[124].mxu1 %vm951_vm7, %v4270_v29 }
0x1ac2   :  { %v4246_v58 = vpop.f32.mrb[130].mxu0  ;;  %6681 = vmatprep.mubr.msk.f32.mxu1 %vm7583_vm0, %v9516_v31  ;;  %7262 = vmatpush3.bf16.msra.mxu1 %v9537_v2 }
0x1ac3   :  { %v4247_v3 = vadd.f32 %v9113_v52, %v4246_v58  ;;  %v6644_v11 = vpop.f32.mrb[131].mxu0  ;;  %7263 = vmatprep.subr.bf16.mxu1 %v9514_v60 }
0x1ac5   :  { %v4266_v34 = vmax.f32 %v4247_v3, 0.0 }
0x1ac6   :  { %7265 = vmatpush3.bf16.msra.mxu1 %v9538_v27 }
0x1ac7   :  { %v4271_v12 = vmul.f32 %v7502_v23, %v4266_v34  ;;  %7266 = vmatprep.subr.bf16.mxu1 %v9514_v60  ;;  %v7507_v34 = vld [vmem:[#allocation2 + $0xf8] sm:$0xff] }
0x1ac9   :  { %6682 = vmatmul.mubr.msk.f32.gmra.mrb[126].mxu1 %vm951_vm7, %v4271_v12 }
0x1aca   :  { %6684 = vmatprep.mubr.msk.f32.mxu1 %vm7583_vm0, %v9516_v31  ;;  %7268 = vmatpush3.bf16.msra.mxu1 %v9539_v37 }
0x1acb   :  { %7269 = vmatprep.subr.bf16.mxu1 %v9514_v60 }
0x1ace   :  { %7271 = vmatpush3.bf16.msra.mxu1 %v9540_v51 }
0x1acf   :  { %7272 = vmatprep.subr.bf16.mxu1 %v9514_v60 }
0x1ad2   :  { %7274 = vmatpush3.bf16.msra.mxu1 %v9541_v49 }
0x1ad3   :  { %7275 = vmatprep.subr.bf16.mxu1 %v9514_v60 }
0x1ad6   :  { %7277 = vmatpush3.bf16.msra.mxu1 %v9542_v18 }
0x1ad7   :  { %7278 = vmatprep.subr.bf16.mxu1 %v9514_v60 }
0x1ada   :  { %7280 = vmatpush3.bf16.msra.mxu1 %v9543_v30  ;;  %v9184_v30 = vld [vmem:[#allocation2 + $0x380] sm:$0xff] }
0x1adb   :  { %7281 = vmatprep.subr.bf16.mxu1 %v9514_v60 }
0x1ade   :  { %7283 = vmatpush3.bf16.msra.mxu1 %v9544_v35 }
0x1adf   :  { %7284 = vmatprep.subr.bf16.mxu1 %v9514_v60 }
0x1b21   :  { %v4140_v15 = vpop.permute.xlu0 %4139 }
0x1b22   :  { %v4157_v10 = vsel %vm35_vm1, %v4152_v26, %v4140_v15  ;;  %v9546_v15 = vld [vmem:[#allocation11_spill] sm:$0xff] }
0x1b23   :  { %6646 = vmatmul.mubr.msk.f32.gmra.mrb[132].mxu0 %vm813_vm6, %v4157_v10 }
0x1b24   :  { %6648 = vmatprep.mubr.msk.f32.mxu0 %vm7583_vm0, %v9516_v31 }
0x1b25   :  { %v4142_v55 = vpop.permute.xlu1 %4141 }
0x1b26   :  { %v4158_v8 = vsel %vm35_vm1, %v4153_v53, %v4142_v55 }
0x1b27   :  { %6649 = vmatmul.mubr.msk.f32.gmra.mrb[134].mxu0 %vm813_vm6, %v4158_v8  ;;  %v9547_v8 = vld [vmem:[#allocation12_spill] sm:$0xff] }
0x1b28   :  { %6651 = vmatprep.mubr.msk.f32.mxu0 %vm7583_vm0, %v9516_v31 }
0x1b29   :  { %v4144_v41 = vpop.permute.xlu1 %4143 }
0x1b2a   :  { %v4159_v61 = vsel %vm35_vm1, %v4154_v50, %v4144_v41  ;;  %v9197_v50 = vld [vmem:[#allocation2 + $0x388] sm:$0xff] }
0x1b2b   :  { %6652 = vmatmul.mubr.msk.f32.gmra.mrb[136].mxu0 %vm813_vm6, %v4159_v61  ;;  %v9548_v61 = vld [vmem:[#allocation13_spill] sm:$0xff] }
0x1b2c   :  { %6725 = vmatprep.mubr.msk.f32.mxu0 %vm7583_vm0, %v9516_v31 }
0x1b2d   :  { %v9171_v3 = vpop.permute.xlu1 %4455 }
0x1b31   :  { %v9179_v23 = vpop.permute.xlu1 %4485 }
0x1b94   :  { %v4356_v13 = vpop.f32.mrb[124].mxu1 }
0x1b95   :  { %v4357_v0 = vadd.f32 %v7503_v14, %v4356_v13  ;;  %v6680_v54 = vpop.f32.mrb[125].mxu1  ;;  %v9549_v13 = vld [vmem:[#allocation14_spill] sm:$0xff]  ;;  %v9550_v14 = vld [vmem:[#allocation15_spill] sm:$0xff] }
0x1b96   :  { %v9552_v54 = vld [vmem:[#allocation17_spill] sm:$0xff] }
0x1b97   :  { %v4380_v56 = vmax.f32 %v4357_v0, 0.0  ;;  %v9551_v0 = vld [vmem:[#allocation16_spill] sm:$0xff] }
0x1b99   :  { %4390 = vrot.lane.b32.xlu1 %v4380_v56, %s7586_s4 }
0x1b9c   :  { %v4361_v16 = vpop.f32.mrb[126].mxu1 }
0x1b9d   :  { %4405 = vrot.lane.b32.xlu1 %v4380_v56, %s7588_s5  ;;  %v4362_v57 = vadd.f32 %v7504_v36, %v4361_v16  ;;  %v6683_v19 = vpop.f32.mrb[127].mxu1  ;;  %v7510_v16 = vld [vmem:[#allocation2 + $0x170] sm:$0xff] }
0x1b9f   :  { %v4381_v25 = vmax.f32 %v4362_v57, 0.0 }
0x1ba1   :  { %4420 = vrot.lane.b32.xlu1 %v4380_v56, %s7589_s6 }
0x1ba5   :  { %4392 = vrot.lane.b32.xlu1 %v4381_v25, %s7586_s4 }
0x1ba9   :  { %4407 = vrot.lane.b32.xlu1 %v4381_v25, %s7588_s5 }
0x1bad   :  { %4422 = vrot.lane.b32.xlu1 %v4381_v25, %s7589_s6 }
0x1bf6   :  { %v4251_v63 = vpop.f32.mrb[132].mxu0 }
0x1bf7   :  { %v4252_v62 = vadd.f32 %v9113_v52, %v4251_v63  ;;  %v6647_v39 = vpop.f32.mrb[133].mxu0  ;;  %v7511_v63 = vld [vmem:[#allocation2 + $0x178] sm:$0xff] }
0x1bf9   :  { %v4267_v38 = vmax.f32 %v4252_v62, 0.0 }
0x1bfa   :  { %v4256_v42 = vpop.f32.mrb[134].mxu0 }
0x1bfb   :  { %v4272_v45 = vmul.f32 %v7505_v59, %v4267_v38  ;;  %v4257_v4 = vadd.f32 %v9113_v52, %v4256_v42  ;;  %v6650_v46 = vpop.f32.mrb[135].mxu0 }
0x1bfd   :  { %v4268_v24 = vmax.f32 %v4257_v4, 0.0  ;;  %6685 = vmatmul.mubr.msk.f32.gmra.mrb[128].mxu1 %vm951_vm7, %v4272_v45  ;;  %v7512_v45 = vld [vmem:[#allocation2 + $0x180] sm:$0xff] }
0x1bfe   :  { %v4261_v6 = vpop.f32.mrb[136].mxu0  ;;  %6687 = vmatprep.mubr.msk.f32.mxu1 %vm7583_vm0, %v9516_v31 }
0x1bff   :  { %v4273_v29 = vmul.f32 %v7506_v48, %v4268_v24  ;;  %v4262_v58 = vadd.f32 %v9113_v52, %v4261_v6  ;;  %v6653_v2 = vpop.f32.mrb[137].mxu0  ;;  %v4471_v24 = vpop.permute.xlu0 %4470 }
0x1c01   :  { %v4269_v11 = vmax.f32 %v4262_v58, 0.0  ;;  %6688 = vmatmul.mubr.msk.f32.gmra.mrb[130].mxu1 %vm951_vm7, %v4273_v29 }
0x1c02   :  { %6690 = vmatprep.mubr.msk.f32.mxu1 %vm7583_vm0, %v9516_v31 }
0x1c03   :  { %v4274_v27 = vmul.f32 %v7507_v34, %v4269_v11  ;;  %v9244_v6 = vpop.permute.xlu0 %4457 }
0x1c05   :  { %6691 = vmatmul.mubr.msk.f32.gmra.mrb[132].mxu1 %vm951_vm7, %v4274_v27 }
0x1c06   :  { %6819 = vmatprep.mubr.msk.f32.mxu1 %vm7583_vm0, %v9516_v31 }
0x1c0b   :  { %v4391_v12 = vpop.permute.xlu1 %4390 }
0x1c0c   :  { %v4435_v52 = vsel %vm209_vm3, %v4380_v56, %v4391_v12  ;;  %v9249_v12 = vld [vmem:[#allocation2 + $0x390] sm:$0xff] }
0x1c0f   :  { %v4406_v37 = vpop.permute.xlu1 %4405 }
0x1c10   :  { %v4440_v51 = vsel %vm343_vm4, %v4435_v52, %v4406_v37 }
0x1c13   :  { %v4421_v49 = vpop.permute.xlu1 %4420 }
0x1c14   :  { %v4445_v18 = vsel %vm951_vm7, %v4440_v51, %v4421_v49 }
0x1c15   :  { %v4450_v35 = vmul.f32 %v9184_v30, %v4445_v18 }
0x1c17   :  { %v4393_v44 = vpop.permute.xlu1 %4392  ;;  %6726 = vmatmul.mubr.f32.vlgmr.msra.gmra.mrb[138].mxu0 %v4450_v35 }
0x1c18   :  { %6728 = vmatprep.mubr.msk.f32.mxu0 %vm7583_vm0, %v9516_v31  ;;  %7238 = vmatpush3.bf16.msra.mxu0 %v9545_v7  ;;  %v4436_v26 = vsel %vm209_vm3, %v4381_v25, %v4393_v44  ;;  %v9257_v44 = vld [vmem:[#allocation2 + $0x398] sm:$0xff] }
0x1c19   :  { %7239 = vmatprep.subr.bf16.mxu0 %v9514_v60 }
0x1c1b   :  { %v4408_v20 = vpop.permute.xlu1 %4407 }
0x1c1c   :  { %7241 = vmatpush3.bf16.msra.mxu0 %v9546_v15  ;;  %v4441_v10 = vsel %vm343_vm4, %v4436_v26, %v4408_v20 }
0x1c1d   :  { %7242 = vmatprep.subr.bf16.mxu0 %v9514_v60 }
0x1c1f   :  { %v4423_v53 = vpop.permute.xlu1 %4422 }
0x1c20   :  { %v4446_v55 = vsel %vm951_vm7, %v4441_v10, %v4423_v53  ;;  %7244 = vmatpush3.bf16.msra.mxu0 %v9547_v8  ;;  %v4500_v10 = vsel %vm209_vm3, %v8917_v9, %v9171_v3  ;;  %v4501_v9 = vsel %vm209_vm3, %v8925_v32, %v9244_v6 }
0x1c21   :  { %v4451_v41 = vmul.f32 %v9197_v50, %v4446_v55  ;;  %7245 = vmatprep.subr.bf16.mxu0 %v9514_v60 }
0x1c23   :  { %6729 = vmatmul.mubr.f32.gmra.mrb[140].mxu0 %v4451_v41 }
0x1c24   :  { %7247 = vmatpush3.bf16.msra.mxu0 %v9548_v61  ;;  %6731 = vmatprep.mubr.msk.f32.mxu0 %vm7583_vm0, %v9516_v31  ;;  %v4505_v61 = vsel %vm343_vm4, %v4500_v10, %v4471_v24 }
0x1c25   :  { %7248 = vmatprep.subr.bf16.mxu0 %v9514_v60 }
0x1c28   :  { %7250 = vmatpush3.bf16.msra.mxu0 %v9549_v13  ;;  %v9269_v13 = vld [vmem:[#allocation2 + $0x3a0] sm:$0xff] }
0x1c29   :  { %7251 = vmatprep.subr.bf16.mxu0 %v9514_v60 }
0x1c2c   :  { %7253 = vmatpush3.bf16.msra.mxu0 %v9550_v14 }
0x1c2d   :  { %7254 = vmatprep.subr.bf16.mxu0 %v9514_v60 }
0x1c30   :  { %7256 = vmatpush3.bf16.msra.mxu0 %v9551_v0  ;;  %v4510_v0 = vsel %vm951_vm7, %v4505_v61, %v9179_v23 }
0x1c31   :  { %7257 = vmatprep.subr.bf16.mxu0 %v9514_v60 }
0x1c34   :  { %7259 = vmatpush3.bf16.msra.mxu0 %v9552_v54 }
0x1c35   :  { %6876 = vmatprep.subr.mxu0 %v9516_v31 }
0x1cd0   :  { %v4366_v56 = vpop.f32.mrb[128].mxu1 }
0x1cd1   :  { %v4367_v36 = vadd.f32 %v7510_v16, %v4366_v56  ;;  %v6686_v57 = vpop.f32.mrb[129].mxu1  ;;  %v4515_v16 = vmul.f32 %v9184_v30, %v4510_v0 }
0x1cd3   :  { %v4382_v19 = vmax.f32 %v4367_v36, 0.0 }
0x1cd4   :  { %v4371_v25 = vpop.f32.mrb[130].mxu1 }
0x1cd5   :  { %v4372_v62 = vadd.f32 %v7511_v63, %v4371_v25  ;;  %4409 = vrot.lane.b32.xlu1 %v4382_v19, %s7588_s5  ;;  %4394 = vrot.lane.b32.xlu0 %v4382_v19, %s7586_s4  ;;  %v6689_v39 = vpop.f32.mrb[131].mxu1 }
0x1cd7   :  { %v4383_v38 = vmax.f32 %v4372_v62, 0.0 }
0x1cd8   :  { %v4376_v42 = vpop.f32.mrb[132].mxu1 }
0x1cd9   :  { %4424 = vrot.lane.b32.xlu0 %v4382_v19, %s7589_s6  ;;  %4396 = vrot.lane.b32.xlu1 %v4383_v38, %s7586_s4  ;;  %v6692_v59 = vpop.f32.mrb[133].mxu1  ;;  %v4377_v4 = vadd.f32 %v7512_v45, %v4376_v42 }
0x1cdb   :  { %v4384_v46 = vmax.f32 %v4377_v4, 0.0 }
0x1cdd   :  { %4411 = vrot.lane.b32.xlu0 %v4383_v38, %s7588_s5  ;;  %4426 = vrot.lane.b32.xlu1 %v4383_v38, %s7589_s6 }
0x1ce1   :  { %4413 = vrot.lane.b32.xlu1 %v4384_v46, %s7588_s5  ;;  %4398 = vrot.lane.b32.xlu0 %v4384_v46, %s7586_s4 }
0x1ce5   :  { %4472 = vrot.lane.b32.xlu1 %v8925_v32, %s7588_s5  ;;  %4428 = vrot.lane.b32.xlu0 %v4384_v46, %s7589_s6 }
0x1ce9   :  { %4459 = vrot.lane.b32.xlu1 %v8863_v28, %s7586_s4  ;;  %4487 = vrot.lane.b32.xlu0 %v8925_v32, %s7589_s6 }
0x1ced   :  { %4489 = vrot.lane.b32.xlu1 %v8863_v28, %s7589_s6  ;;  %4474 = vrot.lane.b32.xlu0 %v8863_v28, %s7588_s5 }
0x1cf1   :  { %4476 = vrot.lane.b32.xlu1 %v8877_v33, %s7588_s5  ;;  %4461 = vrot.lane.b32.xlu0 %v8877_v33, %s7586_s4 }
0x1cf5   :  { %4463 = vrot.lane.b32.xlu1 %v8891_v1, %s7586_s4  ;;  %4491 = vrot.lane.b32.xlu0 %v8877_v33, %s7589_s6 }
0x1cf9   :  { %4493 = vrot.lane.b32.xlu1 %v8891_v1, %s7589_s6  ;;  %4478 = vrot.lane.b32.xlu0 %v8891_v1, %s7588_s5 }
0x1d47   :  { %v4410_v48 = vpop.permute.xlu1 %4409  ;;  %v4395_v29 = vpop.permute.xlu0 %4394 }
0x1d48   :  { %v4437_v58 = vsel %vm209_vm3, %v4382_v19, %v4395_v29 }
0x1d49   :  { %v4442_v2 = vsel %vm343_vm4, %v4437_v58, %v4410_v48 }
0x1d4b   :  { %v4425_v11 = vpop.permute.xlu0 %4424  ;;  %v4397_v34 = vpop.permute.xlu1 %4396 }
0x1d4c   :  { %v4447_v27 = vsel %vm951_vm7, %v4442_v2, %v4425_v11  ;;  %v4438_v37 = vsel %vm209_vm3, %v4383_v38, %v4397_v34 }
0x1d4d   :  { %v4452_v52 = vmul.f32 %v9249_v12, %v4447_v27 }
0x1d4f   :  { %6732 = vmatmul.mubr.f32.gmra.mrb[142].mxu0 %v4452_v52  ;;  %v4412_v51 = vpop.permute.xlu0 %4411  ;;  %v4427_v49 = vpop.permute.xlu1 %4426 }
0x1d50   :  { %v4443_v18 = vsel %vm343_vm4, %v4438_v37, %v4412_v51  ;;  %6734 = vmatprep.mubr.msk.f32.mxu0 %vm7583_vm0, %v9516_v31 }
0x1d51   :  { %v4448_v35 = vsel %vm951_vm7, %v4443_v18, %v4427_v49 }
0x1d52   :  { %v4453_v7 = vmul.f32 %v9257_v44, %v4448_v35 }
0x1d53   :  { %v4414_v26 = vpop.permute.xlu1 %4413  ;;  %v4399_v20 = vpop.permute.xlu0 %4398 }
0x1d54   :  { %v4439_v15 = vsel %vm209_vm3, %v4384_v46, %v4399_v20  ;;  %6735 = vmatmul.mubr.f32.gmra.mrb[144].mxu0 %v4453_v7  ;;  %v7516_v7 = vld [vmem:[#allocation2 + $0x2b0] sm:$0xff] }
0x1d55   :  { %6737 = vmatprep.mubr.msk.f32.mxu0 %vm7583_vm0, %v9516_v31  ;;  %v4444_v55 = vsel %vm343_vm4, %v4439_v15, %v4414_v26  ;;  %v7517_v26 = vld [vmem:[#allocation2 + $0x208] sm:$0xff] }
0x1d56   :  { %v7302_v20 = vadd.f32 %v7517_v26, %v7516_v7 }
0x1d57   :  { %v4473_v53 = vpop.permute.xlu1 %4472  ;;  %v4429_v8 = vpop.permute.xlu0 %4428 }
0x1d58   :  { %v4449_v41 = vsel %vm951_vm7, %v4444_v55, %v4429_v8  ;;  %v4506_v36 = vsel %vm343_vm4, %v4501_v9, %v4473_v53  ;;  %v7518_v55 = vld [vmem:[#allocation2 + $0x2b8] sm:$0xff]  ;;  %v7519_v8 = vld [vmem:[#allocation2 + $0x210] sm:$0xff] }
0x1d59   :  { %v4454_v14 = vmul.f32 %v9269_v13, %v4449_v41  ;;  %v7304_v41 = vadd.f32 %v7519_v8, %v7518_v55 }
0x1d5b   :  { %v9274_v54 = vpop.permute.xlu1 %4459  ;;  %6738 = vmatmul.mubr.f32.gmra.mrb[146].mxu0 %v4454_v14  ;;  %v4488_v56 = vpop.permute.xlu0 %4487 }
0x1d5c   :  { %6772 = vmatprep.mubr.msk.f32.mxu0 %vm7583_vm0, %v9516_v31  ;;  %v4511_v57 = vsel %vm951_vm7, %v4506_v36, %v4488_v56  ;;  %v4502_v23 = vsel %vm209_vm3, %v8863_v28, %v9274_v54  ;;  %v7520_v36 = vld [vmem:[#allocation2 + $0x218] sm:$0xff] }
0x1d5d   :  { %v4516_v32 = vmul.f32 %v9197_v50, %v4511_v57 }
0x1d5f   :  { %v4490_v19 = vpop.permute.xlu1 %4489  ;;  %6773 = vmatmul.mubr.f32.vlgmr.msra.gmra.mrb[138].mxu0 %v4515_v16  ;;  %v4475_v25 = vpop.permute.xlu0 %4474 }
0x1d60   :  { %v4507_v63 = vsel %vm343_vm4, %v4502_v23, %v4475_v25  ;;  %6775 = vmatprep.mubr.msk.f32.mxu0 %vm7583_vm0, %v9516_v31  ;;  %v7521_v23 = vld [vmem:[#allocation2 + $0x2c0] sm:$0xff] }
0x1d61   :  { %v4512_v62 = vsel %vm951_vm7, %v4507_v63, %v4490_v19 }
0x1d62   :  { %v4517_v59 = vmul.f32 %v9249_v12, %v4512_v62  ;;  %v7522_v62 = vld [vmem:[#allocation2 + $0x220] sm:$0xff] }
0x1d63   :  { %v4477_v39 = vpop.permute.xlu1 %4476  ;;  %6776 = vmatmul.mubr.f32.gmra.mrb[140].mxu0 %v4516_v32  ;;  %v9292_v38 = vpop.permute.xlu0 %4461 }
0x1d64   :  { %v4503_v42 = vsel %vm209_vm3, %v8877_v33, %v9292_v38  ;;  %6778 = vmatprep.mubr.msk.f32.mxu0 %vm7583_vm0, %v9516_v31 }
0x1d65   :  { %v4508_v4 = vsel %vm343_vm4, %v4503_v42, %v4477_v39 }
0x1d67   :  { %v9300_v45 = vpop.permute.xlu1 %4463  ;;  %6779 = vmatmul.mubr.f32.gmra.mrb[148].mxu0 %v4517_v59  ;;  %v4492_v46 = vpop.permute.xlu0 %4491  ;;  %v7523_v59 = vld [vmem:[#allocation2 + $0x2c8] sm:$0xff] }
0x1d68   :  { %v4513_v24 = vsel %vm951_vm7, %v4508_v4, %v4492_v46  ;;  %6781 = vmatprep.mubr.msk.f32.mxu0 %vm7583_vm0, %v9516_v31  ;;  %v4504_v29 = vsel %vm209_vm3, %v8891_v1, %v9300_v45 }
0x1d69   :  { %v4518_v48 = vmul.f32 %v9257_v44, %v4513_v24 }
0x1d6b   :  { %v4494_v58 = vpop.permute.xlu1 %4493  ;;  %6782 = vmatmul.mubr.f32.gmra.mrb[150].mxu0 %v4518_v48  ;;  %v4479_v2 = vpop.permute.xlu0 %4478 }
0x1d6c   :  { %v4509_v11 = vsel %vm343_vm4, %v4504_v29, %v4479_v2  ;;  %6784 = vmatprep.mubr.msk.f32.mxu0 %vm7583_vm0, %v9516_v31 }
0x1d6d   :  { %v4514_v34 = vsel %vm951_vm7, %v4509_v11, %v4494_v58  ;;  %v7524_v11 = vld [vmem:[#allocation2 + $0x228] sm:$0xff] }
0x1d6e   :  { %v4519_v27 = vmul.f32 %v9269_v13, %v4514_v34 }
0x1d70   :  { %6785 = vmatmul.mubr.f32.gmra.mrb[152].mxu0 %v4519_v27  ;;  %v7525_v27 = vld [vmem:[#allocation2 + $0x2d0] sm:$0xff] }
0x1d71   :  { %6878 = vmatprep.mubr.msk.f32.mxu0 %vm7583_vm0, %v9516_v31 }
0x1e22   :  { %v4596_v52 = vpop.f32.mrb[142].mxu0 }
0x1e23   :  { %v6733_v37 = vpop.f32.mrb[143].mxu0  ;;  %v9317_v57 = vadd.f32 %v7520_v36, %v4596_v52 }
0x1e27   :  { %v4601_v51 = vpop.f32.mrb[144].mxu0 }
0x1e28   :  { %v6736_v49 = vpop.f32.mrb[145].mxu0  ;;  %v9320_v39 = vadd.f32 %v7522_v62, %v4601_v51 }
0x1e2e   :  { %v4606_v18 = vpop.f32.mrb[146].mxu0 }
0x1e2f   :  { %v6739_v35 = vpop.f32.mrb[147].mxu0  ;;  %v9323_v34 = vadd.f32 %v7524_v11, %v4606_v18 }
0x1e32   :  { %v4676_v15 = vpop.f32.mrb[138].mxu0 }
0x1e33   :  { %v7303_v10 = vadd.f32 %v7302_v20, %v4676_v15  ;;  %v6774_v53 = vpop.f32.mrb[139].mxu0 }
0x1e35   :  { %v5356_v61 = vmul.f32 -1.442695, %v7303_v10 }
0x1e36   :  { %v4681_v14 = vpop.f32.mrb[140].mxu0 }
0x1e37   :  { %7389 = vpow2.f32 %v5356_v61  ;;  %v7305_v0 = vadd.f32 %v7304_v41, %v4681_v14  ;;  %v6777_v56 = vpop.f32.mrb[141].mxu0 }
0x1e39   :  { %v5357_v9 = vmul.f32 -1.442695, %v7305_v0 }
0x1e3a   :  { %v4686_v16 = vpop.f32.mrb[148].mxu0 }
0x1e3b   :  { %7391 = vpow2.f32 %v5357_v9  ;;  %v4687_v19 = vadd.f32 %v7521_v23, %v4686_v16  ;;  %v6780_v25 = vpop.f32.mrb[149].mxu0 }
0x1e3d   :  { %v4702_v63 = vadd.f32 %v4687_v19, %v9317_v57 }
0x1e3e   :  { %v4691_v32 = vpop.f32.mrb[150].mxu0 }
0x1e3f   :  { %v5358_v42 = vmul.f32 -1.442695, %v4702_v63  ;;  %v4692_v4 = vadd.f32 %v7523_v59, %v4691_v32  ;;  %v6783_v46 = vpop.f32.mrb[151].mxu0  ;;  %v9553_v59 = vld [vmem:[#allocation32_spill] sm:$0xff] }
0x1e41   :  { %v7390_v24 = vpop.eup %7389  ;;  %7393 = vpow2.f32 %v5358_v42  ;;  %v4703_v48 = vadd.f32 %v4692_v4, %v9320_v39 }
0x1e42   :  { %v4720_v29 = vadd.f32 1.0, %v7390_v24 }
0x1e43   :  { %v5359_v58 = vmul.f32 -1.442695, %v4703_v48  ;;  %v4696_v2 = vpop.f32.mrb[152].mxu0 }
0x1e44   :  { %7395 = vrcp.f32 %v4720_v29  ;;  %v4697_v52 = vadd.f32 %v7525_v27, %v4696_v2  ;;  %v6786_v37 = vpop.f32.mrb[153].mxu0  ;;  %v9554_v29 = vld [vmem:[#allocation33_spill] sm:$0xff] }
0x1e45   :  { %v7392_v51 = vpop.eup %7391  ;;  %7397 = vpow2.f32 %v5359_v58 }
0x1e46   :  { %v4721_v49 = vadd.f32 1.0, %v7392_v51  ;;  %v4704_v35 = vadd.f32 %v4697_v52, %v9323_v34 }
0x1e48   :  { %7399 = vrcp.f32 %v4721_v49  ;;  %v5360_v7 = vmul.f32 -1.442695, %v4704_v35 }
0x1e4a   :  { %7401 = vpow2.f32 %v5360_v7 }
0x1e4b   :  { %v7394_v26 = vpop.eup %7393 }
0x1e4c   :  { %v4722_v20 = vadd.f32 1.0, %v7394_v26 }
0x1e4e   :  { %v7396_v15 = vpop.eup %7395  ;;  %7403 = vrcp.f32 %v4722_v20 }
0x1e4f   :  { %v7398_v10 = vpop.eup %7397  ;;  %v4735_v18 = vmul.f32 %v7396_v15, %v9171_v3 }
0x1e50   :  { %v4723_v53 = vadd.f32 1.0, %v7398_v10 }
0x1e51   :  { %4760 = vrot.lane.b32.xlu1 %v4735_v18, %s7586_s4  ;;  %4745 = vrot.lane.b32.xlu0 %v4735_v18, %s7589_s6 }
0x1e52   :  { %v7400_v55 = vpop.eup %7399  ;;  %7405 = vrcp.f32 %v4723_v53 }
0x1e53   :  { %v4736_v8 = vmul.f32 %v7400_v55, %v9244_v6 }
0x1e54   :  { %v7402_v41 = vpop.eup %7401 }
0x1e55   :  { %4775 = vrot.lane.b32.xlu0 %v4735_v18, %s7588_s5  ;;  %4747 = vrot.lane.b32.xlu1 %v4736_v8, %s7589_s6  ;;  %v4724_v61 = vadd.f32 1.0, %v7402_v41 }
0x1e57   :  { %7407 = vrcp.f32 %v4724_v61 }
0x1e58   :  { %v9332_v14 = vpop.eup %7403 }
0x1e59   :  { %4762 = vrot.lane.b32.xlu0 %v4736_v8, %s7586_s4  ;;  %4777 = vrot.lane.b32.xlu1 %v4736_v8, %s7588_s5  ;;  %v4737_v3 = vmul.f32 %v9332_v14, %v9274_v54 }
0x1e5c   :  { %v9338_v0 = vpop.eup %7405 }
0x1e5d   :  { %4764 = vrot.lane.b32.xlu1 %v4737_v3, %s7586_s4  ;;  %4749 = vrot.lane.b32.xlu0 %v4737_v3, %s7589_s6  ;;  %v4738_v6 = vmul.f32 %v9338_v0, %v9292_v38 }
0x1e61   :  { %4779 = vrot.lane.b32.xlu0 %v4737_v3, %s7588_s5  ;;  %4751 = vrot.lane.b32.xlu1 %v4738_v6, %s7589_s6  ;;  %v9346_v56 = vpop.eup %7407 }
0x1e62   :  { %v4739_v54 = vmul.f32 %v9346_v56, %v9300_v45 }
0x1e65   :  { %4766 = vrot.lane.b32.xlu0 %v4738_v6, %s7586_s4  ;;  %4781 = vrot.lane.b32.xlu1 %v4738_v6, %s7588_s5 }
0x1e69   :  { %4768 = vrot.lane.b32.xlu1 %v4739_v54, %s7586_s4  ;;  %4753 = vrot.lane.b32.xlu0 %v4739_v54, %s7589_s6  ;;  %s7554_s4 = scalar_lea.vmem %s5210_s20, 128 }
0x1e6a   :  { %p7555_p8 = scmp.ne.s32.totalorder %s5210_s20, %s7554_s4  ;;  %p7560_p10 = scmp.lt.s32.totalorder %s7554_s4, %s7554_s4 }
0x1e6c   :  { %p7561_p11 = por %p7560_p10, %p7559_p9 }
0x1e6d   :  { %4783 = vrot.lane.b32.xlu0 %v4739_v54, %s7588_s5 }
0x1e6e   :  { %p7562_p12 = pnand %p7561_p11, %p7555_p8 }
0x1ec3   :  { %v4761_v38 = vpop.permute.xlu1 %4760  ;;  %v4746_v9 = vpop.permute.xlu0 %4745 }
0x1ec4   :  { %v4790_v16 = vsel %vm209_vm3, %v4746_v9, %v4735_v18 }
0x1ec5   :  { %v4795_v23 = vsel %vm343_vm4, %v4790_v16, %v4761_v38 }
0x1ec7   :  { %v4748_v36 = vpop.permute.xlu1 %4747  ;;  %v4776_v19 = vpop.permute.xlu0 %4775 }
0x1ec8   :  { %v4800_v25 = vsel %vm951_vm7, %v4795_v23, %v4776_v19  ;;  %v4791_v45 = vsel %vm209_vm3, %v4748_v36, %v4736_v8 }
0x1ec9   :  { %v4805_v63 = vmul.f32 %v9184_v30, %v4800_v25 }
0x1ecb   :  { %v4778_v32 = vpop.permute.xlu1 %4777  ;;  %6820 = vmatmul.mubr.f32.vlgmr.msra.gmra.mrb[134].mxu1 %v4805_v63  ;;  %v4763_v62 = vpop.permute.xlu0 %4762 }
0x1ecc   :  { %v4796_v42 = vsel %vm343_vm4, %v4791_v45, %v4763_v62  ;;  %6822 = vmatprep.mubr.msk.f32.mxu1 %vm7583_vm0, %v9516_v31  ;;  %7286 = vmatpush3.bf16.msra.mxu1 %v9553_v59 }
0x1ecd   :  { %v4801_v4 = vsel %vm951_vm7, %v4796_v42, %v4778_v32  ;;  %7287 = vmatprep.subr.bf16.mxu1 %v9514_v60 }
0x1ece   :  { %v4806_v46 = vmul.f32 %v9197_v50, %v4801_v4 }
0x1ecf   :  { %v4765_v24 = vpop.permute.xlu1 %4764  ;;  %v4750_v30 = vpop.permute.xlu0 %4749 }
0x1ed0   :  { %v4792_v48 = vsel %vm209_vm3, %v4750_v30, %v4737_v3  ;;  %6823 = vmatmul.mubr.f32.gmra.mrb[136].mxu1 %v4806_v46 }
0x1ed1   :  { %6825 = vmatprep.mubr.msk.f32.mxu1 %vm7583_vm0, %v9516_v31  ;;  %7289 = vmatpush3.bf16.msra.mxu1 %v9554_v29  ;;  %v4797_v2 = vsel %vm343_vm4, %v4792_v48, %v4765_v24  ;;  %v7526_v48 = vld [vmem:[#allocation2 + $0x3c8] ss:$0 sm:$0xff] }
0x1ed2   :  { %7290 = vmatprep.subr.bf16.mxu1 %v9514_v60 }
0x1ed3   :  { %v4752_v58 = vpop.permute.xlu1 %4751  ;;  %v4780_v11 = vpop.permute.xlu0 %4779 }
0x1ed4   :  { %v4802_v27 = vsel %vm951_vm7, %v4797_v2, %v4780_v11  ;;  %v4793_v52 = vsel %vm209_vm3, %v4752_v58, %v4738_v6 }
0x1ed5   :  { %v4807_v50 = vmul.f32 %v9249_v12, %v4802_v27 }
0x1ed7   :  { %v4782_v37 = vpop.permute.xlu1 %4781  ;;  %6826 = vmatmul.mubr.f32.gmra.mrb[138].mxu1 %v4807_v50  ;;  %v4767_v51 = vpop.permute.xlu0 %4766 }
0x1ed8   :  { %v4798_v49 = vsel %vm343_vm4, %v4793_v52, %v4767_v51  ;;  %6828 = vmatprep.mubr.msk.f32.mxu1 %vm7583_vm0, %v9516_v31 }
0x1ed9   :  { %v4803_v35 = vsel %vm951_vm7, %v4798_v49, %v4782_v37 }
0x1eda   :  { %v4808_v7 = vmul.f32 %v9257_v44, %v4803_v35  ;;  %v7529_v35 = vld [vmem:[#allocation2 + $0x3e0] sm:$0xff] }
0x1edb   :  { %v4754_v26 = vpop.permute.xlu0 %4753  ;;  %v4769_v20 = vpop.permute.xlu1 %4768 }
0x1edc   :  { %v4794_v15 = vsel %vm209_vm3, %v4754_v26, %v4739_v54  ;;  %6829 = vmatmul.mubr.f32.gmra.mrb[140].mxu1 %v4808_v7 }
0x1edd   :  { %6831 = vmatprep.mubr.msk.f32.mxu1 %vm7583_vm0, %v9516_v31  ;;  %v4799_v12 = vsel %vm343_vm4, %v4794_v15, %v4769_v20  ;;  %v7530_v20 = vld [vmem:[#allocation2 + $0x428] sm:$0xff] }
0x1edf   :  { %v4784_v10 = vpop.permute.xlu0 %4783 }
0x1ee0   :  { %v4804_v18 = vsel %vm951_vm7, %v4799_v12, %v4784_v10 }
0x1ee1   :  { %v4809_v53 = vmul.f32 %v9269_v13, %v4804_v18 }
0x1ee3   :  { %6832 = vmatmul.mubr.f32.gmra.mrb[142].mxu1 %v4809_v53 }
0x1ee4   :  { %6842 = vmatprep.mubr.msk.f32.mxu1 %vm7583_vm0, %v9516_v31 }
0x1f9e   :  { %v4876_v44 = vpop.f32.mrb[134].mxu1 }
0x1f9f   :  { %v6821_v55 = vpop.f32.mrb[135].mxu1  ;;  %v7531_v44 = vld [vmem:[#allocation2 + $0x438] sm:$0xff] }
0x1fa3   :  { %v4880_v8 = vpop.f32.mrb[136].mxu1 }
0x1fa4   :  { %v6824_v41 = vpop.f32.mrb[137].mxu1 }
0x1faa   :  { %v4884_v61 = vpop.f32.mrb[138].mxu1 }
0x1fab   :  { %4901 = vrot.lane.b32.xlu1 %v4884_v61, %s7588_s5  ;;  %v6827_v3 = vpop.f32.mrb[139].mxu1 }
0x1faf   :  { %v4889_v6 = vpop.f32.mrb[140].mxu1 }
0x1fb0   :  { %4903 = vrot.lane.b32.xlu0 %v4889_v6, %s7588_s5  ;;  %v6830_v54 = vpop.f32.mrb[141].mxu1 }
0x1fb6   :  { %v4894_v38 = vpop.f32.mrb[142].mxu1 }
0x1fb7   :  { %4905 = vrot.lane.b32.xlu1 %v4894_v38, %s7588_s5  ;;  %v6833_v13 = vpop.f32.mrb[143].mxu1 }
0x201d   :  { %v4902_v9 = vpop.permute.xlu1 %4901 }
0x201e   :  { %v4910_v16 = vadd.f32 %v4902_v9, %v9317_v57  ;;  %v4919_v57 = vsub.f32 1.0, %v9332_v14 }
0x2020   :  { %v4913_v36 = vadd.f32 %v4910_v16, %v8233_v21 }
0x2022   :  { %7409 = vtanh.f32 %v4913_v36  ;;  %v4904_v23 = vpop.permute.xlu0 %4903 }
0x2023   :  { %v4911_v19 = vadd.f32 %v4904_v23, %v9320_v39 }
0x2025   :  { %v4914_v25 = vadd.f32 %v4911_v19, %v8241_v5  ;;  %v4922_v5 = vmul.f32 %v4919_v57, %v8863_v28 }
0x2027   :  { %7411 = vtanh.f32 %v4914_v25 }
0x2029   :  { %v4906_v63 = vpop.permute.xlu1 %4905 }
0x202a   :  { %v4912_v45 = vadd.f32 %v4906_v63, %v9323_v34  ;;  %v4920_v34 = vsub.f32 1.0, %v9338_v0 }
0x202c   :  { %v7410_v32 = vpop.eup %7409  ;;  %v4915_v62 = vadd.f32 %v4912_v45, %v8246_v22  ;;  %v4923_v46 = vmul.f32 %v4920_v34, %v8877_v33 }
0x202d   :  { %4928 = vrot.lane.b32.xlu0 %v7410_v32, %s7588_s5 }
0x202e   :  { %7413 = vtanh.f32 %v4915_v62 }
0x2031   :  { %v7412_v42 = vpop.eup %7411 }
0x2032   :  { %4930 = vrot.lane.b32.xlu1 %v7412_v42, %s7588_s5 }
0x2038   :  { %v7414_v21 = vpop.eup %7413 }
0x2039   :  { %4932 = vrot.lane.b32.xlu0 %v7414_v21, %s7588_s5 }
0x209f   :  { %v4929_v39 = vpop.permute.xlu0 %4928 }
0x20a0   :  { %v4937_v59 = vmul.f32 %v9332_v14, %v4929_v39  ;;  %v4921_v14 = vsub.f32 1.0, %v9346_v56 }
0x20a2   :  { %v4940_v4 = vadd.f32 %v4937_v59, %v4922_v5 }
0x20a4   :  { %6843 = vmatmul.mubr.msk.f32.vlgmr.msra.gmra.mrb[144].mxu1 %vm209_vm3, %v4940_v4  ;;  %v4931_v22 = vpop.permute.xlu1 %4930 }
0x20a5   :  { %v4938_v24 = vmul.f32 %v9338_v0, %v4931_v22  ;;  %6845 = vmatprep.mubr.msk.f32.mxu1 %vm7583_vm0, %v9516_v31  ;;  %7292 = vmatpush3.bf16.msra.mxu1 %v8295_v40  ;;  %v4924_v0 = vmul.f32 %v4921_v14, %v8891_v1  ;;  %v7527_v1 = vld [vmem:[#allocation2 + $0x3d0] sm:$0xff] }
0x20a6   :  { %7293 = vmatprep.subr.bf16.mxu1 %v9514_v60 }
0x20a7   :  { %v4941_v28 = vadd.f32 %v4938_v24, %v4923_v46 }
0x20a9   :  { %6846 = vmatmul.mubr.msk.f32.gmra.mrb[146].mxu1 %vm209_vm3, %v4941_v28 }
0x20aa   :  { %6848 = vmatprep.mubr.msk.f32.mxu1 %vm7583_vm0, %v9516_v31  ;;  %7295 = vmatpush3.bf16.msra.mxu1 %v8298_v17 }
0x20ab   :  { %v4933_v33 = vpop.permute.xlu0 %4932  ;;  %7296 = vmatprep.subr.bf16.mxu1 %v9514_v60 }
0x20ac   :  { %v4939_v30 = vmul.f32 %v9346_v56, %v4933_v33 }
0x20ae   :  { %v4942_v40 = vadd.f32 %v4939_v30, %v4924_v0  ;;  %7298 = vmatpush3.bf16.msra.mxu1 %v8305_v47  ;;  %v7528_v47 = vld [vmem:[#allocation2 + $0x3d8] sm:$0xff] }
0x20af   :  { %7299 = vmatprep.subr.bf16.mxu1 %v9514_v60 }
0x20b0   :  { %6849 = vmatmul.mubr.msk.f32.gmra.mrb[148].mxu1 %vm209_vm3, %v4942_v40 }
0x20b1   :  { %6867 = vmatprep.mubr.msk.f32.mxu1 %vm7583_vm0, %v9516_v31 }
0x20b2   :  { %7301 = vmatpush3.bf16.msra.mxu1 %v8309_v43 }
0x2177   :  { %v5018_v17 = vpop.f32.mrb[144].mxu1 }
0x2178   :  { %v5019_v29 = vadd.f32 %v7526_v48, %v5018_v17  ;;  %v6844_v58 = vpop.f32.mrb[145].mxu1 }
0x217a   :  { %v5032_v2 = vmax.f32 %v5019_v29, 0.0 }
0x217c   :  { %v5035_v11 = vmul.f32 %v7527_v1, %v5032_v2  ;;  %v5023_v56 = vpop.f32.mrb[146].mxu1 }
0x217d   :  { %v5024_v27 = vadd.f32 %v7526_v48, %v5023_v56  ;;  %v6847_v50 = vpop.f32.mrb[147].mxu1 }
0x217e   :  { %6868 = vmatmul.mubr.msk.f32.vlgmr.msra.gmra.mrb[150].mxu1 %vm343_vm4, %v5035_v11 }
0x217f   :  { %v5033_v60 = vmax.f32 %v5024_v27, 0.0  ;;  %6870 = vmatprep.mubr.msk.f32.mxu1 %vm7583_vm0, %v9516_v31 }
0x2181   :  { %v5036_v52 = vmul.f32 %v7528_v47, %v5033_v60 }
0x2183   :  { %v5028_v37 = vpop.f32.mrb[148].mxu1  ;;  %6871 = vmatmul.mubr.msk.f32.gmra.mrb[152].mxu1 %vm343_vm4, %v5036_v52 }
0x2184   :  { %v5029_v43 = vadd.f32 %v7526_v48, %v5028_v37  ;;  %v6850_v51 = vpop.f32.mrb[149].mxu1  ;;  %6873 = vmatprep.mubr.msk.f32.mxu1 %vm7583_vm0, %v9516_v31 }
0x2186   :  { %v5034_v49 = vmax.f32 %v5029_v43, 0.0 }
0x2188   :  { %v5037_v7 = vmul.f32 %v7529_v35, %v5034_v49 }
0x218a   :  { %6874 = vmatmul.mubr.msk.f32.gmra.mrb[154].mxu1 %vm343_vm4, %v5037_v7 }
0x2251   :  { %v5113_v26 = vpop.f32.mrb[150].mxu1 }
0x2252   :  { %v5114_v15 = vadd.f32 %v7530_v20, %v5113_v26  ;;  %v6869_v12 = vpop.f32.mrb[151].mxu1 }
0x2254   :  { %6877 = vmatpush3.xpose.msk.msra.mxu0 %vm209_vm3, %v5114_v15 }
0x2256   :  { %v5118_v10 = vpop.f32.mrb[152].mxu1 }
0x2257   :  { %v6872_v18 = vpop.f32.mrb[153].mxu1 }
0x225d   :  { %v5122_v53 = vpop.f32.mrb[154].mxu1 }
0x225e   :  { %v5123_v55 = vadd.f32 %v7531_v44, %v5122_v53  ;;  %v6875_v8 = vpop.f32.mrb[155].mxu1 }
0x2260   :  { %6879 = vmatmul.mubr.msk.f32.vlgmr.msra.gmra.mrb[154].mxu0 %vm209_vm3, %v5123_v55 }
0x2333   :  { %v5198_v31 = vpop.f32.mrb[154].mxu0 }
0x2334   :  { %5202 = vst.msk [vmem:[#allocation5] sm:$0xff] %vm124_vm2, %v5198_v31  ;;  %v6880_v41 = vpop.f32.mrb[155].mxu0 }
0x2335   :  { %7565 = shalt.err (!%p7562_p12)
}
0x2336   :  { %s7566_s6 = scalar_lea.hbm %s9450_s2, 128 }
0x2337   :  { %p7567_p13 = scmp.ne.s32.totalorder %s9450_s2, %s7566_s6  ;;  %p7570_p0 = scmp.lt.u32.totalorder %s7566_s6, %s9450_s2 }
0x2339   :  { %p7572_p1 = pnand %p7570_p0, %p7567_p13 }
0x233b   :  { %7575 = shalt.err (!%p7572_p1)
}
0x233c   :  { %5212 = dma.vmem_to_hbm [thread:$0]  %s5210_s20, 128, %s9450_s2, [#allocation4]  }
0x233d   :  { %7578 = dma.done.wait [#allocation4], 128  }
0x233e   :  { %7579 = vsyncadd [#allocation4], 4294967168 }
0x233f   :  { %5216 = vsyncpa [#allocation3], 1 }
0x2340   :  { %5217 = vsyncpa [#allocation4], 1 }

</bundles_post_ra>
